<compile_context>
chip_gen: v7x
topology: tpu7x:2x2x1
jax: 0.10.0
libtpu: 0.0.40
codegen_flags: <defaults>
</compile_context>

<pallas_src>
import functools
import numpy as np
import jax
import jax.numpy as jnp
from jax import lax
from jax.experimental import pallas as pl
from jax.experimental.pallas import tpu as pltpu

VMEM = pltpu.MemorySpace.VMEM
_LN_EPS = 1e-5
_BN_EPS = 1e-5
_NEG_INF = -1e30

# ------------------------- in-kernel math helpers --------------------------

_ERF_P = 0.3275911
_ERF_A = (0.254829592, -0.284496736, 1.421413741, -1.453152027, 1.061405429)


def _erf_f32(x):
    # TODO(synk): Mosaic has no erf primitive; Abramowitz & Stegun 7.1.26
    # polynomial (|err| < 1.5e-7, float32-accurate) matches torch.nn.GELU(exact).
    sgn = jnp.where(x >= 0.0, 1.0, -1.0)
    ax = jnp.abs(x)
    t = 1.0 / (1.0 + _ERF_P * ax)
    a1, a2, a3, a4, a5 = _ERF_A
    poly = ((((a5 * t + a4) * t + a3) * t + a2) * t + a1) * t
    return sgn * (1.0 - poly * jnp.exp(-ax * ax))


def _gelu_exact(x):
    return 0.5 * x * (1.0 + _erf_f32(x * 0.7071067811865476))


def _layernorm(x, g, b, eps):
    mu = jnp.mean(x, axis=-1, keepdims=True)
    var = jnp.mean(jnp.square(x - mu), axis=-1, keepdims=True)
    return (x - mu) * jax.lax.rsqrt(var + eps) * g + b


def _batchnorm_relu(x, g, b, eps):
    # BatchNorm1d training-mode normalization (biased batch stats) + ReLU.
    mu = jnp.mean(x, axis=0, keepdims=True)
    var = jnp.mean(jnp.square(x - mu), axis=0, keepdims=True)
    return jnp.maximum((x - mu) * jax.lax.rsqrt(var + eps) * g + b, 0.0)


# ------------------------ fused transformer kernel -------------------------
# grid = (2,)  ->  one grid step per Seq_Transformer (st1 -> s_t, st2 -> c_t).
# Per-layer weights arrive as (depth, ...) slabs; the kernel indexes them with
# a dynamic leading-dim index inside a fori_loop and works on the whole
# (B*N, D) activation slab at once.

def _transformer_kernel(mask_ref, z_ref, embw_ref, embb_ref, ctok_ref,
                        ln1g_ref, ln1b_ref, qkvw_ref, outw_ref, outb_ref,
                        ln2g_ref, ln2b_ref, ff1w_ref, ff1b_ref, ff2w_ref, ff2b_ref,
                        out_ref, x_s, *, heads):
    BN, D = x_s.shape
    B = out_ref.shape[0]
    N = BN // B
    L = N - 1
    dh = D // heads
    depth = ln1g_ref.shape[0]

    # ---- patch embedding: one (B*L, C) @ (C, D) matmul, then slab assembly ----
    e = jnp.dot(z_ref[...], embw_ref[...],
                preferred_element_type=jnp.float32) + embb_ref[...]
    ctok = ctok_ref[...]
    for b in range(B):
        x_s[b * N:b * N + 1, :] = ctok
        x_s[b * N + 1:(b + 1) * N, :] = e[b * L:(b + 1) * L, :]

    mask_bias = mask_ref[...]          # (BN, BN): 0 in-sequence, -1e30 cross-sequence

    def layer_body(l, carry):
        x = x_s[...]                                           # (BN, D)
        # ---- Residual(PreNorm(Attention)) ----
        h = _layernorm(x, ln1g_ref[l], ln1b_ref[l], _LN_EPS)
        # Fused QKV: one (BN, D) @ (D, 3D) matmul; attention scale pre-folded
        # into the q columns at init.
        qkv = jnp.dot(h, qkvw_ref[l], preferred_element_type=jnp.float32)
        ctxs = []
        for hh in range(heads):
            q = qkv[:, hh * dh:(hh + 1) * dh]
            k = qkv[:, D + hh * dh:D + (hh + 1) * dh]
            v = qkv[:, 2 * D + hh * dh:2 * D + (hh + 1) * dh]
            # Block-diagonal attention over the flattened (B*N) axis.
            s = lax.dot_general(q, k, (((1,), (1,)), ((), ())),
                                preferred_element_type=jnp.float32)
            s = s + mask_bias
            s = s - jnp.max(s, axis=-1, keepdims=True)
            p = jnp.exp(s)
            p = p / jnp.sum(p, axis=-1, keepdims=True)
            ctxs.append(jnp.dot(p, v, preferred_element_type=jnp.float32))
        ctx = jnp.concatenate(ctxs, axis=-1)                   # (BN, D)
        attn = jnp.dot(ctx, outw_ref[l],
                       preferred_element_type=jnp.float32) + outb_ref[l]
        x = x + attn
        # ---- Residual(PreNorm(FeedForward)) ----
        hf = _layernorm(x, ln2g_ref[l], ln2b_ref[l], _LN_EPS)
        hf = jnp.dot(hf, ff1w_ref[l], preferred_element_type=jnp.float32) + ff1b_ref[l]
        hf = _gelu_exact(hf)
        hf = jnp.dot(hf, ff2w_ref[l], preferred_element_type=jnp.float32) + ff2b_ref[l]
        x_s[...] = x + hf
        # TODO(synk): nn.Dropout (train mode) treated as identity.
        return carry

    lax.fori_loop(0, depth, layer_body, 0)

    # Class token x[:, 0] per sequence.
    for b in range(B):
        out_ref[b:b + 1, :] = x_s[b * N:b * N + 1, :]


def transformers_fwd(tp, z, heads=4):
    """z: (B, L, C) -> (2, B, D) class-token features: [s_t (st1), c_t (st2)]."""
    B, L, C = z.shape
    D = tp["emb_w"].shape[-1]
    depth = tp["ln1_g"].shape[1]
    F = tp["ff1_w"].shape[-1]
    N = L + 1
    BN = B * N

    z_flat = z.reshape(B * L, C).astype(jnp.float32)
    seq_id = jnp.arange(BN, dtype=jnp.int32) // N
    mask_bias = jnp.where(seq_id[:, None] == seq_id[None, :],
                          jnp.float32(0.0), jnp.float32(_NEG_INF))

    in_specs = [
        pl.BlockSpec((BN, BN), lambda t: (0, 0)),                        # mask (shared)
        pl.BlockSpec((B * L, C), lambda t: (0, 0)),                      # z (shared)
        pl.BlockSpec((None, C, D), lambda t: (t, 0, 0)),                 # emb_w
        pl.BlockSpec((None, 1, D), lambda t: (t, 0, 0)),                 # emb_b
        pl.BlockSpec((None, 1, D), lambda t: (t, 0, 0)),                 # c_token
        pl.BlockSpec((None, depth, 1, D), lambda t: (t, 0, 0, 0)),       # ln1_g
        pl.BlockSpec((None, depth, 1, D), lambda t: (t, 0, 0, 0)),       # ln1_b
        pl.BlockSpec((None, depth, D, 3 * D), lambda t: (t, 0, 0, 0)),   # qkv_w (fused)
        pl.BlockSpec((None, depth, D, D), lambda t: (t, 0, 0, 0)),       # out_w
        pl.BlockSpec((None, depth, 1, D), lambda t: (t, 0, 0, 0)),       # out_b
        pl.BlockSpec((None, depth, 1, D), lambda t: (t, 0, 0, 0)),       # ln2_g
        pl.BlockSpec((None, depth, 1, D), lambda t: (t, 0, 0, 0)),       # ln2_b
        pl.BlockSpec((None, depth, D, F), lambda t: (t, 0, 0, 0)),       # ff1_w
        pl.BlockSpec((None, depth, 1, F), lambda t: (t, 0, 0, 0)),       # ff1_b
        pl.BlockSpec((None, depth, F, D), lambda t: (t, 0, 0, 0)),       # ff2_w
        pl.BlockSpec((None, depth, 1, D), lambda t: (t, 0, 0, 0)),       # ff2_b
    ]
    kernel = functools.partial(_transformer_kernel, heads=heads)
    return pl.pallas_call(
        kernel,
        out_shape=jax.ShapeDtypeStruct((2, B, D), jnp.float32),
        grid_spec=pltpu.PrefetchScalarGridSpec(
            num_scalar_prefetch=0,
            grid=(2,),
            in_specs=in_specs,
            out_specs=pl.BlockSpec((None, B, D), lambda t: (t, 0, 0)),
            scratch_shapes=[pltpu.VMEM((BN, D), jnp.float32)],
        ),
        compiler_params=pltpu.CompilerParams(dimension_semantics=("parallel",)),
    )(mask_bias, z_flat,
      tp["emb_w"], tp["emb_b"], tp["c_token"],
      tp["ln1_g"], tp["ln1_b"], tp["qkv_w"], tp["out_w"], tp["out_b"],
      tp["ln2_g"], tp["ln2_b"], tp["ff1_w"], tp["ff1_b"], tp["ff2_w"], tp["ff2_b"])


# ------------- fused heads kernel: proj heads + discriminator + classifier -------------

def _heads_kernel(st_ref,
                  p1l1w_ref, p1l1b_ref, p1bng_ref, p1bnb_ref, p1l2w_ref, p1l2b_ref,
                  p2l1w_ref, p2l1b_ref, p2bng_ref, p2bnb_ref, p2l2w_ref, p2l2b_ref,
                  dl1w_ref, dl1b_ref, dbn1g_ref, dbn1b_ref,
                  dl2w_ref, dl2b_ref, dbn2g_ref, dbn2b_ref,
                  dl3w_ref, dl3b_ref,
                  cw_ref, cb_ref,
                  pros_ref, proc_ref, disc_ref, pred_ref):
    def lin(x, w_ref, b_ref):
        return jnp.dot(x, w_ref[...], preferred_element_type=jnp.float32) + b_ref[...]

    s_t = st_ref[0]                      # (B, D) class token of seq_transformer1
    c_t = st_ref[1]                      # (B, D) class token of seq_transformer2

    # projection_head1(s_t): Linear -> BN -> ReLU -> Linear
    h = lin(s_t, p1l1w_ref, p1l1b_ref)
    h = _batchnorm_relu(h, p1bng_ref[...], p1bnb_ref[...], _BN_EPS)
    pros = lin(h, p1l2w_ref, p1l2b_ref)
    pros_ref[...] = pros

    # projection_head2(c_t)
    h = lin(c_t, p2l1w_ref, p2l1b_ref)
    h = _batchnorm_relu(h, p2bng_ref[...], p2bnb_ref[...], _BN_EPS)
    proc = lin(h, p2l2w_ref, p2l2b_ref)
    proc_ref[...] = proc

    # Discriminator on head_pros (ReverseLayerF is identity in the forward pass)
    h = lin(pros, dl1w_ref, dl1b_ref)
    h = _batchnorm_relu(h, dbn1g_ref[...], dbn1b_ref[...], _BN_EPS)
    h = lin(h, dl2w_ref, dl2b_ref)
    h = _batchnorm_relu(h, dbn2g_ref[...], dbn2b_ref[...], _BN_EPS)
    disc_ref[...] = lin(h, dl3w_ref, dl3b_ref)

    # classifier (common_network.feat_classifier): single Linear on head_proc
    pred_ref[...] = lin(proc, cw_ref, cb_ref)


def heads_fwd(hp, t_out):
    B = t_out.shape[1]
    c4 = hp["ph1_l2_w"].shape[-1]
    nc = hp["cls_w"].shape[-1]
    args = (t_out,
            hp["ph1_l1_w"], hp["ph1_l1_b"], hp["ph1_bn_g"], hp["ph1_bn_b"],
            hp["ph1_l2_w"], hp["ph1_l2_b"],
            hp["ph2_l1_w"], hp["ph2_l1_b"], hp["ph2_bn_g"], hp["ph2_bn_b"],
            hp["ph2_l2_w"], hp["ph2_l2_b"],
            hp["d_l1_w"], hp["d_l1_b"], hp["d_bn1_g"], hp["d_bn1_b"],
            hp["d_l2_w"], hp["d_l2_b"], hp["d_bn2_g"], hp["d_bn2_b"],
            hp["d_l3_w"], hp["d_l3_b"],
            hp["cls_w"], hp["cls_b"])
    return pl.pallas_call(
        _heads_kernel,
        out_shape=(jax.ShapeDtypeStruct((B, c4), jnp.float32),
                   jax.ShapeDtypeStruct((B, c4), jnp.float32),
                   jax.ShapeDtypeStruct((B, nc), jnp.float32),
                   jax.ShapeDtypeStruct((B, nc), jnp.float32)),
        in_specs=[pl.BlockSpec(memory_space=VMEM)] * len(args),
        out_specs=(pl.BlockSpec(memory_space=VMEM),) * 4,
    )(*args)


# --------------------------- parameter creation ---------------------------

def _linear_params(key, in_dim, out_dim, bias=True):
    """PyTorch nn.Linear init, stored pre-transposed as (in, out); bias as (1, out)."""
    kw, kb = jax.random.split(key)
    bound = 1.0 / np.sqrt(in_dim)
    w = jax.random.uniform(kw, (out_dim, in_dim), jnp.float32, -bound, bound)
    wt = jnp.transpose(w)                    # layout prep done once, off the hot path
    b = (jax.random.uniform(kb, (1, out_dim), jnp.float32, -bound, bound)
         if bias else None)
    return wt, b


def _init_one_transformer(key, patch_size, dim, depth, heads, mlp_dim):
    scale = float(dim) ** -0.5          # TS-TCC Attention uses dim ** -0.5
    keys = jax.random.split(key, 2 + depth)
    emb_w, emb_b = _linear_params(keys[0], patch_size, dim)
    c_tok = jax.random.normal(keys[1], (1, dim), jnp.float32)
    qkv_w, out_w, out_b = [], [], []
    ff1_w, ff1_b, ff2_w, ff2_b = [], [], [], []
    for l in range(depth):
        lk = jax.random.split(keys[2 + l], 4)
        wqkv, _ = _linear_params(lk[0], dim, 3 * dim, bias=False)   # (dim, 3*dim)
        # Fold the attention scale into the q columns (free at init).
        wqkv = wqkv.at[:, :dim].multiply(scale)
        wo, bo = _linear_params(lk[1], dim, dim)
        w1, b1 = _linear_params(lk[2], dim, mlp_dim)
        w2, b2 = _linear_params(lk[3], mlp_dim, dim)
        qkv_w.append(wqkv); out_w.append(wo); out_b.append(bo)
        ff1_w.append(w1); ff1_b.append(b1)
        ff2_w.append(w2); ff2_b.append(b2)
    return {
        "emb_w": emb_w,                              # (C, D)
        "emb_b": emb_b,                              # (1, D)
        "c_token": c_tok,                            # (1, D)
        "ln1_g": jnp.ones((depth, 1, dim), jnp.float32),
        "ln1_b": jnp.zeros((depth, 1, dim), jnp.float32),
        "qkv_w": jnp.stack(qkv_w),                   # (depth, D, 3D) fused, q-scaled
        "out_w": jnp.stack(out_w),                   # (depth, D, D)
        "out_b": jnp.stack(out_b),                   # (depth, 1, D)
        "ln2_g": jnp.ones((depth, 1, dim), jnp.float32),
        "ln2_b": jnp.zeros((depth, 1, dim), jnp.float32),
        "ff1_w": jnp.stack(ff1_w), "ff1_b": jnp.stack(ff1_b),
        "ff2_w": jnp.stack(ff2_w), "ff2_b": jnp.stack(ff2_b),
    }


def init_heads(key, hidden_dim, num_channels, num_classes):
    c2, c4 = num_channels // 2, num_channels // 4
    ks = jax.random.split(key, 8)
    p = {}
    p["ph1_l1_w"], p["ph1_l1_b"] = _linear_params(ks[0], hidden_dim, c2)
    p["ph1_bn_g"], p["ph1_bn_b"] = jnp.ones((1, c2), jnp.float32), jnp.zeros((1, c2), jnp.float32)
    p["ph1_l2_w"], p["ph1_l2_b"] = _linear_params(ks[1], c2, c4)
    p["ph2_l1_w"], p["ph2_l1_b"] = _linear_params(ks[2], hidden_dim, c2)
    p["ph2_bn_g"], p["ph2_bn_b"] = jnp.ones((1, c2), jnp.float32), jnp.zeros((1, c2), jnp.float32)
    p["ph2_l2_w"], p["ph2_l2_b"] = _linear_params(ks[3], c2, c4)
    p["d_l1_w"], p["d_l1_b"] = _linear_params(ks[4], c4, 256)
    p["d_bn1_g"], p["d_bn1_b"] = jnp.ones((1, 256), jnp.float32), jnp.zeros((1, 256), jnp.float32)
    p["d_l2_w"], p["d_l2_b"] = _linear_params(ks[5], 256, 256)
    p["d_bn2_g"], p["d_bn2_b"] = jnp.ones((1, 256), jnp.float32), jnp.zeros((1, 256), jnp.float32)
    p["d_l3_w"], p["d_l3_b"] = _linear_params(ks[6], 256, num_classes)
    p["cls_w"], p["cls_b"] = _linear_params(ks[7], c4, num_classes)
    return p


def init_tc(key, num_channels, hidden_dim, num_classes, depth=4, heads=4, mlp_dim=64):
    kt1, kt2, kh, kq1, kq2 = jax.random.split(key, 5)
    t1 = _init_one_transformer(kt1, num_channels, hidden_dim, depth, heads, mlp_dim)
    t2 = _init_one_transformer(kt2, num_channels, hidden_dim, depth, heads, mlp_dim)
    # Stack st1 (-> s_t) and st2 (-> c_t) along a leading axis of size 2.
    trans = {k: jnp.stack([t1[k], t2[k]], axis=0) for k in t1}
    return {
        "trans": trans,
        "heads": init_heads(kh, hidden_dim, num_channels, num_classes),
        # Present in the torch module but unused by forward(): Wk, lsoftmax, query_s, query_c.
        "query_s": jax.random.normal(kq1, (1, num_channels, 1), jnp.float32),
        "query_c": jax.random.normal(kq2, (1, num_channels, 1), jnp.float32),
    }


# ------------------------------ model forward ------------------------------

def tc_forward(params, features_aug1, features_aug2):
    z_aug1 = jnp.transpose(features_aug1, (0, 2, 1))   # NCL -> (B, L, C)
    # features_aug2 is transposed in the torch forward but never used downstream.
    nce = 0
    t_out = transformers_fwd(params["trans"], z_aug1)  # (2, B, D): [s_t, c_t]
    s_t = t_out[0]
    c_t = t_out[1]
    head_pros, head_proc, disc_out, pred_out = heads_fwd(params["heads"], t_out)
    return nce, head_pros, head_proc, disc_out, pred_out, s_t, c_t


# ----------------------------------- main -----------------------------------

if __name__ == "__main__":
    # configs: final_out_channels = 16, TC.hidden_dim = 32, num_classes = 4, seq_len = 8
    B, C, L = 4, 16, 8
    HIDDEN = 32
    NUM_CLASSES = 4

    key = jax.random.PRNGKey(0)
    kp, k1, k2 = jax.random.split(key, 3)
    params = init_tc(kp, C, HIDDEN, NUM_CLASSES)

    features_aug1 = jax.random.normal(k1, (B, C, L), jnp.float32)
    features_aug2 = jax.random.normal(k2, (B, C, L), jnp.float32)

    fwd = jax.jit(functools.partial(tc_forward, params))
    nce, head_pros, head_proc, disc_out, pred_out, s_t, c_t = fwd(
        features_aug1, features_aug2)
    jax.block_until_ready((head_pros, head_proc, disc_out, pred_out, s_t, c_t))

    assert head_pros.shape == (B, C // 4)
    assert head_proc.shape == (B, C // 4)
    assert disc_out.shape == (B, NUM_CLASSES)
    assert pred_out.shape == (B, NUM_CLASSES)
    assert s_t.shape == (B, HIDDEN)
    assert c_t.shape == (B, HIDDEN)
    assert all(bool(jnp.all(jnp.isfinite(t))) for t in
               (head_pros, head_proc, disc_out, pred_out, s_t, c_t))
    print("KERNEL_OK")
</pallas_src>

<mosaic_0001>
module attributes {stable_mosaic.version = 11 : i64} {
  func.func @_transformer_kernel(%arg0: i32, %arg1: memref<36x36xf32, #tpu.memory_space<vmem>>, %arg2: memref<32x16xf32, #tpu.memory_space<vmem>>, %arg3: memref<1x16x32xf32, #tpu.memory_space<vmem>>, %arg4: memref<1x1x32xf32, #tpu.memory_space<vmem>>, %arg5: memref<1x1x32xf32, #tpu.memory_space<vmem>>, %arg6: memref<1x4x1x32xf32, #tpu.memory_space<vmem>>, %arg7: memref<1x4x1x32xf32, #tpu.memory_space<vmem>>, %arg8: memref<1x4x32x96xf32, #tpu.memory_space<vmem>>, %arg9: memref<1x4x32x32xf32, #tpu.memory_space<vmem>>, %arg10: memref<1x4x1x32xf32, #tpu.memory_space<vmem>>, %arg11: memref<1x4x1x32xf32, #tpu.memory_space<vmem>>, %arg12: memref<1x4x1x32xf32, #tpu.memory_space<vmem>>, %arg13: memref<1x4x32x64xf32, #tpu.memory_space<vmem>>, %arg14: memref<1x4x1x64xf32, #tpu.memory_space<vmem>>, %arg15: memref<1x4x64x32xf32, #tpu.memory_space<vmem>>, %arg16: memref<1x4x1x32xf32, #tpu.memory_space<vmem>>, %arg17: memref<1x4x32xf32, #tpu.memory_space<vmem>>, %arg18: memref<36x32xf32, #tpu.memory_space<vmem>>) attributes {dimension_semantics = [#tpu.dimension_semantics<parallel>], iteration_bounds = array<i64: 2>, scalar_prefetch = 0 : i64, scratch_operands = 1 : i64, tpu.core_type = #tpu.core_type<tc>, window_params = [{pipeline_mode = #tpu.pipeline_mode<synchronous>, transform_indices = @transform_0, window_bounds = array<i64: 36, 36>}, {pipeline_mode = #tpu.pipeline_mode<synchronous>, transform_indices = @transform_1, window_bounds = array<i64: 32, 16>}, {transform_indices = @transform_2, window_bounds = array<i64: 1, 16, 32>}, {transform_indices = @transform_3, window_bounds = array<i64: 1, 1, 32>}, {transform_indices = @transform_4, window_bounds = array<i64: 1, 1, 32>}, {transform_indices = @transform_5, window_bounds = array<i64: 1, 4, 1, 32>}, {transform_indices = @transform_6, window_bounds = array<i64: 1, 4, 1, 32>}, {transform_indices = @transform_7, window_bounds = array<i64: 1, 4, 32, 96>}, {transform_indices = @transform_8, window_bounds = array<i64: 1, 4, 32, 32>}, {transform_indices = @transform_9, window_bounds = array<i64: 1, 4, 1, 32>}, {transform_indices = @transform_10, window_bounds = array<i64: 1, 4, 1, 32>}, {transform_indices = @transform_11, window_bounds = array<i64: 1, 4, 1, 32>}, {transform_indices = @transform_12, window_bounds = array<i64: 1, 4, 32, 64>}, {transform_indices = @transform_13, window_bounds = array<i64: 1, 4, 1, 64>}, {transform_indices = @transform_14, window_bounds = array<i64: 1, 4, 64, 32>}, {transform_indices = @transform_15, window_bounds = array<i64: 1, 4, 1, 32>}, {transform_indices = @transform_16, window_bounds = array<i64: 1, 4, 32>}]} {
    %c0 = arith.constant 0 : index
    %c0_0 = arith.constant 0 : index
    %0 = vector.load %arg2[%c0, %c0_0] : memref<32x16xf32, #tpu.memory_space<vmem>>, vector<32x16xf32>
    %c0_1 = arith.constant 0 : index
    %c0_2 = arith.constant 0 : index
    %c0_3 = arith.constant 0 : index
    %1 = vector.load %arg3[%c0_1, %c0_2, %c0_3] : memref<1x16x32xf32, #tpu.memory_space<vmem>>, vector<1x16x32xf32>
    %2 = vector.shape_cast %1 : vector<1x16x32xf32> to vector<16x32xf32>
    %cst = arith.constant dense<0.000000e+00> : vector<32x32xf32>
    %3 = tpu.matmul %0, %2, %cst {dimension_numbers = #tpu.dot_dimension_numbers<[1], [0], [0], [1], [0, 0, 1, 1], [], []>} : vector<32x16xf32>, vector<16x32xf32>, vector<32x32xf32> -> vector<32x32xf32>
    %c0_4 = arith.constant 0 : index
    %c0_5 = arith.constant 0 : index
    %c0_6 = arith.constant 0 : index
    %4 = vector.load %arg4[%c0_4, %c0_5, %c0_6] : memref<1x1x32xf32, #tpu.memory_space<vmem>>, vector<1x1x32xf32>
    %5 = vector.shape_cast %4 : vector<1x1x32xf32> to vector<1x32xf32>
    %6 = vector.broadcast %5 : vector<1x32xf32> to vector<32x32xf32>
    %7 = arith.addf %3, %6 : vector<32x32xf32>
    %c0_7 = arith.constant 0 : index
    %c0_8 = arith.constant 0 : index
    %c0_9 = arith.constant 0 : index
    %8 = vector.load %arg5[%c0_7, %c0_8, %c0_9] : memref<1x1x32xf32, #tpu.memory_space<vmem>>, vector<1x1x32xf32>
    %9 = vector.shape_cast %8 : vector<1x1x32xf32> to vector<1x32xf32>
    %c0_10 = arith.constant 0 : index
    %c0_11 = arith.constant 0 : index
    %10 = vector.load %arg18[%c0_10, %c0_11] : memref<36x32xf32, #tpu.memory_space<vmem>>, vector<1x32xf32>
    tpu.vector_store %arg18[%c0_10, %c0_11], %9 {strides = array<i32>} : memref<36x32xf32, #tpu.memory_space<vmem>>, vector<1x32xf32>,
    %11 = vector.extract_strided_slice %7 {offsets = [0, 0], sizes = [8, 32], strides = [1, 1]} : vector<32x32xf32> to vector<8x32xf32>
    %c1 = arith.constant 1 : index
    %c0_12 = arith.constant 0 : index
    %12 = vector.load %arg18[%c1, %c0_12] : memref<36x32xf32, #tpu.memory_space<vmem>>, vector<8x32xf32>
    tpu.vector_store %arg18[%c1, %c0_12], %11 {strides = array<i32>} : memref<36x32xf32, #tpu.memory_space<vmem>>, vector<8x32xf32>,
    %c9 = arith.constant 9 : index
    %c0_13 = arith.constant 0 : index
    %13 = vector.load %arg18[%c9, %c0_13] : memref<36x32xf32, #tpu.memory_space<vmem>>, vector<1x32xf32>
    tpu.vector_store %arg18[%c9, %c0_13], %9 {strides = array<i32>} : memref<36x32xf32, #tpu.memory_space<vmem>>, vector<1x32xf32>,
    %14 = vector.extract_strided_slice %7 {offsets = [8, 0], sizes = [8, 32], strides = [1, 1]} : vector<32x32xf32> to vector<8x32xf32>
    %c10 = arith.constant 10 : index
    %c0_14 = arith.constant 0 : index
    %15 = vector.load %arg18[%c10, %c0_14] : memref<36x32xf32, #tpu.memory_space<vmem>>, vector<8x32xf32>
    tpu.vector_store %arg18[%c10, %c0_14], %14 {strides = array<i32>} : memref<36x32xf32, #tpu.memory_space<vmem>>, vector<8x32xf32>,
    %c18 = arith.constant 18 : index
    %c0_15 = arith.constant 0 : index
    %16 = vector.load %arg18[%c18, %c0_15] : memref<36x32xf32, #tpu.memory_space<vmem>>, vector<1x32xf32>
    tpu.vector_store %arg18[%c18, %c0_15], %9 {strides = array<i32>} : memref<36x32xf32, #tpu.memory_space<vmem>>, vector<1x32xf32>,
    %17 = vector.extract_strided_slice %7 {offsets = [16, 0], sizes = [8, 32], strides = [1, 1]} : vector<32x32xf32> to vector<8x32xf32>
    %c19 = arith.constant 19 : index
    %c0_16 = arith.constant 0 : index
    %18 = vector.load %arg18[%c19, %c0_16] : memref<36x32xf32, #tpu.memory_space<vmem>>, vector<8x32xf32>
    tpu.vector_store %arg18[%c19, %c0_16], %17 {strides = array<i32>} : memref<36x32xf32, #tpu.memory_space<vmem>>, vector<8x32xf32>,
    %c27 = arith.constant 27 : index
    %c0_17 = arith.constant 0 : index
    %19 = vector.load %arg18[%c27, %c0_17] : memref<36x32xf32, #tpu.memory_space<vmem>>, vector<1x32xf32>
    tpu.vector_store %arg18[%c27, %c0_17], %9 {strides = array<i32>} : memref<36x32xf32, #tpu.memory_space<vmem>>, vector<1x32xf32>,
    %20 = vector.extract_strided_slice %7 {offsets = [24, 0], sizes = [8, 32], strides = [1, 1]} : vector<32x32xf32> to vector<8x32xf32>
    %c28 = arith.constant 28 : index
    %c0_18 = arith.constant 0 : index
    %21 = vector.load %arg18[%c28, %c0_18] : memref<36x32xf32, #tpu.memory_space<vmem>>, vector<8x32xf32>
    tpu.vector_store %arg18[%c28, %c0_18], %20 {strides = array<i32>} : memref<36x32xf32, #tpu.memory_space<vmem>>, vector<8x32xf32>,
    %c0_19 = arith.constant 0 : index
    %c0_20 = arith.constant 0 : index
    %22 = vector.load %arg1[%c0_19, %c0_20] : memref<36x36xf32, #tpu.memory_space<vmem>>, vector<36x36xf32>
    %c0_i32 = arith.constant 0 : i32
    %c4_i32 = arith.constant 4 : i32
    %23 = arith.addi %c0_i32, %c4_i32 : i32
    %c1_i32 = arith.constant 1 : i32
    scf.for %arg19 = %c0_i32 to %23 step %c1_i32  : i32 {
      %c0_40 = arith.constant 0 : index
      %c0_41 = arith.constant 0 : index
      %40 = vector.load %arg18[%c0_40, %c0_41] : memref<36x32xf32, #tpu.memory_space<vmem>>, vector<36x32xf32>
      %c0_42 = arith.constant 0 : index
      %41 = arith.index_cast %arg19 : i32 to index
      %c0_43 = arith.constant 0 : index
      %c0_44 = arith.constant 0 : index
      %42 = vector.load %arg6[%c0_42, %41, %c0_43, %c0_44] : memref<1x4x1x32xf32, #tpu.memory_space<vmem>>, vector<1x1x1x32xf32>
      %43 = vector.shape_cast %42 : vector<1x1x1x32xf32> to vector<1x32xf32>
      %c0_45 = arith.constant 0 : index
      %44 = arith.index_cast %arg19 : i32 to index
      %c0_46 = arith.constant 0 : index
      %c0_47 = arith.constant 0 : index
      %45 = vector.load %arg7[%c0_45, %44, %c0_46, %c0_47] : memref<1x4x1x32xf32, #tpu.memory_space<vmem>>, vector<1x1x1x32xf32>
      %46 = vector.shape_cast %45 : vector<1x1x1x32xf32> to vector<1x32xf32>
      %cst_48 = arith.constant dense<0.000000e+00> : vector<36xf32>
      %47 = vector.multi_reduction <add>, %40, %cst_48 [1] : vector<36x32xf32> to vector<36xf32>
      %48 = vector.shape_cast %47 : vector<36xf32> to vector<36x1xf32>
      %cst_49 = arith.constant 3.200000e+01 : f32
      %49 = vector.broadcast %cst_49 : f32 to vector<36x1xf32>
      %50 = arith.divf %48, %49 : vector<36x1xf32>
      %51 = vector.broadcast %50 : vector<36x1xf32> to vector<36x32xf32>
      %52 = arith.subf %40, %51 : vector<36x32xf32>
      %53 = arith.mulf %52, %52 : vector<36x32xf32>
      %cst_50 = arith.constant dense<0.000000e+00> : vector<36xf32>
      %54 = vector.multi_reduction <add>, %53, %cst_50 [1] : vector<36x32xf32> to vector<36xf32>
      %55 = vector.shape_cast %54 : vector<36xf32> to vector<36x1xf32>
      %cst_51 = arith.constant 3.200000e+01 : f32
      %56 = vector.broadcast %cst_51 : f32 to vector<36x1xf32>
      %57 = arith.divf %55, %56 : vector<36x1xf32>
      %58 = vector.broadcast %50 : vector<36x1xf32> to vector<36x32xf32>
      %59 = arith.subf %40, %58 : vector<36x32xf32>
      %cst_52 = arith.constant 9.99999974E-6 : f32
      %60 = vector.broadcast %cst_52 : f32 to vector<36x1xf32>
      %61 = arith.addf %57, %60 : vector<36x1xf32>
      %62 = math.rsqrt %61 : vector<36x1xf32>
      %63 = vector.broadcast %62 : vector<36x1xf32> to vector<36x32xf32>
      %64 = arith.mulf %59, %63 : vector<36x32xf32>
      %65 = vector.broadcast %43 : vector<1x32xf32> to vector<36x32xf32>
      %66 = arith.mulf %64, %65 : vector<36x32xf32>
      %67 = vector.broadcast %46 : vector<1x32xf32> to vector<36x32xf32>
      %68 = arith.addf %66, %67 : vector<36x32xf32>
      %c0_53 = arith.constant 0 : index
      %69 = arith.index_cast %arg19 : i32 to index
      %c0_54 = arith.constant 0 : index
      %c0_55 = arith.constant 0 : index
      %70 = vector.load %arg8[%c0_53, %69, %c0_54, %c0_55] : memref<1x4x32x96xf32, #tpu.memory_space<vmem>>, vector<1x1x32x96xf32>
      %71 = vector.shape_cast %70 : vector<1x1x32x96xf32> to vector<32x96xf32>
      %cst_56 = arith.constant dense<0.000000e+00> : vector<36x96xf32>
      %72 = tpu.matmul %68, %71, %cst_56 {dimension_numbers = #tpu.dot_dimension_numbers<[1], [0], [0], [1], [0, 0, 1, 1], [], []>} : vector<36x32xf32>, vector<32x96xf32>, vector<36x96xf32> -> vector<36x96xf32>
      %73 = vector.extract_strided_slice %72 {offsets = [0, 0], sizes = [36, 8], strides = [1, 1]} : vector<36x96xf32> to vector<36x8xf32>
      %74 = vector.extract_strided_slice %72 {offsets = [0, 32], sizes = [36, 8], strides = [1, 1]} : vector<36x96xf32> to vector<36x8xf32>
      %75 = vector.extract_strided_slice %72 {offsets = [0, 64], sizes = [36, 8], strides = [1, 1]} : vector<36x96xf32> to vector<36x8xf32>
      %cst_57 = arith.constant dense<0.000000e+00> : vector<36x36xf32>
      %76 = tpu.matmul %73, %74, %cst_57 {dimension_numbers = #tpu.dot_dimension_numbers<[1], [1], [0], [0], [0, 0, 1, 0], [], []>} : vector<36x8xf32>, vector<36x8xf32>, vector<36x36xf32> -> vector<36x36xf32>
      %77 = arith.addf %76, %22 : vector<36x36xf32>
      %cst_58 = arith.constant dense<0xFF800000> : vector<36xf32>
      %78 = vector.multi_reduction <maximumf>, %77, %cst_58 [1] : vector<36x36xf32> to vector<36xf32>
      %79 = vector.shape_cast %78 : vector<36xf32> to vector<36x1xf32>
      %80 = vector.broadcast %79 : vector<36x1xf32> to vector<36x36xf32>
      %81 = arith.subf %77, %80 : vector<36x36xf32>
      %82 = math.exp %81 : vector<36x36xf32>
      %cst_59 = arith.constant dense<0.000000e+00> : vector<36xf32>
      %83 = vector.multi_reduction <add>, %82, %cst_59 [1] : vector<36x36xf32> to vector<36xf32>
      %84 = vector.shape_cast %83 : vector<36xf32> to vector<36x1xf32>
      %85 = vector.broadcast %84 : vector<36x1xf32> to vector<36x36xf32>
      %86 = arith.divf %82, %85 : vector<36x36xf32>
      %cst_60 = arith.constant dense<0.000000e+00> : vector<36x8xf32>
      %87 = tpu.matmul %86, %75, %cst_60 {dimension_numbers = #tpu.dot_dimension_numbers<[1], [0], [0], [1], [0, 0, 1, 1], [], []>} : vector<36x36xf32>, vector<36x8xf32>, vector<36x8xf32> -> vector<36x8xf32>
      %88 = vector.extract_strided_slice %72 {offsets = [0, 8], sizes = [36, 8], strides = [1, 1]} : vector<36x96xf32> to vector<36x8xf32>
      %89 = vector.extract_strided_slice %72 {offsets = [0, 40], sizes = [36, 8], strides = [1, 1]} : vector<36x96xf32> to vector<36x8xf32>
      %90 = vector.extract_strided_slice %72 {offsets = [0, 72], sizes = [36, 8], strides = [1, 1]} : vector<36x96xf32> to vector<36x8xf32>
      %cst_61 = arith.constant dense<0.000000e+00> : vector<36x36xf32>
      %91 = tpu.matmul %88, %89, %cst_61 {dimension_numbers = #tpu.dot_dimension_numbers<[1], [1], [0], [0], [0, 0, 1, 0], [], []>} : vector<36x8xf32>, vector<36x8xf32>, vector<36x36xf32> -> vector<36x36xf32>
      %92 = arith.addf %91, %22 : vector<36x36xf32>
      %cst_62 = arith.constant dense<0xFF800000> : vector<36xf32>
      %93 = vector.multi_reduction <maximumf>, %92, %cst_62 [1] : vector<36x36xf32> to vector<36xf32>
      %94 = vector.shape_cast %93 : vector<36xf32> to vector<36x1xf32>
      %95 = vector.broadcast %94 : vector<36x1xf32> to vector<36x36xf32>
      %96 = arith.subf %92, %95 : vector<36x36xf32>
      %97 = math.exp %96 : vector<36x36xf32>
      %cst_63 = arith.constant dense<0.000000e+00> : vector<36xf32>
      %98 = vector.multi_reduction <add>, %97, %cst_63 [1] : vector<36x36xf32> to vector<36xf32>
      %99 = vector.shape_cast %98 : vector<36xf32> to vector<36x1xf32>
      %100 = vector.broadcast %99 : vector<36x1xf32> to vector<36x36xf32>
      %101 = arith.divf %97, %100 : vector<36x36xf32>
      %cst_64 = arith.constant dense<0.000000e+00> : vector<36x8xf32>
      %102 = tpu.matmul %101, %90, %cst_64 {dimension_numbers = #tpu.dot_dimension_numbers<[1], [0], [0], [1], [0, 0, 1, 1], [], []>} : vector<36x36xf32>, vector<36x8xf32>, vector<36x8xf32> -> vector<36x8xf32>
      %103 = vector.extract_strided_slice %72 {offsets = [0, 16], sizes = [36, 8], strides = [1, 1]} : vector<36x96xf32> to vector<36x8xf32>
      %104 = vector.extract_strided_slice %72 {offsets = [0, 48], sizes = [36, 8], strides = [1, 1]} : vector<36x96xf32> to vector<36x8xf32>
      %105 = vector.extract_strided_slice %72 {offsets = [0, 80], sizes = [36, 8], strides = [1, 1]} : vector<36x96xf32> to vector<36x8xf32>
      %cst_65 = arith.constant dense<0.000000e+00> : vector<36x36xf32>
      %106 = tpu.matmul %103, %104, %cst_65 {dimension_numbers = #tpu.dot_dimension_numbers<[1], [1], [0], [0], [0, 0, 1, 0], [], []>} : vector<36x8xf32>, vector<36x8xf32>, vector<36x36xf32> -> vector<36x36xf32>
      %107 = arith.addf %106, %22 : vector<36x36xf32>
      %cst_66 = arith.constant dense<0xFF800000> : vector<36xf32>
      %108 = vector.multi_reduction <maximumf>, %107, %cst_66 [1] : vector<36x36xf32> to vector<36xf32>
      %109 = vector.shape_cast %108 : vector<36xf32> to vector<36x1xf32>
      %110 = vector.broadcast %109 : vector<36x1xf32> to vector<36x36xf32>
      %111 = arith.subf %107, %110 : vector<36x36xf32>
      %112 = math.exp %111 : vector<36x36xf32>
      %cst_67 = arith.constant dense<0.000000e+00> : vector<36xf32>
      %113 = vector.multi_reduction <add>, %112, %cst_67 [1] : vector<36x36xf32> to vector<36xf32>
      %114 = vector.shape_cast %113 : vector<36xf32> to vector<36x1xf32>
      %115 = vector.broadcast %114 : vector<36x1xf32> to vector<36x36xf32>
      %116 = arith.divf %112, %115 : vector<36x36xf32>
      %cst_68 = arith.constant dense<0.000000e+00> : vector<36x8xf32>
      %117 = tpu.matmul %116, %105, %cst_68 {dimension_numbers = #tpu.dot_dimension_numbers<[1], [0], [0], [1], [0, 0, 1, 1], [], []>} : vector<36x36xf32>, vector<36x8xf32>, vector<36x8xf32> -> vector<36x8xf32>
      %118 = vector.extract_strided_slice %72 {offsets = [0, 24], sizes = [36, 8], strides = [1, 1]} : vector<36x96xf32> to vector<36x8xf32>
      %119 = vector.extract_strided_slice %72 {offsets = [0, 56], sizes = [36, 8], strides = [1, 1]} : vector<36x96xf32> to vector<36x8xf32>
      %120 = vector.extract_strided_slice %72 {offsets = [0, 88], sizes = [36, 8], strides = [1, 1]} : vector<36x96xf32> to vector<36x8xf32>
      %cst_69 = arith.constant dense<0.000000e+00> : vector<36x36xf32>
      %121 = tpu.matmul %118, %119, %cst_69 {dimension_numbers = #tpu.dot_dimension_numbers<[1], [1], [0], [0], [0, 0, 1, 0], [], []>} : vector<36x8xf32>, vector<36x8xf32>, vector<36x36xf32> -> vector<36x36xf32>
      %122 = arith.addf %121, %22 : vector<36x36xf32>
      %cst_70 = arith.constant dense<0xFF800000> : vector<36xf32>
      %123 = vector.multi_reduction <maximumf>, %122, %cst_70 [1] : vector<36x36xf32> to vector<36xf32>
      %124 = vector.shape_cast %123 : vector<36xf32> to vector<36x1xf32>
      %125 = vector.broadcast %124 : vector<36x1xf32> to vector<36x36xf32>
      %126 = arith.subf %122, %125 : vector<36x36xf32>
      %127 = math.exp %126 : vector<36x36xf32>
      %cst_71 = arith.constant dense<0.000000e+00> : vector<36xf32>
      %128 = vector.multi_reduction <add>, %127, %cst_71 [1] : vector<36x36xf32> to vector<36xf32>
      %129 = vector.shape_cast %128 : vector<36xf32> to vector<36x1xf32>
      %130 = vector.broadcast %129 : vector<36x1xf32> to vector<36x36xf32>
      %131 = arith.divf %127, %130 : vector<36x36xf32>
      %cst_72 = arith.constant dense<0.000000e+00> : vector<36x8xf32>
      %132 = tpu.matmul %131, %120, %cst_72 {dimension_numbers = #tpu.dot_dimension_numbers<[1], [0], [0], [1], [0, 0, 1, 1], [], []>} : vector<36x36xf32>, vector<36x8xf32>, vector<36x8xf32> -> vector<36x8xf32>
      %133 = tpu.concatenate %87, %102, %117, %132 in 1 : vector<36x8xf32>, vector<36x8xf32>, vector<36x8xf32>, vector<36x8xf32> -> vector<36x32xf32>
      %c0_73 = arith.constant 0 : index
      %134 = arith.index_cast %arg19 : i32 to index
      %c0_74 = arith.constant 0 : index
      %c0_75 = arith.constant 0 : index
      %135 = vector.load %arg9[%c0_73, %134, %c0_74, %c0_75] : memref<1x4x32x32xf32, #tpu.memory_space<vmem>>, vector<1x1x32x32xf32>
      %136 = vector.shape_cast %135 : vector<1x1x32x32xf32> to vector<32x32xf32>
      %cst_76 = arith.constant dense<0.000000e+00> : vector<36x32xf32>
      %137 = tpu.matmul %133, %136, %cst_76 {dimension_numbers = #tpu.dot_dimension_numbers<[1], [0], [0], [1], [0, 0, 1, 1], [], []>} : vector<36x32xf32>, vector<32x32xf32>, vector<36x32xf32> -> vector<36x32xf32>
      %c0_77 = arith.constant 0 : index
      %138 = arith.index_cast %arg19 : i32 to index
      %c0_78 = arith.constant 0 : index
      %c0_79 = arith.constant 0 : index
      %139 = vector.load %arg10[%c0_77, %138, %c0_78, %c0_79] : memref<1x4x1x32xf32, #tpu.memory_space<vmem>>, vector<1x1x1x32xf32>
      %140 = vector.shape_cast %139 : vector<1x1x1x32xf32> to vector<1x32xf32>
      %141 = vector.broadcast %140 : vector<1x32xf32> to vector<36x32xf32>
      %142 = arith.addf %137, %141 : vector<36x32xf32>
      %143 = arith.addf %40, %142 : vector<36x32xf32>
      %c0_80 = arith.constant 0 : index
      %144 = arith.index_cast %arg19 : i32 to index
      %c0_81 = arith.constant 0 : index
      %c0_82 = arith.constant 0 : index
      %145 = vector.load %arg11[%c0_80, %144, %c0_81, %c0_82] : memref<1x4x1x32xf32, #tpu.memory_space<vmem>>, vector<1x1x1x32xf32>
      %146 = vector.shape_cast %145 : vector<1x1x1x32xf32> to vector<1x32xf32>
      %c0_83 = arith.constant 0 : index
      %147 = arith.index_cast %arg19 : i32 to index
      %c0_84 = arith.constant 0 : index
      %c0_85 = arith.constant 0 : index
      %148 = vector.load %arg12[%c0_83, %147, %c0_84, %c0_85] : memref<1x4x1x32xf32, #tpu.memory_space<vmem>>, vector<1x1x1x32xf32>
      %149 = vector.shape_cast %148 : vector<1x1x1x32xf32> to vector<1x32xf32>
      %cst_86 = arith.constant dense<0.000000e+00> : vector<36xf32>
      %150 = vector.multi_reduction <add>, %143, %cst_86 [1] : vector<36x32xf32> to vector<36xf32>
      %151 = vector.shape_cast %150 : vector<36xf32> to vector<36x1xf32>
      %cst_87 = arith.constant 3.200000e+01 : f32
      %152 = vector.broadcast %cst_87 : f32 to vector<36x1xf32>
      %153 = arith.divf %151, %152 : vector<36x1xf32>
      %154 = vector.broadcast %153 : vector<36x1xf32> to vector<36x32xf32>
      %155 = arith.subf %143, %154 : vector<36x32xf32>
      %156 = arith.mulf %155, %155 : vector<36x32xf32>
      %cst_88 = arith.constant dense<0.000000e+00> : vector<36xf32>
      %157 = vector.multi_reduction <add>, %156, %cst_88 [1] : vector<36x32xf32> to vector<36xf32>
      %158 = vector.shape_cast %157 : vector<36xf32> to vector<36x1xf32>
      %cst_89 = arith.constant 3.200000e+01 : f32
      %159 = vector.broadcast %cst_89 : f32 to vector<36x1xf32>
      %160 = arith.divf %158, %159 : vector<36x1xf32>
      %161 = vector.broadcast %153 : vector<36x1xf32> to vector<36x32xf32>
      %162 = arith.subf %143, %161 : vector<36x32xf32>
      %cst_90 = arith.constant 9.99999974E-6 : f32
      %163 = vector.broadcast %cst_90 : f32 to vector<36x1xf32>
      %164 = arith.addf %160, %163 : vector<36x1xf32>
      %165 = math.rsqrt %164 : vector<36x1xf32>
      %166 = vector.broadcast %165 : vector<36x1xf32> to vector<36x32xf32>
      %167 = arith.mulf %162, %166 : vector<36x32xf32>
      %168 = vector.broadcast %146 : vector<1x32xf32> to vector<36x32xf32>
      %169 = arith.mulf %167, %168 : vector<36x32xf32>
      %170 = vector.broadcast %149 : vector<1x32xf32> to vector<36x32xf32>
      %171 = arith.addf %169, %170 : vector<36x32xf32>
      %c0_91 = arith.constant 0 : index
      %172 = arith.index_cast %arg19 : i32 to index
      %c0_92 = arith.constant 0 : index
      %c0_93 = arith.constant 0 : index
      %173 = vector.load %arg13[%c0_91, %172, %c0_92, %c0_93] : memref<1x4x32x64xf32, #tpu.memory_space<vmem>>, vector<1x1x32x64xf32>
      %174 = vector.shape_cast %173 : vector<1x1x32x64xf32> to vector<32x64xf32>
      %cst_94 = arith.constant dense<0.000000e+00> : vector<36x64xf32>
      %175 = tpu.matmul %171, %174, %cst_94 {dimension_numbers = #tpu.dot_dimension_numbers<[1], [0], [0], [1], [0, 0, 1, 1], [], []>} : vector<36x32xf32>, vector<32x64xf32>, vector<36x64xf32> -> vector<36x64xf32>
      %c0_95 = arith.constant 0 : index
      %176 = arith.index_cast %arg19 : i32 to index
      %c0_96 = arith.constant 0 : index
      %c0_97 = arith.constant 0 : index
      %177 = vector.load %arg14[%c0_95, %176, %c0_96, %c0_97] : memref<1x4x1x64xf32, #tpu.memory_space<vmem>>, vector<1x1x1x64xf32>
      %178 = vector.shape_cast %177 : vector<1x1x1x64xf32> to vector<1x64xf32>
      %179 = vector.broadcast %178 : vector<1x64xf32> to vector<36x64xf32>
      %180 = arith.addf %175, %179 : vector<36x64xf32>
      %cst_98 = arith.constant 5.000000e-01 : f32
      %181 = vector.broadcast %cst_98 : f32 to vector<36x64xf32>
      %182 = arith.mulf %181, %180 : vector<36x64xf32>
      %cst_99 = arith.constant 0.707106769 : f32
      %183 = vector.broadcast %cst_99 : f32 to vector<36x64xf32>
      %184 = arith.mulf %180, %183 : vector<36x64xf32>
      %cst_100 = arith.constant 0.000000e+00 : f32
      %185 = vector.broadcast %cst_100 : f32 to vector<36x64xf32>
      %186 = arith.cmpf oge, %184, %185 : vector<36x64xf32>
      %cst_101 = arith.constant 1.000000e+00 : f32
      %cst_102 = arith.constant -1.000000e+00 : f32
      %187 = vector.broadcast %cst_101 : f32 to vector<36x64xf32>
      %188 = vector.broadcast %cst_102 : f32 to vector<36x64xf32>
      %189 = arith.select %186, %187, %188 : vector<36x64xi1>, vector<36x64xf32>
      %190 = math.absf %184 : vector<36x64xf32>
      %cst_103 = arith.constant 0.327591091 : f32
      %191 = vector.broadcast %cst_103 : f32 to vector<36x64xf32>
      %192 = arith.mulf %191, %190 : vector<36x64xf32>
      %cst_104 = arith.constant 1.000000e+00 : f32
      %193 = vector.broadcast %cst_104 : f32 to vector<36x64xf32>
      %194 = arith.addf %193, %192 : vector<36x64xf32>
      %cst_105 = arith.constant 1.000000e+00 : f32
      %195 = vector.broadcast %cst_105 : f32 to vector<36x64xf32>
      %196 = arith.divf %195, %194 : vector<36x64xf32>
      %cst_106 = arith.constant 1.06140542 : f32
      %197 = vector.broadcast %cst_106 : f32 to vector<36x64xf32>
      %198 = arith.mulf %197, %196 : vector<36x64xf32>
      %cst_107 = arith.constant -1.45315206 : f32
      %199 = vector.broadcast %cst_107 : f32 to vector<36x64xf32>
      %200 = arith.addf %198, %199 : vector<36x64xf32>
      %201 = arith.mulf %200, %196 : vector<36x64xf32>
      %cst_108 = arith.constant 1.42141378 : f32
      %202 = vector.broadcast %cst_108 : f32 to vector<36x64xf32>
      %203 = arith.addf %201, %202 : vector<36x64xf32>
      %204 = arith.mulf %203, %196 : vector<36x64xf32>
      %cst_109 = arith.constant -0.284496725 : f32
      %205 = vector.broadcast %cst_109 : f32 to vector<36x64xf32>
      %206 = arith.addf %204, %205 : vector<36x64xf32>
      %207 = arith.mulf %206, %196 : vector<36x64xf32>
      %cst_110 = arith.constant 0.254829586 : f32
      %208 = vector.broadcast %cst_110 : f32 to vector<36x64xf32>
      %209 = arith.addf %207, %208 : vector<36x64xf32>
      %210 = arith.mulf %209, %196 : vector<36x64xf32>
      %cst_111 = arith.constant 0.000000e+00 : f32
      %211 = vector.broadcast %cst_111 : f32 to vector<36x64xf32>
      %212 = arith.subf %211, %190 : vector<36x64xf32>
      %213 = arith.mulf %212, %190 : vector<36x64xf32>
      %214 = math.exp %213 : vector<36x64xf32>
      %215 = arith.mulf %210, %214 : vector<36x64xf32>
      %cst_112 = arith.constant 1.000000e+00 : f32
      %216 = vector.broadcast %cst_112 : f32 to vector<36x64xf32>
      %217 = arith.subf %216, %215 : vector<36x64xf32>
      %218 = arith.mulf %189, %217 : vector<36x64xf32>
      %cst_113 = arith.constant 1.000000e+00 : f32
      %219 = vector.broadcast %cst_113 : f32 to vector<36x64xf32>
      %220 = arith.addf %219, %218 : vector<36x64xf32>
      %221 = arith.mulf %182, %220 : vector<36x64xf32>
      %c0_114 = arith.constant 0 : index
      %222 = arith.index_cast %arg19 : i32 to index
      %c0_115 = arith.constant 0 : index
      %c0_116 = arith.constant 0 : index
      %223 = vector.load %arg15[%c0_114, %222, %c0_115, %c0_116] : memref<1x4x64x32xf32, #tpu.memory_space<vmem>>, vector<1x1x64x32xf32>
      %224 = vector.shape_cast %223 : vector<1x1x64x32xf32> to vector<64x32xf32>
      %cst_117 = arith.constant dense<0.000000e+00> : vector<36x32xf32>
      %225 = tpu.matmul %221, %224, %cst_117 {dimension_numbers = #tpu.dot_dimension_numbers<[1], [0], [0], [1], [0, 0, 1, 1], [], []>} : vector<36x64xf32>, vector<64x32xf32>, vector<36x32xf32> -> vector<36x32xf32>
      %c0_118 = arith.constant 0 : index
      %226 = arith.index_cast %arg19 : i32 to index
      %c0_119 = arith.constant 0 : index
      %c0_120 = arith.constant 0 : index
      %227 = vector.load %arg16[%c0_118, %226, %c0_119, %c0_120] : memref<1x4x1x32xf32, #tpu.memory_space<vmem>>, vector<1x1x1x32xf32>
      %228 = vector.shape_cast %227 : vector<1x1x1x32xf32> to vector<1x32xf32>
      %229 = vector.broadcast %228 : vector<1x32xf32> to vector<36x32xf32>
      %230 = arith.addf %225, %229 : vector<36x32xf32>
      %231 = arith.addf %143, %230 : vector<36x32xf32>
      %c0_121 = arith.constant 0 : index
      %c0_122 = arith.constant 0 : index
      %232 = vector.load %arg18[%c0_121, %c0_122] : memref<36x32xf32, #tpu.memory_space<vmem>>, vector<36x32xf32>
      tpu.vector_store %arg18[%c0_121, %c0_122], %231 {strides = array<i32>} : memref<36x32xf32, #tpu.memory_space<vmem>>, vector<36x32xf32>,
    }
    %c4_i32_21 = arith.constant 4 : i32
    %c0_22 = arith.constant 0 : index
    %c0_23 = arith.constant 0 : index
    %24 = vector.load %arg18[%c0_22, %c0_23] : memref<36x32xf32, #tpu.memory_space<vmem>>, vector<1x32xf32>
    %c0_24 = arith.constant 0 : index
    %c0_25 = arith.constant 0 : index
    %c0_26 = arith.constant 0 : index
    %25 = vector.load %arg17[%c0_24, %c0_25, %c0_26] : memref<1x4x32xf32, #tpu.memory_space<vmem>>, vector<1x1x32xf32>
    %26 = vector.shape_cast %25 : vector<1x1x32xf32> to vector<1x32xf32>
    %27 = vector.shape_cast %24 : vector<1x32xf32> to vector<1x1x32xf32>
    tpu.vector_store %arg17[%c0_24, %c0_25, %c0_26], %27 {strides = array<i32>} : memref<1x4x32xf32, #tpu.memory_space<vmem>>, vector<1x1x32xf32>,
    %c9_27 = arith.constant 9 : index
    %c0_28 = arith.constant 0 : index
    %28 = vector.load %arg18[%c9_27, %c0_28] : memref<36x32xf32, #tpu.memory_space<vmem>>, vector<1x32xf32>
    %c0_29 = arith.constant 0 : index
    %c1_30 = arith.constant 1 : index
    %c0_31 = arith.constant 0 : index
    %29 = vector.load %arg17[%c0_29, %c1_30, %c0_31] : memref<1x4x32xf32, #tpu.memory_space<vmem>>, vector<1x1x32xf32>
    %30 = vector.shape_cast %29 : vector<1x1x32xf32> to vector<1x32xf32>
    %31 = vector.shape_cast %28 : vector<1x32xf32> to vector<1x1x32xf32>
    tpu.vector_store %arg17[%c0_29, %c1_30, %c0_31], %31 {strides = array<i32>} : memref<1x4x32xf32, #tpu.memory_space<vmem>>, vector<1x1x32xf32>,
    %c18_32 = arith.constant 18 : index
    %c0_33 = arith.constant 0 : index
    %32 = vector.load %arg18[%c18_32, %c0_33] : memref<36x32xf32, #tpu.memory_space<vmem>>, vector<1x32xf32>
    %c0_34 = arith.constant 0 : index
    %c2 = arith.constant 2 : index
    %c0_35 = arith.constant 0 : index
    %33 = vector.load %arg17[%c0_34, %c2, %c0_35] : memref<1x4x32xf32, #tpu.memory_space<vmem>>, vector<1x1x32xf32>
    %34 = vector.shape_cast %33 : vector<1x1x32xf32> to vector<1x32xf32>
    %35 = vector.shape_cast %32 : vector<1x32xf32> to vector<1x1x32xf32>
    tpu.vector_store %arg17[%c0_34, %c2, %c0_35], %35 {strides = array<i32>} : memref<1x4x32xf32, #tpu.memory_space<vmem>>, vector<1x1x32xf32>,
    %c27_36 = arith.constant 27 : index
    %c0_37 = arith.constant 0 : index
    %36 = vector.load %arg18[%c27_36, %c0_37] : memref<36x32xf32, #tpu.memory_space<vmem>>, vector<1x32xf32>
    %c0_38 = arith.constant 0 : index
    %c3 = arith.constant 3 : index
    %c0_39 = arith.constant 0 : index
    %37 = vector.load %arg17[%c0_38, %c3, %c0_39] : memref<1x4x32xf32, #tpu.memory_space<vmem>>, vector<1x1x32xf32>
    %38 = vector.shape_cast %37 : vector<1x1x32xf32> to vector<1x32xf32>
    %39 = vector.shape_cast %36 : vector<1x32xf32> to vector<1x1x32xf32>
    tpu.vector_store %arg17[%c0_38, %c3, %c0_39], %39 {strides = array<i32>} : memref<1x4x32xf32, #tpu.memory_space<vmem>>, vector<1x1x32xf32>,
    return
  }
  func.func @transform_0(%arg0: i32) -> (i32, i32) {
    %c0_i32 = arith.constant 0 : i32
    %c0_i32_0 = arith.constant 0 : i32
    %c0_i32_1 = arith.constant 0 : i32
    return %c0_i32, %c0_i32_0 : i32, i32
  }
  func.func @transform_1(%arg0: i32) -> (i32, i32) {
    %c0_i32 = arith.constant 0 : i32
    %c0_i32_0 = arith.constant 0 : i32
    %c0_i32_1 = arith.constant 0 : i32
    return %c0_i32, %c0_i32_0 : i32, i32
  }
  func.func @transform_2(%arg0: i32) -> (i32, i32, i32) {
    %c0_i32 = arith.constant 0 : i32
    %c0_i32_0 = arith.constant 0 : i32
    %c0_i32_1 = arith.constant 0 : i32
    return %arg0, %c0_i32, %c0_i32_0 : i32, i32, i32
  }
  func.func @transform_3(%arg0: i32) -> (i32, i32, i32) {
    %c0_i32 = arith.constant 0 : i32
    %c0_i32_0 = arith.constant 0 : i32
    %c0_i32_1 = arith.constant 0 : i32
    return %arg0, %c0_i32, %c0_i32_0 : i32, i32, i32
  }
  func.func @transform_4(%arg0: i32) -> (i32, i32, i32) {
    %c0_i32 = arith.constant 0 : i32
    %c0_i32_0 = arith.constant 0 : i32
    %c0_i32_1 = arith.constant 0 : i32
    return %arg0, %c0_i32, %c0_i32_0 : i32, i32, i32
  }
  func.func @transform_5(%arg0: i32) -> (i32, i32, i32, i32) {
    %c0_i32 = arith.constant 0 : i32
    %c0_i32_0 = arith.constant 0 : i32
    %c0_i32_1 = arith.constant 0 : i32
    %c0_i32_2 = arith.constant 0 : i32
    return %arg0, %c0_i32, %c0_i32_0, %c0_i32_1 : i32, i32, i32, i32
  }
  func.func @transform_6(%arg0: i32) -> (i32, i32, i32, i32) {
    %c0_i32 = arith.constant 0 : i32
    %c0_i32_0 = arith.constant 0 : i32
    %c0_i32_1 = arith.constant 0 : i32
    %c0_i32_2 = arith.constant 0 : i32
    return %arg0, %c0_i32, %c0_i32_0, %c0_i32_1 : i32, i32, i32, i32
  }
  func.func @transform_7(%arg0: i32) -> (i32, i32, i32, i32) {
    %c0_i32 = arith.constant 0 : i32
    %c0_i32_0 = arith.constant 0 : i32
    %c0_i32_1 = arith.constant 0 : i32
    %c0_i32_2 = arith.constant 0 : i32
    return %arg0, %c0_i32, %c0_i32_0, %c0_i32_1 : i32, i32, i32, i32
  }
  func.func @transform_8(%arg0: i32) -> (i32, i32, i32, i32) {
    %c0_i32 = arith.constant 0 : i32
    %c0_i32_0 = arith.constant 0 : i32
    %c0_i32_1 = arith.constant 0 : i32
    %c0_i32_2 = arith.constant 0 : i32
    return %arg0, %c0_i32, %c0_i32_0, %c0_i32_1 : i32, i32, i32, i32
  }
  func.func @transform_9(%arg0: i32) -> (i32, i32, i32, i32) {
    %c0_i32 = arith.constant 0 : i32
    %c0_i32_0 = arith.constant 0 : i32
    %c0_i32_1 = arith.constant 0 : i32
    %c0_i32_2 = arith.constant 0 : i32
    return %arg0, %c0_i32, %c0_i32_0, %c0_i32_1 : i32, i32, i32, i32
  }
  func.func @transform_10(%arg0: i32) -> (i32, i32, i32, i32) {
    %c0_i32 = arith.constant 0 : i32
    %c0_i32_0 = arith.constant 0 : i32
    %c0_i32_1 = arith.constant 0 : i32
    %c0_i32_2 = arith.constant 0 : i32
    return %arg0, %c0_i32, %c0_i32_0, %c0_i32_1 : i32, i32, i32, i32
  }
  func.func @transform_11(%arg0: i32) -> (i32, i32, i32, i32) {
    %c0_i32 = arith.constant 0 : i32
    %c0_i32_0 = arith.constant 0 : i32
    %c0_i32_1 = arith.constant 0 : i32
    %c0_i32_2 = arith.constant 0 : i32
    return %arg0, %c0_i32, %c0_i32_0, %c0_i32_1 : i32, i32, i32, i32
  }
  func.func @transform_12(%arg0: i32) -> (i32, i32, i32, i32) {
    %c0_i32 = arith.constant 0 : i32
    %c0_i32_0 = arith.constant 0 : i32
    %c0_i32_1 = arith.constant 0 : i32
    %c0_i32_2 = arith.constant 0 : i32
    return %arg0, %c0_i32, %c0_i32_0, %c0_i32_1 : i32, i32, i32, i32
  }
  func.func @transform_13(%arg0: i32) -> (i32, i32, i32, i32) {
    %c0_i32 = arith.constant 0 : i32
    %c0_i32_0 = arith.constant 0 : i32
    %c0_i32_1 = arith.constant 0 : i32
    %c0_i32_2 = arith.constant 0 : i32
    return %arg0, %c0_i32, %c0_i32_0, %c0_i32_1 : i32, i32, i32, i32
  }
  func.func @transform_14(%arg0: i32) -> (i32, i32, i32, i32) {
    %c0_i32 = arith.constant 0 : i32
    %c0_i32_0 = arith.constant 0 : i32
    %c0_i32_1 = arith.constant 0 : i32
    %c0_i32_2 = arith.constant 0 : i32
    return %arg0, %c0_i32, %c0_i32_0, %c0_i32_1 : i32, i32, i32, i32
  }
  func.func @transform_15(%arg0: i32) -> (i32, i32, i32, i32) {
    %c0_i32 = arith.constant 0 : i32
    %c0_i32_0 = arith.constant 0 : i32
    %c0_i32_1 = arith.constant 0 : i32
    %c0_i32_2 = arith.constant 0 : i32
    return %arg0, %c0_i32, %c0_i32_0, %c0_i32_1 : i32, i32, i32, i32
  }
  func.func @transform_16(%arg0: i32) -> (i32, i32, i32) {
    %c0_i32 = arith.constant 0 : i32
    %c0_i32_0 = arith.constant 0 : i32
    %c0_i32_1 = arith.constant 0 : i32
    return %arg0, %c0_i32, %c0_i32_0 : i32, i32, i32
  }
}

module attributes {stable_mosaic.version = 11 : i64} {
  func.func @_heads_kernel(%arg0: memref<2x4x32xf32, #tpu.memory_space<vmem>>, %arg1: memref<32x8xf32, #tpu.memory_space<vmem>>, %arg2: memref<1x8xf32, #tpu.memory_space<vmem>>, %arg3: memref<1x8xf32, #tpu.memory_space<vmem>>, %arg4: memref<1x8xf32, #tpu.memory_space<vmem>>, %arg5: memref<8x4xf32, #tpu.memory_space<vmem>>, %arg6: memref<1x4xf32, #tpu.memory_space<vmem>>, %arg7: memref<32x8xf32, #tpu.memory_space<vmem>>, %arg8: memref<1x8xf32, #tpu.memory_space<vmem>>, %arg9: memref<1x8xf32, #tpu.memory_space<vmem>>, %arg10: memref<1x8xf32, #tpu.memory_space<vmem>>, %arg11: memref<8x4xf32, #tpu.memory_space<vmem>>, %arg12: memref<1x4xf32, #tpu.memory_space<vmem>>, %arg13: memref<4x256xf32, #tpu.memory_space<vmem>>, %arg14: memref<1x256xf32, #tpu.memory_space<vmem>>, %arg15: memref<1x256xf32, #tpu.memory_space<vmem>>, %arg16: memref<1x256xf32, #tpu.memory_space<vmem>>, %arg17: memref<256x256xf32, #tpu.memory_space<vmem>>, %arg18: memref<1x256xf32, #tpu.memory_space<vmem>>, %arg19: memref<1x256xf32, #tpu.memory_space<vmem>>, %arg20: memref<1x256xf32, #tpu.memory_space<vmem>>, %arg21: memref<256x4xf32, #tpu.memory_space<vmem>>, %arg22: memref<1x4xf32, #tpu.memory_space<vmem>>, %arg23: memref<4x4xf32, #tpu.memory_space<vmem>>, %arg24: memref<1x4xf32, #tpu.memory_space<vmem>>, %arg25: memref<4x4xf32, #tpu.memory_space<vmem>>, %arg26: memref<4x4xf32, #tpu.memory_space<vmem>>, %arg27: memref<4x4xf32, #tpu.memory_space<vmem>>, %arg28: memref<4x4xf32, #tpu.memory_space<vmem>>) attributes {dimension_semantics = [], scalar_prefetch = 0 : i64, scratch_operands = 0 : i64, tpu.core_type = #tpu.core_type<tc>} {
    %c0 = arith.constant 0 : index
    %c0_0 = arith.constant 0 : index
    %c0_1 = arith.constant 0 : index
    %0 = vector.load %arg0[%c0, %c0_0, %c0_1] : memref<2x4x32xf32, #tpu.memory_space<vmem>>, vector<1x4x32xf32>
    %1 = vector.shape_cast %0 : vector<1x4x32xf32> to vector<4x32xf32>
    %c1 = arith.constant 1 : index
    %c0_2 = arith.constant 0 : index
    %c0_3 = arith.constant 0 : index
    %2 = vector.load %arg0[%c1, %c0_2, %c0_3] : memref<2x4x32xf32, #tpu.memory_space<vmem>>, vector<1x4x32xf32>
    %3 = vector.shape_cast %2 : vector<1x4x32xf32> to vector<4x32xf32>
    %c0_4 = arith.constant 0 : index
    %c0_5 = arith.constant 0 : index
    %4 = vector.load %arg1[%c0_4, %c0_5] : memref<32x8xf32, #tpu.memory_space<vmem>>, vector<32x8xf32>
    %cst = arith.constant dense<0.000000e+00> : vector<4x8xf32>
    %5 = tpu.matmul %1, %4, %cst {dimension_numbers = #tpu.dot_dimension_numbers<[1], [0], [0], [1], [0, 0, 1, 1], [], []>} : vector<4x32xf32>, vector<32x8xf32>, vector<4x8xf32> -> vector<4x8xf32>
    %c0_6 = arith.constant 0 : index
    %c0_7 = arith.constant 0 : index
    %6 = vector.load %arg2[%c0_6, %c0_7] : memref<1x8xf32, #tpu.memory_space<vmem>>, vector<1x8xf32>
    %7 = vector.broadcast %6 : vector<1x8xf32> to vector<4x8xf32>
    %8 = arith.addf %5, %7 : vector<4x8xf32>
    %c0_8 = arith.constant 0 : index
    %c0_9 = arith.constant 0 : index
    %9 = vector.load %arg3[%c0_8, %c0_9] : memref<1x8xf32, #tpu.memory_space<vmem>>, vector<1x8xf32>
    %c0_10 = arith.constant 0 : index
    %c0_11 = arith.constant 0 : index
    %10 = vector.load %arg4[%c0_10, %c0_11] : memref<1x8xf32, #tpu.memory_space<vmem>>, vector<1x8xf32>
    %cst_12 = arith.constant dense<0.000000e+00> : vector<8xf32>
    %11 = vector.multi_reduction <add>, %8, %cst_12 [0] : vector<4x8xf32> to vector<8xf32>
    %12 = vector.shape_cast %11 : vector<8xf32> to vector<1x8xf32>
    %cst_13 = arith.constant 4.000000e+00 : f32
    %13 = vector.broadcast %cst_13 : f32 to vector<1x8xf32>
    %14 = arith.divf %12, %13 : vector<1x8xf32>
    %15 = vector.broadcast %14 : vector<1x8xf32> to vector<4x8xf32>
    %16 = arith.subf %8, %15 : vector<4x8xf32>
    %17 = arith.mulf %16, %16 : vector<4x8xf32>
    %cst_14 = arith.constant dense<0.000000e+00> : vector<8xf32>
    %18 = vector.multi_reduction <add>, %17, %cst_14 [0] : vector<4x8xf32> to vector<8xf32>
    %19 = vector.shape_cast %18 : vector<8xf32> to vector<1x8xf32>
    %cst_15 = arith.constant 4.000000e+00 : f32
    %20 = vector.broadcast %cst_15 : f32 to vector<1x8xf32>
    %21 = arith.divf %19, %20 : vector<1x8xf32>
    %22 = vector.broadcast %14 : vector<1x8xf32> to vector<4x8xf32>
    %23 = arith.subf %8, %22 : vector<4x8xf32>
    %cst_16 = arith.constant 9.99999974E-6 : f32
    %24 = vector.broadcast %cst_16 : f32 to vector<1x8xf32>
    %25 = arith.addf %21, %24 : vector<1x8xf32>
    %26 = math.rsqrt %25 : vector<1x8xf32>
    %27 = vector.broadcast %26 : vector<1x8xf32> to vector<4x8xf32>
    %28 = arith.mulf %23, %27 : vector<4x8xf32>
    %29 = vector.broadcast %9 : vector<1x8xf32> to vector<4x8xf32>
    %30 = arith.mulf %28, %29 : vector<4x8xf32>
    %31 = vector.broadcast %10 : vector<1x8xf32> to vector<4x8xf32>
    %32 = arith.addf %30, %31 : vector<4x8xf32>
    %cst_17 = arith.constant 0.000000e+00 : f32
    %33 = vector.broadcast %cst_17 : f32 to vector<4x8xf32>
    %34 = arith.maximumf %32, %33 : vector<4x8xf32>
    %c0_18 = arith.constant 0 : index
    %c0_19 = arith.constant 0 : index
    %35 = vector.load %arg5[%c0_18, %c0_19] : memref<8x4xf32, #tpu.memory_space<vmem>>, vector<8x4xf32>
    %cst_20 = arith.constant dense<0.000000e+00> : vector<4x4xf32>
    %36 = tpu.matmul %34, %35, %cst_20 {dimension_numbers = #tpu.dot_dimension_numbers<[1], [0], [0], [1], [0, 0, 1, 1], [], []>} : vector<4x8xf32>, vector<8x4xf32>, vector<4x4xf32> -> vector<4x4xf32>
    %c0_21 = arith.constant 0 : index
    %c0_22 = arith.constant 0 : index
    %37 = vector.load %arg6[%c0_21, %c0_22] : memref<1x4xf32, #tpu.memory_space<vmem>>, vector<1x4xf32>
    %38 = vector.broadcast %37 : vector<1x4xf32> to vector<4x4xf32>
    %39 = arith.addf %36, %38 : vector<4x4xf32>
    %c0_23 = arith.constant 0 : index
    %c0_24 = arith.constant 0 : index
    %40 = vector.load %arg25[%c0_23, %c0_24] : memref<4x4xf32, #tpu.memory_space<vmem>>, vector<4x4xf32>
    tpu.vector_store %arg25[%c0_23, %c0_24], %39 {strides = array<i32>} : memref<4x4xf32, #tpu.memory_space<vmem>>, vector<4x4xf32>,
    %c0_25 = arith.constant 0 : index
    %c0_26 = arith.constant 0 : index
    %41 = vector.load %arg7[%c0_25, %c0_26] : memref<32x8xf32, #tpu.memory_space<vmem>>, vector<32x8xf32>
    %cst_27 = arith.constant dense<0.000000e+00> : vector<4x8xf32>
    %42 = tpu.matmul %3, %41, %cst_27 {dimension_numbers = #tpu.dot_dimension_numbers<[1], [0], [0], [1], [0, 0, 1, 1], [], []>} : vector<4x32xf32>, vector<32x8xf32>, vector<4x8xf32> -> vector<4x8xf32>
    %c0_28 = arith.constant 0 : index
    %c0_29 = arith.constant 0 : index
    %43 = vector.load %arg8[%c0_28, %c0_29] : memref<1x8xf32, #tpu.memory_space<vmem>>, vector<1x8xf32>
    %44 = vector.broadcast %43 : vector<1x8xf32> to vector<4x8xf32>
    %45 = arith.addf %42, %44 : vector<4x8xf32>
    %c0_30 = arith.constant 0 : index
    %c0_31 = arith.constant 0 : index
    %46 = vector.load %arg9[%c0_30, %c0_31] : memref<1x8xf32, #tpu.memory_space<vmem>>, vector<1x8xf32>
    %c0_32 = arith.constant 0 : index
    %c0_33 = arith.constant 0 : index
    %47 = vector.load %arg10[%c0_32, %c0_33] : memref<1x8xf32, #tpu.memory_space<vmem>>, vector<1x8xf32>
    %cst_34 = arith.constant dense<0.000000e+00> : vector<8xf32>
    %48 = vector.multi_reduction <add>, %45, %cst_34 [0] : vector<4x8xf32> to vector<8xf32>
    %49 = vector.shape_cast %48 : vector<8xf32> to vector<1x8xf32>
    %cst_35 = arith.constant 4.000000e+00 : f32
    %50 = vector.broadcast %cst_35 : f32 to vector<1x8xf32>
    %51 = arith.divf %49, %50 : vector<1x8xf32>
    %52 = vector.broadcast %51 : vector<1x8xf32> to vector<4x8xf32>
    %53 = arith.subf %45, %52 : vector<4x8xf32>
    %54 = arith.mulf %53, %53 : vector<4x8xf32>
    %cst_36 = arith.constant dense<0.000000e+00> : vector<8xf32>
    %55 = vector.multi_reduction <add>, %54, %cst_36 [0] : vector<4x8xf32> to vector<8xf32>
    %56 = vector.shape_cast %55 : vector<8xf32> to vector<1x8xf32>
    %cst_37 = arith.constant 4.000000e+00 : f32
    %57 = vector.broadcast %cst_37 : f32 to vector<1x8xf32>
    %58 = arith.divf %56, %57 : vector<1x8xf32>
    %59 = vector.broadcast %51 : vector<1x8xf32> to vector<4x8xf32>
    %60 = arith.subf %45, %59 : vector<4x8xf32>
    %cst_38 = arith.constant 9.99999974E-6 : f32
    %61 = vector.broadcast %cst_38 : f32 to vector<1x8xf32>
    %62 = arith.addf %58, %61 : vector<1x8xf32>
    %63 = math.rsqrt %62 : vector<1x8xf32>
    %64 = vector.broadcast %63 : vector<1x8xf32> to vector<4x8xf32>
    %65 = arith.mulf %60, %64 : vector<4x8xf32>
    %66 = vector.broadcast %46 : vector<1x8xf32> to vector<4x8xf32>
    %67 = arith.mulf %65, %66 : vector<4x8xf32>
    %68 = vector.broadcast %47 : vector<1x8xf32> to vector<4x8xf32>
    %69 = arith.addf %67, %68 : vector<4x8xf32>
    %cst_39 = arith.constant 0.000000e+00 : f32
    %70 = vector.broadcast %cst_39 : f32 to vector<4x8xf32>
    %71 = arith.maximumf %69, %70 : vector<4x8xf32>
    %c0_40 = arith.constant 0 : index
    %c0_41 = arith.constant 0 : index
    %72 = vector.load %arg11[%c0_40, %c0_41] : memref<8x4xf32, #tpu.memory_space<vmem>>, vector<8x4xf32>
    %cst_42 = arith.constant dense<0.000000e+00> : vector<4x4xf32>
    %73 = tpu.matmul %71, %72, %cst_42 {dimension_numbers = #tpu.dot_dimension_numbers<[1], [0], [0], [1], [0, 0, 1, 1], [], []>} : vector<4x8xf32>, vector<8x4xf32>, vector<4x4xf32> -> vector<4x4xf32>
    %c0_43 = arith.constant 0 : index
    %c0_44 = arith.constant 0 : index
    %74 = vector.load %arg12[%c0_43, %c0_44] : memref<1x4xf32, #tpu.memory_space<vmem>>, vector<1x4xf32>
    %75 = vector.broadcast %74 : vector<1x4xf32> to vector<4x4xf32>
    %76 = arith.addf %73, %75 : vector<4x4xf32>
    %c0_45 = arith.constant 0 : index
    %c0_46 = arith.constant 0 : index
    %77 = vector.load %arg26[%c0_45, %c0_46] : memref<4x4xf32, #tpu.memory_space<vmem>>, vector<4x4xf32>
    tpu.vector_store %arg26[%c0_45, %c0_46], %76 {strides = array<i32>} : memref<4x4xf32, #tpu.memory_space<vmem>>, vector<4x4xf32>,
    %c0_47 = arith.constant 0 : index
    %c0_48 = arith.constant 0 : index
    %78 = vector.load %arg13[%c0_47, %c0_48] : memref<4x256xf32, #tpu.memory_space<vmem>>, vector<4x256xf32>
    %cst_49 = arith.constant dense<0.000000e+00> : vector<4x256xf32>
    %79 = tpu.matmul %39, %78, %cst_49 {dimension_numbers = #tpu.dot_dimension_numbers<[1], [0], [0], [1], [0, 0, 1, 1], [], []>} : vector<4x4xf32>, vector<4x256xf32>, vector<4x256xf32> -> vector<4x256xf32>
    %c0_50 = arith.constant 0 : index
    %c0_51 = arith.constant 0 : index
    %80 = vector.load %arg14[%c0_50, %c0_51] : memref<1x256xf32, #tpu.memory_space<vmem>>, vector<1x256xf32>
    %81 = vector.broadcast %80 : vector<1x256xf32> to vector<4x256xf32>
    %82 = arith.addf %79, %81 : vector<4x256xf32>
    %c0_52 = arith.constant 0 : index
    %c0_53 = arith.constant 0 : index
    %83 = vector.load %arg15[%c0_52, %c0_53] : memref<1x256xf32, #tpu.memory_space<vmem>>, vector<1x256xf32>
    %c0_54 = arith.constant 0 : index
    %c0_55 = arith.constant 0 : index
    %84 = vector.load %arg16[%c0_54, %c0_55] : memref<1x256xf32, #tpu.memory_space<vmem>>, vector<1x256xf32>
    %cst_56 = arith.constant dense<0.000000e+00> : vector<256xf32>
    %85 = vector.multi_reduction <add>, %82, %cst_56 [0] : vector<4x256xf32> to vector<256xf32>
    %86 = vector.shape_cast %85 : vector<256xf32> to vector<1x256xf32>
    %cst_57 = arith.constant 4.000000e+00 : f32
    %87 = vector.broadcast %cst_57 : f32 to vector<1x256xf32>
    %88 = arith.divf %86, %87 : vector<1x256xf32>
    %89 = vector.broadcast %88 : vector<1x256xf32> to vector<4x256xf32>
    %90 = arith.subf %82, %89 : vector<4x256xf32>
    %91 = arith.mulf %90, %90 : vector<4x256xf32>
    %cst_58 = arith.constant dense<0.000000e+00> : vector<256xf32>
    %92 = vector.multi_reduction <add>, %91, %cst_58 [0] : vector<4x256xf32> to vector<256xf32>
    %93 = vector.shape_cast %92 : vector<256xf32> to vector<1x256xf32>
    %cst_59 = arith.constant 4.000000e+00 : f32
    %94 = vector.broadcast %cst_59 : f32 to vector<1x256xf32>
    %95 = arith.divf %93, %94 : vector<1x256xf32>
    %96 = vector.broadcast %88 : vector<1x256xf32> to vector<4x256xf32>
    %97 = arith.subf %82, %96 : vector<4x256xf32>
    %cst_60 = arith.constant 9.99999974E-6 : f32
    %98 = vector.broadcast %cst_60 : f32 to vector<1x256xf32>
    %99 = arith.addf %95, %98 : vector<1x256xf32>
    %100 = math.rsqrt %99 : vector<1x256xf32>
    %101 = vector.broadcast %100 : vector<1x256xf32> to vector<4x256xf32>
    %102 = arith.mulf %97, %101 : vector<4x256xf32>
    %103 = vector.broadcast %83 : vector<1x256xf32> to vector<4x256xf32>
    %104 = arith.mulf %102, %103 : vector<4x256xf32>
    %105 = vector.broadcast %84 : vector<1x256xf32> to vector<4x256xf32>
    %106 = arith.addf %104, %105 : vector<4x256xf32>
    %cst_61 = arith.constant 0.000000e+00 : f32
    %107 = vector.broadcast %cst_61 : f32 to vector<4x256xf32>
    %108 = arith.maximumf %106, %107 : vector<4x256xf32>
    %c0_62 = arith.constant 0 : index
    %c0_63 = arith.constant 0 : index
    %109 = vector.load %arg17[%c0_62, %c0_63] : memref<256x256xf32, #tpu.memory_space<vmem>>, vector<256x256xf32>
    %cst_64 = arith.constant dense<0.000000e+00> : vector<4x256xf32>
    %110 = tpu.matmul %108, %109, %cst_64 {dimension_numbers = #tpu.dot_dimension_numbers<[1], [0], [0], [1], [0, 0, 1, 1], [], []>} : vector<4x256xf32>, vector<256x256xf32>, vector<4x256xf32> -> vector<4x256xf32>
    %c0_65 = arith.constant 0 : index
    %c0_66 = arith.constant 0 : index
    %111 = vector.load %arg18[%c0_65, %c0_66] : memref<1x256xf32, #tpu.memory_space<vmem>>, vector<1x256xf32>
    %112 = vector.broadcast %111 : vector<1x256xf32> to vector<4x256xf32>
    %113 = arith.addf %110, %112 : vector<4x256xf32>
    %c0_67 = arith.constant 0 : index
    %c0_68 = arith.constant 0 : index
    %114 = vector.load %arg19[%c0_67, %c0_68] : memref<1x256xf32, #tpu.memory_space<vmem>>, vector<1x256xf32>
    %c0_69 = arith.constant 0 : index
    %c0_70 = arith.constant 0 : index
    %115 = vector.load %arg20[%c0_69, %c0_70] : memref<1x256xf32, #tpu.memory_space<vmem>>, vector<1x256xf32>
    %cst_71 = arith.constant dense<0.000000e+00> : vector<256xf32>
    %116 = vector.multi_reduction <add>, %113, %cst_71 [0] : vector<4x256xf32> to vector<256xf32>
    %117 = vector.shape_cast %116 : vector<256xf32> to vector<1x256xf32>
    %cst_72 = arith.constant 4.000000e+00 : f32
    %118 = vector.broadcast %cst_72 : f32 to vector<1x256xf32>
    %119 = arith.divf %117, %118 : vector<1x256xf32>
    %120 = vector.broadcast %119 : vector<1x256xf32> to vector<4x256xf32>
    %121 = arith.subf %113, %120 : vector<4x256xf32>
    %122 = arith.mulf %121, %121 : vector<4x256xf32>
    %cst_73 = arith.constant dense<0.000000e+00> : vector<256xf32>
    %123 = vector.multi_reduction <add>, %122, %cst_73 [0] : vector<4x256xf32> to vector<256xf32>
    %124 = vector.shape_cast %123 : vector<256xf32> to vector<1x256xf32>
    %cst_74 = arith.constant 4.000000e+00 : f32
    %125 = vector.broadcast %cst_74 : f32 to vector<1x256xf32>
    %126 = arith.divf %124, %125 : vector<1x256xf32>
    %127 = vector.broadcast %119 : vector<1x256xf32> to vector<4x256xf32>
    %128 = arith.subf %113, %127 : vector<4x256xf32>
    %cst_75 = arith.constant 9.99999974E-6 : f32
    %129 = vector.broadcast %cst_75 : f32 to vector<1x256xf32>
    %130 = arith.addf %126, %129 : vector<1x256xf32>
    %131 = math.rsqrt %130 : vector<1x256xf32>
    %132 = vector.broadcast %131 : vector<1x256xf32> to vector<4x256xf32>
    %133 = arith.mulf %128, %132 : vector<4x256xf32>
    %134 = vector.broadcast %114 : vector<1x256xf32> to vector<4x256xf32>
    %135 = arith.mulf %133, %134 : vector<4x256xf32>
    %136 = vector.broadcast %115 : vector<1x256xf32> to vector<4x256xf32>
    %137 = arith.addf %135, %136 : vector<4x256xf32>
    %cst_76 = arith.constant 0.000000e+00 : f32
    %138 = vector.broadcast %cst_76 : f32 to vector<4x256xf32>
    %139 = arith.maximumf %137, %138 : vector<4x256xf32>
    %c0_77 = arith.constant 0 : index
    %c0_78 = arith.constant 0 : index
    %140 = vector.load %arg21[%c0_77, %c0_78] : memref<256x4xf32, #tpu.memory_space<vmem>>, vector<256x4xf32>
    %cst_79 = arith.constant dense<0.000000e+00> : vector<4x4xf32>
    %141 = tpu.matmul %139, %140, %cst_79 {dimension_numbers = #tpu.dot_dimension_numbers<[1], [0], [0], [1], [0, 0, 1, 1], [], []>} : vector<4x256xf32>, vector<256x4xf32>, vector<4x4xf32> -> vector<4x4xf32>
    %c0_80 = arith.constant 0 : index
    %c0_81 = arith.constant 0 : index
    %142 = vector.load %arg22[%c0_80, %c0_81] : memref<1x4xf32, #tpu.memory_space<vmem>>, vector<1x4xf32>
    %143 = vector.broadcast %142 : vector<1x4xf32> to vector<4x4xf32>
    %144 = arith.addf %141, %143 : vector<4x4xf32>
    %c0_82 = arith.constant 0 : index
    %c0_83 = arith.constant 0 : index
    %145 = vector.load %arg27[%c0_82, %c0_83] : memref<4x4xf32, #tpu.memory_space<vmem>>, vector<4x4xf32>
    tpu.vector_store %arg27[%c0_82, %c0_83], %144 {strides = array<i32>} : memref<4x4xf32, #tpu.memory_space<vmem>>, vector<4x4xf32>,
    %c0_84 = arith.constant 0 : index
    %c0_85 = arith.constant 0 : index
    %146 = vector.load %arg23[%c0_84, %c0_85] : memref<4x4xf32, #tpu.memory_space<vmem>>, vector<4x4xf32>
    %cst_86 = arith.constant dense<0.000000e+00> : vector<4x4xf32>
    %147 = tpu.matmul %76, %146, %cst_86 {dimension_numbers = #tpu.dot_dimension_numbers<[1], [0], [0], [1], [0, 0, 1, 1], [], []>} : vector<4x4xf32>, vector<4x4xf32>, vector<4x4xf32> -> vector<4x4xf32>
    %c0_87 = arith.constant 0 : index
    %c0_88 = arith.constant 0 : index
    %148 = vector.load %arg24[%c0_87, %c0_88] : memref<1x4xf32, #tpu.memory_space<vmem>>, vector<1x4xf32>
    %149 = vector.broadcast %148 : vector<1x4xf32> to vector<4x4xf32>
    %150 = arith.addf %147, %149 : vector<4x4xf32>
    %c0_89 = arith.constant 0 : index
    %c0_90 = arith.constant 0 : index
    %151 = vector.load %arg28[%c0_89, %c0_90] : memref<4x4xf32, #tpu.memory_space<vmem>>, vector<4x4xf32>
    tpu.vector_store %arg28[%c0_89, %c0_90], %150 {strides = array<i32>} : memref<4x4xf32, #tpu.memory_space<vmem>>, vector<4x4xf32>,
    return
  }
}

</mosaic_0001>

<bundles_post_ra>
// kernel: tc_forward.3
= control target key start
LH: loop header
LB: loop body
LE: loop exit
PB: predicated region body
PF: predicated region fallthrough
CT: control target
= control target key end

     0   :  { %s2106_s0 = inlined_call_operand.vmem [shape: f32[2,4,32], index: 0, kind: input, shape index: {}]   ;;  %s2107_s1 = inlined_call_operand.vmem [shape: f32[32,8], index: 1, kind: input, shape index: {}]   ;;  %s2108_s2 = inlined_call_operand.vmem [shape: f32[1,8], index: 2, kind: input, shape index: {}]   ;;  %s2109_s3 = inlined_call_operand.vmem [shape: f32[1,8], index: 3, kind: input, shape index: {}, may-alias: {3,9}]   ;;  %s2110_s4 = inlined_call_operand.vmem [shape: f32[1,8], index: 4, kind: input, shape index: {}, may-alias: {4,10}]   ;;  %s2111_s5 = inlined_call_operand.vmem [shape: f32[8,4], index: 5, kind: input, shape index: {}]   ;;  %s2112_s6 = inlined_call_operand.vmem [shape: f32[1,4], index: 6, kind: input, shape index: {}]   ;;  %s2113_s7 = inlined_call_operand.vmem [shape: f32[32,8], index: 7, kind: input, shape index: {}]   ;;  %s2114_s8 = inlined_call_operand.vmem [shape: f32[1,8], index: 8, kind: input, shape index: {}]   ;;  %s2115_s9 = inlined_call_operand.vmem [shape: f32[1,8], index: 9, kind: input, shape index: {}, may-alias: {3,9}]   ;;  %s2116_s10 = inlined_call_operand.vmem [shape: f32[1,8], index: 10, kind: input, shape index: {}, may-alias: {4,10}]   ;;  %s2117_s11 = inlined_call_operand.vmem [shape: f32[8,4], index: 11, kind: input, shape index: {}]   ;;  %s2118_s12 = inlined_call_operand.vmem [shape: f32[1,4], index: 12, kind: input, shape index: {}]   ;;  %s2119_s13 = inlined_call_operand.vmem [shape: f32[4,256], index: 13, kind: input, shape index: {}]   ;;  %s2120_s14 = inlined_call_operand.vmem [shape: f32[1,256], index: 14, kind: input, shape index: {}]   ;;  %s2121_s15 = inlined_call_operand.vmem [shape: f32[1,256], index: 15, kind: input, shape index: {}, may-alias: {15,19}]   ;;  %s2122_s16 = inlined_call_operand.vmem [shape: f32[1,256], index: 16, kind: input, shape index: {}, may-alias: {16,20}]   ;;  %s2123_s17 = inlined_call_operand.vmem [shape: f32[256,256], index: 17, kind: input, shape index: {}]   ;;  %s2124_s18 = inlined_call_operand.vmem [shape: f32[1,256], index: 18, kind: input, shape index: {}]   ;;  %s2125_s19 = inlined_call_operand.vmem [shape: f32[1,256], index: 19, kind: input, shape index: {}, may-alias: {15,19}]   ;;  %s2126_s20 = inlined_call_operand.vmem [shape: f32[1,256], index: 20, kind: input, shape index: {}, may-alias: {16,20}]   ;;  %s2127_s21 = inlined_call_operand.vmem [shape: f32[256,4], index: 21, kind: input, shape index: {}]   ;;  %s2128_s22 = inlined_call_operand.vmem [shape: f32[1,4], index: 22, kind: input, shape index: {}]   ;;  %s2129_s23 = inlined_call_operand.vmem [shape: f32[4,4], index: 23, kind: input, shape index: {}]   ;;  %s2130_s24 = inlined_call_operand.vmem [shape: f32[1,4], index: 24, kind: input, shape index: {}]   ;;  %s2131_s25 = inlined_call_operand.hbm [shape: f32[4,4], index: 25, kind: output, shape index: {0}]   ;;  %s2132_s26 = inlined_call_operand.hbm [shape: f32[4,4], index: 26, kind: output, shape index: {1}]   ;;  %s2133_s27 = inlined_call_operand.hbm [shape: f32[4,4], index: 27, kind: output, shape index: {2}]   ;;  %s2134_s28 = inlined_call_operand.hbm [shape: f32[4,4], index: 28, kind: output, shape index: {3}]  }
   0x1   :  { %2138 = sst [smem:[#allocation12_spill]] %s2106_s0 }
   0x2   :  { %2139 = sst [smem:[#allocation13_spill]] %s2107_s1 }
   0x3   :  { %2140 = sst [smem:[#allocation14_spill]] %s2108_s2 }
   0x4   :  { %2141 = sst [smem:[#allocation15_spill]] %s2109_s3 }
   0x5   :  { %2142 = sst [smem:[#allocation16_spill]] %s2110_s4 }
   0x6   :  { %2143 = sst [smem:[#allocation17_spill]] %s2111_s5 }
   0x7   :  { %2144 = sst [smem:[#allocation18_spill]] %s2112_s6 }
   0x8   :  { %2145 = sst [smem:[#allocation19_spill]] %s2113_s7 }
   0x9   :  { %2146 = sst [smem:[#allocation20_spill]] %s2114_s8 }
   0xa   :  { %2147 = sst [smem:[#allocation21_spill]] %s2115_s9 }
   0xb   :  { %2148 = sst [smem:[#allocation22_spill]] %s2116_s10 }
   0xc   :  { %2149 = sst [smem:[#allocation23_spill]] %s2117_s11 }
   0xd   :  { %2150 = sst [smem:[#allocation24_spill]] %s2118_s12 }
   0xe   :  { %34 = vsyncpa [#allocation3], 0 }
   0xf   :  { %35 = vsyncpa [#allocation5], 0  ;;  %s2151_s9 = sld [smem:[#allocation13_spill]]  ;;  %v1469_v3 = vmov 0.0|0.0   ;;  %vm1470_vm0 = vmmov 0   ;;  %v1471_v6 = vmov 0.0  }
  0x10   :  { %1247 = vmatprep.subr.bf16.mxu1 %v1469_v3  ;;  %1218 = vmatprep.mubr.msk.f32.mxu1 %vm1470_vm0, %v1471_v6 }
  0x15   :  { %v90_v0 = vld [vmem:[%s2151_s9] sm:$0xff]  ;;  %v91_v1 = vld [vmem:[%s2151_s9 + $0x8] sm:$0xff]  ;;  %v92_v2 = vld [vmem:[%s2151_s9 + $0x10] sm:$0xff] }
  0x16   :  { %v1248_v4 = vpack.c.bf16 %v91_v1, %v90_v0  ;;  %v93_v5 = vld [vmem:[%s2151_s9 + $0x18] sm:$0xff] }
  0x17   :  { %36 = vsyncpa [#allocation8], 0  ;;  %v1251_v7 = vpack.c.bf16 %v93_v5, %v92_v2  ;;  %s2152_s7 = sld [smem:[#allocation12_spill]]  ;;  %vm101_vm1 = vcmask 261120   ;;  %s2153_s4 = sld [smem:[#allocation17_spill]]  ;;  %vm177_vm2 = vcmask 60416  }
  0x18   :  { %1249 = vmatpush3.bf16.msra.mxu1 %v1248_v4  ;;  %s2154_s9 = sld [smem:[#allocation14_spill]]  ;;  %s2155_s6 = sld [smem:[#allocation15_spill]]  ;;  %vm223_vm3 = vcmask 64512   ;;  %v503_v48 = vld [vmem:[%s2119_s13] sm:$0xff]  ;;  %vm522_vm4 = vcmask 1043456   ;;  %vm297_vm5 = vcmask 27648  }
  0x19   :  { %1250 = vmatprep.subr.bf16.mxu1 %v1469_v3  ;;  %s2156_s11 = sld [smem:[#allocation16_spill]]  ;;  %s2157_s12 = sld [smem:[#allocation19_spill]]  ;;  %v517_v49 = vcombine.high %v503_v48, %v503_v48  ;;  %vm518_vm6 = vcmask 31744  }
  0x1a   :  { %s2159_s1 = sld [smem:[#allocation18_spill]]  ;;  %s2160_s5 = sld [smem:[#allocation20_spill]] }
  0x1b   :  { %s2161_s30 = sld [smem:[#allocation21_spill]]  ;;  %s2162_s10 = sld [smem:[#allocation22_spill]] }
  0x1c   :  { %1252 = vmatpush3.bf16.msra.mxu1 %v1251_v7  ;;  %s2163_s29 = sld [smem:[#allocation24_spill]]  ;;  %s1472_s3 = smov [#allocation4]  }
  0x1d   :  { %v87_v8 = vld [vmem:[%s2152_s7] sm:$0xf]  ;;  %1221 = vmatprep.subr.mxu1 %v1471_v6  ;;  %v1139_v46 = vld [vmem:[%s2152_s7 + $0x4] sm:$0xf] }
  0x1e   :  { %v215_v9 = vld [vmem:[%s2153_s4] sm:$0xff] }
  0x1f   :  { %1219 = vmatmul.mubr.msk.f32.vlgmr.msra.gmra.mrb[0].mxu1 %vm101_vm1, %v87_v8  ;;  %v1140_v10 = vld [vmem:[%s2154_s9] ss:$0 sm:$0xff]  ;;  %v300_v39 = vld [vmem:[%s2157_s12 + $0x8] sm:$0xff]  ;;  %v301_v43 = vld [vmem:[%s2157_s12 + $0x10] sm:$0xff] }
  0x20   :  { %1223 = vmatprep.mubr.msk.f32.mxu1 %vm1470_vm0, %v1471_v6  ;;  %1222 = vmatpush3.msra.mxu1 %v215_v9  ;;  %v1142_v34 = vld [vmem:[%s2155_s6] ss:$0 sm:$0xff]  ;;  %v302_v44 = vld [vmem:[%s2157_s12 + $0x18] sm:$0xff]  ;;  %s1100_s6 = sshll.u32 %s1472_s3, 4  ;;  %s1101_s6 = int_to_ptr.vmem [resolvable:$true] %s1100_s6 }
  0x21   :  { %1253 = vmatprep.subr.bf16.mxu1 %v1469_v3  ;;  %v1143_v36 = vld [vmem:[%s2156_s11] ss:$0 sm:$0xff]  ;;  %v1257_v45 = vpack.c.bf16 %v302_v44, %v301_v43  ;;  %s2158_s11 = sld [smem:[#allocation23_spill]]  ;;  %v684_v43 = vld [vmem:[%s2123_s17 + $0x70] sm:$0xff]  ;;  %p1380_p1 = scmp.lt.s32.totalorder %s1101_s6, %s1101_s6 }
  0x22   :  { %v299_v38 = vld [vmem:[%s2157_s12] sm:$0xff] }
  0x23   :  { %v1254_v41 = vpack.c.bf16 %v300_v39, %v299_v38  ;;  %v1144_v50 = vld [vmem:[%s2159_s1] ss:$0 sm:$0xff]  ;;  %v683_v39 = vld [vmem:[%s2123_s17 + $0x68] sm:$0xff] }
  0x24   :  { %v1146_v54 = vld [vmem:[%s2160_s5] ss:$0 sm:$0xff] }
  0x27   :  { %v421_v47 = vld [vmem:[%s2158_s11] sm:$0xff]  ;;  %s1375_s11 = scalar_lea.vmem %s1101_s6, 64 }
  0x28   :  { %p1376_p0 = scmp.ne.s32.totalorder %s1101_s6, %s1375_s11  ;;  %p1381_p2 = scmp.lt.s32.totalorder %s1375_s11, %s1375_s11 }
  0x2a   :  { %p1382_p3 = por %p1381_p2, %p1380_p1 }
  0x2c   :  { %p1383_p4 = pnand %p1382_p3, %p1376_p0 }
  0xf2   :  { %v171_v11 = vpop.f32.mrb[0].mxu1 }
  0xf3   :  { %v172_v12 = vadd.f32 %v1140_v10, %v171_v11  ;;  %v1220_v13 = vpop.f32.mrb[1].mxu1 }
  0xf5   :  { %v178_v14 = vsel %vm177_vm2, %v172_v12, 0.0 }
  0xf6   :  { %v179_v15 = vrot.slane %v178_v14, 4 }
  0xf8   :  { %v180_v16 = vadd.f32 %v179_v15, %v178_v14  ;;  %v1148_v15 = vld [vmem:[%s2161_s30] ss:$0 sm:$0xff] }
  0xfa   :  { %v181_v17 = vrot.slane %v180_v16, 2 }
  0xfc   :  { %v182_v18 = vadd.f32 %v181_v17, %v180_v16  ;;  %v1149_v17 = vld [vmem:[%s2162_s10] ss:$0 sm:$0xff]  ;;  %s1473_s10 = smov [#allocation2]  }
  0xfd   :  { %s1090_s0 = sshll.u32 %s1473_s10, 4  ;;  %s1091_s0 = int_to_ptr.vmem [resolvable:$true] %s1090_s0 }
  0xfe   :  { %v183_v19 = vrot.slane %v182_v18, 1 }
 0x100   :  { %v184_v20 = vadd.f32 %v183_v19, %v182_v18 }
 0x102   :  { %v186_v21 = vmul.f32 0.25, %v184_v20 }
 0x104   :  { %v187_v22 = vsub.f32 %v172_v12, %v186_v21  ;;  %v671_v21 = vld [vmem:[%s2123_s17 + $0x8] sm:$0xff] }
 0x106   :  { %v188_v23 = vmul.f32 %v187_v22, %v187_v22 }
 0x108   :  { %v189_v24 = vsel %vm177_vm2, %v188_v23, 0.0 }
 0x109   :  { %v190_v25 = vrot.slane %v189_v24, 4 }
 0x10b   :  { %v191_v26 = vadd.f32 %v190_v25, %v189_v24  ;;  %v670_v24 = vld [vmem:[%s2123_s17] sm:$0xff]  ;;  %v672_v25 = vld [vmem:[%s2123_s17 + $0x10] sm:$0xff] }
 0x10d   :  { %v192_v27 = vrot.slane %v191_v26, 2 }
 0x10f   :  { %v193_v28 = vadd.f32 %v192_v27, %v191_v26  ;;  %v1261_v26 = vpack.c.bf16 %v672_v25, %v670_v24  ;;  %v675_v27 = vld [vmem:[%s2123_s17 + $0x28] sm:$0xff]  ;;  %v717_v25 = vld [vmem:[%s2123_s17 + $0x178] sm:$0xff] }
 0x110   :  { %v715_v24 = vld [vmem:[%s2123_s17 + $0x168] sm:$0xff] }
 0x111   :  { %v194_v29 = vrot.slane %v193_v28, 1 }
 0x113   :  { %v195_v30 = vadd.f32 %v194_v29, %v193_v28  ;;  %v677_v28 = vld [vmem:[%s2123_s17 + $0x38] sm:$0xff] }
 0x114   :  { %v1263_v29 = vpack.c.bf16 %v677_v28, %v675_v27  ;;  %v714_v27 = vld [vmem:[%s2123_s17 + $0x160] sm:$0xff]  ;;  %v716_v28 = vld [vmem:[%s2123_s17 + $0x170] sm:$0xff] }
 0x115   :  { %v196_v31 = vmul.f32 0.25, %v195_v30  ;;  %v674_v30 = vld [vmem:[%s2123_s17 + $0x20] sm:$0xff] }
 0x117   :  { %v197_v32 = vadd.f32 1e-05, %v196_v31  ;;  %v676_v31 = vld [vmem:[%s2123_s17 + $0x30] sm:$0xff] }
 0x119   :  { %1363 = vrsqrt.f32 %v197_v32  ;;  %v1265_v32 = vpack.c.bf16 %v676_v31, %v674_v30  ;;  %v719_v30 = vld [vmem:[%s2123_s17 + $0x188] sm:$0xff]  ;;  %v721_v31 = vld [vmem:[%s2123_s17 + $0x198] sm:$0xff] }
 0x123   :  { %v1364_v33 = vpop.eup %1363 }
 0x124   :  { %v199_v35 = vmul.f32 %v1364_v33, %v187_v22  ;;  %v673_v22 = vld [vmem:[%s2123_s17 + $0x18] sm:$0xff]  ;;  %v679_v33 = vld [vmem:[%s2123_s17 + $0x48] sm:$0xff] }
 0x125   :  { %v1259_v23 = vpack.c.bf16 %v673_v22, %v671_v21  ;;  %v710_v21 = vld [vmem:[%s2123_s17 + $0x140] sm:$0xff]  ;;  %v712_v22 = vld [vmem:[%s2123_s17 + $0x150] sm:$0xff] }
 0x126   :  { %v206_v37 = vmul.f32 %v1142_v34, %v199_v35  ;;  %v681_v34 = vld [vmem:[%s2123_s17 + $0x58] sm:$0xff] }
 0x127   :  { %1260 = vmatprep.subr.bf16.mxu0 %v1259_v23  ;;  %v1267_v35 = vpack.c.bf16 %v681_v34, %v679_v33  ;;  %v1301_v23 = vpack.c.bf16 %v712_v22, %v710_v21  ;;  %v718_v33 = vld [vmem:[%s2123_s17 + $0x180] sm:$0xff]  ;;  %v720_v34 = vld [vmem:[%s2123_s17 + $0x190] sm:$0xff] }
 0x128   :  { %v213_v40 = vadd.f32 %v1143_v36, %v206_v37  ;;  %1262 = vmatpush1.bf16.msra.mxu0 %v1261_v26  ;;  %v678_v36 = vld [vmem:[%s2123_s17 + $0x40] sm:$0xff]  ;;  %v680_v37 = vld [vmem:[%s2123_s17 + $0x50] sm:$0xff]  ;;  %v1303_v26 = vpack.c.bf16 %v717_v25, %v715_v24 }
 0x129   :  { %1264 = vmatprep.subr.bf16.mxu0 %v1263_v29  ;;  %v1269_v38 = vpack.c.bf16 %v680_v37, %v678_v36  ;;  %v1305_v29 = vpack.c.bf16 %v716_v28, %v714_v27  ;;  %v723_v36 = vld [vmem:[%s2123_s17 + $0x1a8] sm:$0xff]  ;;  %v725_v37 = vld [vmem:[%s2123_s17 + $0x1b8] sm:$0xff] }
 0x12a   :  { %v214_v42 = vmax.f32 %v213_v40, 0.0  ;;  %v685_v40 = vld [vmem:[%s2123_s17 + $0x78] sm:$0xff] }
 0x12c   :  { %1224 = vmatmul.mubr.msk.f32.vlgmr.msra.gmra.mrb[2].mxu1 %vm223_vm3, %v214_v42  ;;  %1266 = vmatpush1.bf16.msra.mxu0 %v1265_v32  ;;  %v682_v42 = vld [vmem:[%s2123_s17 + $0x60] sm:$0xff]  ;;  %v1307_v32 = vpack.c.bf16 %v721_v31, %v719_v30 }
 0x12d   :  { %1255 = vmatpush3.bf16.msra.mxu1 %v1254_v41  ;;  %1234 = vmatprep.mubr.msk.f32.mxu1 %vm1470_vm0, %v1471_v6  ;;  %v1271_v41 = vpack.c.bf16 %v685_v40, %v683_v39  ;;  %v1273_v44 = vpack.c.bf16 %v684_v43, %v682_v42  ;;  %v722_v39 = vld [vmem:[%s2123_s17 + $0x1a0] sm:$0xff]  ;;  %v724_v40 = vld [vmem:[%s2123_s17 + $0x1b0] sm:$0xff]  ;;  %v727_v42 = vld [vmem:[%s2123_s17 + $0x1c8] sm:$0xff] }
 0x12e   :  { %1256 = vmatprep.subr.bf16.mxu1 %v1469_v3  ;;  %1268 = vmatprep.subr.bf16.mxu0 %v1267_v35  ;;  %v1309_v35 = vpack.c.bf16 %v720_v34, %v718_v33  ;;  %v729_v43 = vld [vmem:[%s2123_s17 + $0x1d8] sm:$0xff] }
 0x130   :  { %1270 = vmatpush1.bf16.msra.mxu0 %v1269_v38  ;;  %v1311_v38 = vpack.c.bf16 %v725_v37, %v723_v36 }
 0x131   :  { %1258 = vmatpush3.bf16.msra.mxu1 %v1257_v45  ;;  %1272 = vmatprep.subr.bf16.mxu0 %v1271_v41  ;;  %v687_v45 = vld [vmem:[%s2123_s17 + $0x88] sm:$0xff]  ;;  %v1313_v41 = vpack.c.bf16 %v724_v40, %v722_v39 }
 0x132   :  { %1237 = vmatprep.subr.mxu1 %v1471_v6 }
 0x134   :  { %1235 = vmatmul.mubr.msk.f32.vlgmr.msra.gmra.mrb[4].mxu1 %vm101_vm1, %v1139_v46  ;;  %1274 = vmatpush1.bf16.msra.mxu0 %v1273_v44  ;;  %v689_v46 = vld [vmem:[%s2123_s17 + $0x98] sm:$0xff]  ;;  %v1315_v44 = vpack.c.bf16 %v729_v43, %v727_v42 }
 0x135   :  { %1239 = vmatprep.mubr.msk.f32.mxu1 %vm1470_vm0, %v1471_v6  ;;  %1238 = vmatpush3.msra.mxu1 %v421_v47  ;;  %v1275_v47 = vpack.c.bf16 %v689_v46, %v687_v45  ;;  %v726_v45 = vld [vmem:[%s2123_s17 + $0x1c0] sm:$0xff]  ;;  %v728_v46 = vld [vmem:[%s2123_s17 + $0x1d0] sm:$0xff] }
 0x136   :  { %1152 = vmatprep.subr.msk.mxu1 %vm522_vm4, %v517_v49  ;;  %v688_v49 = vld [vmem:[%s2123_s17 + $0x90] sm:$0xff] }
 0x137   :  { %1276 = vmatprep.subr.bf16.mxu0 %v1275_v47  ;;  %v731_v47 = vld [vmem:[%s2123_s17 + $0x1e8] sm:$0xff] }
 0x1ff   :  { %v293_v51 = vpop.f32.mrb[2].mxu1 }
 0x200   :  { %v294_v52 = vadd.f32 %v1144_v50, %v293_v51  ;;  %v1225_v53 = vpop.f32.mrb[3].mxu1  ;;  %v691_v51 = vld [vmem:[%s2123_s17 + $0xa8] sm:$0xff] }
 0x202   :  { %298 = vst.msk [vmem:[#allocation2] sm:$0xf] %vm297_vm5, %v294_v52 }
 0x207   :  { %v379_v55 = vpop.f32.mrb[4].mxu1 }
 0x208   :  { %v380_v56 = vadd.f32 %v1146_v54, %v379_v55  ;;  %v1236_v57 = vpop.f32.mrb[5].mxu1  ;;  %v690_v54 = vld [vmem:[%s2123_s17 + $0xa0] sm:$0xff]  ;;  %v692_v55 = vld [vmem:[%s2123_s17 + $0xb0] sm:$0xff] }
 0x209   :  { %v695_v57 = vld [vmem:[%s2123_s17 + $0xc8] sm:$0xff] }
 0x20a   :  { %v385_v58 = vsel %vm177_vm2, %v380_v56, 0.0 }
 0x20b   :  { %v386_v59 = vrot.slane %v385_v58, 4 }
 0x20d   :  { %v387_v60 = vadd.f32 %v386_v59, %v385_v58  ;;  %v697_v58 = vld [vmem:[%s2123_s17 + $0xd8] sm:$0xff] }
 0x20e   :  { %v1283_v59 = vpack.c.bf16 %v697_v58, %v695_v57  ;;  %v1150_v57 = vld [vmem:[%s2163_s29] ss:$0 sm:$0xff] }
 0x20f   :  { %v388_v61 = vrot.slane %v387_v60, 2  ;;  %v504_v58 = vld [vmem:[%s2120_s14] sm:$0x3] }
 0x211   :  { %v389_v62 = vadd.f32 %v388_v61, %v387_v60  ;;  %v694_v60 = vld [vmem:[%s2123_s17 + $0xc0] sm:$0xff]  ;;  %v696_v61 = vld [vmem:[%s2123_s17 + $0xd0] sm:$0xff] }
 0x213   :  { %v390_v63 = vrot.slane %v389_v62, 1 }
 0x215   :  { %v391_v0 = vadd.f32 %v390_v63, %v389_v62  ;;  %v1285_v62 = vpack.c.bf16 %v696_v61, %v694_v60  ;;  %v699_v63 = vld [vmem:[%s2123_s17 + $0xe8] sm:$0xff] }
 0x217   :  { %v392_v1 = vmul.f32 0.25, %v391_v0  ;;  %v701_v0 = vld [vmem:[%s2123_s17 + $0xf8] sm:$0xff] }
 0x219   :  { %v393_v2 = vsub.f32 %v380_v56, %v392_v1  ;;  %v1281_v56 = vpack.c.bf16 %v692_v55, %v690_v54  ;;  %v1287_v1 = vpack.c.bf16 %v701_v0, %v699_v63  ;;  %v506_v54 = vlaneseq }
 0x21b   :  { %v394_v3 = vmul.f32 %v393_v2, %v393_v2  ;;  %v507_v55 = vshrl.u32 %v506_v54, 7 }
 0x21d   :  { %v395_v4 = vsel %vm177_vm2, %v394_v3, 0.0  ;;  %v700_v3 = vld [vmem:[%s2123_s17 + $0xf0] sm:$0xff] }
 0x21e   :  { %v396_v5 = vrot.slane %v395_v4, 4 }
 0x220   :  { %v397_v7 = vadd.f32 %v396_v5, %v395_v4  ;;  %v703_v5 = vld [vmem:[%s2123_s17 + $0x108] sm:$0xff] }
 0x222   :  { %v398_v8 = vrot.slane %v397_v7, 2 }
 0x224   :  { %v399_v9 = vadd.f32 %v398_v8, %v397_v7  ;;  %v705_v7 = vld [vmem:[%s2123_s17 + $0x118] sm:$0xff] }
 0x225   :  { %v1291_v8 = vpack.c.bf16 %v705_v7, %v703_v5 }
 0x226   :  { %v400_v10 = vrot.slane %v399_v9, 1 }
 0x228   :  { %v401_v11 = vadd.f32 %v400_v10, %v399_v9  ;;  %v702_v9 = vld [vmem:[%s2123_s17 + $0x100] sm:$0xff]  ;;  %v704_v10 = vld [vmem:[%s2123_s17 + $0x110] sm:$0xff] }
 0x22a   :  { %v402_v12 = vmul.f32 0.25, %v401_v11  ;;  %v1293_v11 = vpack.c.bf16 %v704_v10, %v702_v9 }
 0x22c   :  { %v403_v13 = vadd.f32 1e-05, %v402_v12  ;;  %v707_v12 = vld [vmem:[%s2123_s17 + $0x128] sm:$0xff] }
 0x22e   :  { %1365 = vrsqrt.f32 %v403_v13  ;;  %v709_v13 = vld [vmem:[%s2123_s17 + $0x138] sm:$0xff] }
 0x238   :  { %v1366_v14 = vpop.eup %1365 }
 0x239   :  { %v405_v16 = vmul.f32 %v1366_v14, %v393_v2  ;;  %v698_v2 = vld [vmem:[%s2123_s17 + $0xe0] sm:$0xff]  ;;  %v1295_v14 = vpack.c.bf16 %v709_v13, %v707_v12 }
 0x23a   :  { %v1289_v4 = vpack.c.bf16 %v700_v3, %v698_v2 }
 0x23b   :  { %v412_v18 = vmul.f32 %v1148_v15, %v405_v16  ;;  %v706_v15 = vld [vmem:[%s2123_s17 + $0x120] sm:$0xff]  ;;  %v708_v16 = vld [vmem:[%s2123_s17 + $0x130] sm:$0xff] }
 0x23d   :  { %v419_v19 = vadd.f32 %v1149_v17, %v412_v18  ;;  %v1297_v17 = vpack.c.bf16 %v708_v16, %v706_v15  ;;  %v711_v18 = vld [vmem:[%s2123_s17 + $0x148] sm:$0xff] }
 0x23f   :  { %v420_v20 = vmax.f32 %v419_v19, 0.0  ;;  %v713_v19 = vld [vmem:[%s2123_s17 + $0x158] sm:$0xff] }
 0x241   :  { %1240 = vmatmul.mubr.msk.f32.vlgmr.msra.gmra.mrb[6].mxu1 %vm223_vm3, %v420_v20  ;;  %v1299_v20 = vpack.c.bf16 %v713_v19, %v711_v18 }
 0x242   :  { %1153 = vmatpush1.msk.msra.mxu1 %vm522_vm4, %v503_v48  ;;  %591 = vmatprep.mubr.f32.mxu1 %v1471_v6  ;;  %v686_v48 = vld [vmem:[%s2123_s17 + $0x80] sm:$0xff] }
 0x243   :  { %v1277_v50 = vpack.c.bf16 %v688_v49, %v686_v48  ;;  %v1317_v48 = vpack.c.bf16 %v728_v46, %v726_v45  ;;  %v733_v49 = vld [vmem:[%s2123_s17 + $0x1f8] sm:$0xff]  ;;  %v599_v45 = vld [vmem:[%s2122_s16] sm:$0x3] }
 0x245   :  { %1154 = vmatmul.mubr.msk.f32.vlgmr.msra.gmra.mrb[8].mxu1 %vm518_vm6, %v294_v52  ;;  %1278 = vmatpush1.bf16.msra.mxu0 %v1277_v50  ;;  %v693_v52 = vld [vmem:[%s2123_s17 + $0xb8] sm:$0xff]  ;;  %v730_v50 = vld [vmem:[%s2123_s17 + $0x1e0] sm:$0xff] }
 0x246   :  { %v1279_v53 = vpack.c.bf16 %v693_v52, %v691_v51  ;;  %v732_v51 = vld [vmem:[%s2123_s17 + $0x1f0] sm:$0xff]  ;;  %v1319_v52 = vpack.c.bf16 %v733_v49, %v731_v47 }
 0x248   :  { %1280 = vmatprep.subr.bf16.mxu0 %v1279_v53  ;;  %v1321_v53 = vpack.c.bf16 %v732_v51, %v730_v50 }
 0x249   :  { %1282 = vmatpush1.bf16.msra.mxu0 %v1281_v56  ;;  %v1896_v56 = vsub.s32 0, %v507_v55 }
 0x24a   :  { %1284 = vmatprep.subr.bf16.mxu0 %v1283_v59  ;;  %v1904_v59 = vsub.s32 1, %v507_v55 }
 0x24b   :  { %v509_v63 = vrot.slane %v504_v58, %v1896_v56  ;;  %v659_v51 = vrot.slane %v599_v45, %v1896_v56 }
 0x24c   :  { %v513_v0 = vrot.slane %v504_v58, %v1904_v59 }
 0x24d   :  { %1286 = vmatpush1.bf16.msra.mxu0 %v1285_v62 }
 0x24e   :  { %1288 = vmatprep.subr.bf16.mxu0 %v1287_v1 }
 0x251   :  { %1290 = vmatpush1.bf16.msra.mxu0 %v1289_v4 }
 0x252   :  { %1292 = vmatprep.subr.bf16.mxu0 %v1291_v8 }
 0x255   :  { %1294 = vmatpush1.bf16.msra.mxu0 %v1293_v11 }
 0x256   :  { %1296 = vmatprep.subr.bf16.mxu0 %v1295_v14 }
 0x259   :  { %1298 = vmatpush1.bf16.msra.mxu0 %v1297_v17 }
 0x25a   :  { %1300 = vmatprep.subr.bf16.mxu0 %v1299_v20 }
 0x25d   :  { %1302 = vmatpush1.bf16.msra.mxu0 %v1301_v23 }
 0x25e   :  { %1304 = vmatprep.subr.bf16.mxu0 %v1303_v26 }
 0x261   :  { %1306 = vmatpush1.bf16.msra.mxu0 %v1305_v29 }
 0x262   :  { %1308 = vmatprep.subr.bf16.mxu0 %v1307_v32 }
 0x265   :  { %1310 = vmatpush1.bf16.msra.mxu0 %v1309_v35 }
 0x266   :  { %1312 = vmatprep.subr.bf16.mxu0 %v1311_v38 }
 0x269   :  { %1314 = vmatpush1.bf16.msra.mxu0 %v1313_v41 }
 0x26a   :  { %1316 = vmatprep.subr.bf16.mxu0 %v1315_v44  ;;  %v598_v44 = vld [vmem:[%s2121_s15] sm:$0x3] }
 0x26b   :  { %v646_v46 = vrot.slane %v598_v44, %v1896_v56 }
 0x26d   :  { %1318 = vmatpush1.bf16.msra.mxu0 %v1317_v48  ;;  %v650_v48 = vrot.slane %v598_v44, %v1904_v59  ;;  %v903_v44 = vld [vmem:[%s2127_s21 + $0x70] sm:$0xff] }
 0x26e   :  { %1320 = vmatprep.subr.bf16.mxu0 %v1319_v52 }
 0x271   :  { %1322 = vmatpush1.bf16.msra.mxu0 %v1321_v53  ;;  %v663_v53 = vrot.slane %v599_v45, %v1904_v59 }
 0x314   :  { %v498_v60 = vpop.f32.mrb[6].mxu1 }
 0x315   :  { %v1906_v61 = vadd.f32 %v1150_v57, %v498_v60  ;;  %v1241_v62 = vpop.f32.mrb[7].mxu1 }
 0x317   :  { %502 = vst.msk [vmem:[#allocation4] sm:$0xf] %vm297_vm5, %v1906_v61 }
 0x318   :  { %v593_v1 = vpop.f32.mrb[8].mxu1 }
 0x319   :  { %v594_v2 = vadd.f32 %v593_v1, %v509_v63  ;;  %v595_v3 = vpop.f32.mrb[9].mxu1  ;;  %v905_v63 = vld [vmem:[%s2127_s21 + $0x80] sm:$0xff] }
 0x31a   :  { %v596_v4 = vadd.f32 %v595_v3, %v513_v0  ;;  %v906_v0 = vld [vmem:[%s2127_s21 + $0x88] sm:$0xff] }
 0x31b   :  { %v600_v5 = vsel %vm522_vm4, %v594_v2, 0.0  ;;  %v1323_v1 = vpack.c.bf16 %v906_v0, %v905_v63  ;;  %v890_v3 = vld [vmem:[%s2127_s21 + $0x8] sm:$0xff] }
 0x31c   :  { %v601_v7 = vrot.slane %v600_v5, 4  ;;  %v607_v8 = vsel %vm522_vm4, %v596_v4, 0.0 }
 0x31d   :  { %v608_v9 = vrot.slane %v607_v8, 4  ;;  %1324 = vmatprep.subr.bf16.mxu1 %v1323_v1 }
 0x31e   :  { %v602_v10 = vadd.f32 %v601_v7, %v600_v5  ;;  %v907_v5 = vld [vmem:[%s2127_s21 + $0x90] sm:$0xff]  ;;  %v908_v7 = vld [vmem:[%s2127_s21 + $0x98] sm:$0xff] }
 0x31f   :  { %v609_v11 = vadd.f32 %v608_v9, %v607_v8  ;;  %v1327_v8 = vpack.c.bf16 %v908_v7, %v907_v5  ;;  %v891_v9 = vld [vmem:[%s2127_s21 + $0x10] sm:$0xff] }
 0x320   :  { %v603_v12 = vrot.slane %v602_v10, 2 }
 0x321   :  { %v610_v13 = vrot.slane %v609_v11, 2 }
 0x322   :  { %v604_v14 = vadd.f32 %v603_v12, %v602_v10  ;;  %v892_v10 = vld [vmem:[%s2127_s21 + $0x18] sm:$0xff]  ;;  %v909_v12 = vld [vmem:[%s2127_s21 + $0xa0] sm:$0xff] }
 0x323   :  { %v611_v15 = vadd.f32 %v610_v13, %v609_v11  ;;  %v1329_v11 = vpack.c.bf16 %v892_v10, %v891_v9  ;;  %v910_v13 = vld [vmem:[%s2127_s21 + $0xa8] sm:$0xff] }
 0x324   :  { %v605_v16 = vrot.slane %v604_v14, 1 }
 0x325   :  { %v612_v17 = vrot.slane %v611_v15, 1 }
 0x326   :  { %v606_v18 = vadd.f32 %v605_v16, %v604_v14  ;;  %v1331_v14 = vpack.c.bf16 %v910_v13, %v909_v12  ;;  %v894_v16 = vld [vmem:[%s2127_s21 + $0x28] sm:$0xff] }
 0x327   :  { %v613_v19 = vadd.f32 %v612_v17, %v611_v15  ;;  %v893_v15 = vld [vmem:[%s2127_s21 + $0x20] sm:$0xff] }
 0x328   :  { %v614_v20 = vmul.f32 0.25, %v606_v18  ;;  %v1333_v17 = vpack.c.bf16 %v894_v16, %v893_v15  ;;  %v911_v18 = vld [vmem:[%s2127_s21 + $0xb0] sm:$0xff] }
 0x329   :  { %v615_v21 = vmul.f32 0.25, %v613_v19  ;;  %v912_v19 = vld [vmem:[%s2127_s21 + $0xb8] sm:$0xff] }
 0x32a   :  { %v616_v22 = vsub.f32 %v594_v2, %v614_v20  ;;  %v889_v2 = vld [vmem:[%s2127_s21] sm:$0xff]  ;;  %v1335_v20 = vpack.c.bf16 %v912_v19, %v911_v18 }
 0x32b   :  { %v617_v23 = vsub.f32 %v596_v4, %v615_v21  ;;  %v1325_v4 = vpack.c.bf16 %v890_v3, %v889_v2  ;;  %v895_v21 = vld [vmem:[%s2127_s21 + $0x30] sm:$0xff] }
 0x32c   :  { %v618_v24 = vmul.f32 %v616_v22, %v616_v22 }
 0x32d   :  { %v619_v25 = vmul.f32 %v617_v23, %v617_v23  ;;  %1326 = vmatpush3.bf16.msra.mxu1 %v1325_v4 }
 0x32e   :  { %v620_v26 = vsel %vm522_vm4, %v618_v24, 0.0  ;;  %1328 = vmatprep.subr.bf16.mxu1 %v1327_v8  ;;  %v913_v24 = vld [vmem:[%s2127_s21 + $0xc0] sm:$0xff] }
 0x32f   :  { %v621_v27 = vrot.slane %v620_v26, 4  ;;  %v627_v28 = vsel %vm522_vm4, %v619_v25, 0.0  ;;  %v914_v25 = vld [vmem:[%s2127_s21 + $0xc8] sm:$0xff] }
 0x330   :  { %v628_v29 = vrot.slane %v627_v28, 4 }
 0x331   :  { %v622_v30 = vadd.f32 %v621_v27, %v620_v26  ;;  %1330 = vmatpush3.bf16.msra.mxu1 %v1329_v11  ;;  %v1339_v26 = vpack.c.bf16 %v914_v25, %v913_v24  ;;  %v897_v27 = vld [vmem:[%s2127_s21 + $0x40] sm:$0xff] }
 0x332   :  { %v629_v31 = vadd.f32 %v628_v29, %v627_v28  ;;  %1332 = vmatprep.subr.bf16.mxu1 %v1331_v14  ;;  %v898_v28 = vld [vmem:[%s2127_s21 + $0x48] sm:$0xff] }
 0x333   :  { %v623_v32 = vrot.slane %v622_v30, 2  ;;  %v1341_v29 = vpack.c.bf16 %v898_v28, %v897_v27 }
 0x334   :  { %v630_v33 = vrot.slane %v629_v31, 2 }
 0x335   :  { %v624_v34 = vadd.f32 %v623_v32, %v622_v30  ;;  %1334 = vmatpush3.bf16.msra.mxu1 %v1333_v17  ;;  %v915_v30 = vld [vmem:[%s2127_s21 + $0xd0] sm:$0xff] }
 0x336   :  { %v631_v35 = vadd.f32 %v630_v33, %v629_v31  ;;  %1336 = vmatprep.subr.bf16.mxu1 %v1335_v20  ;;  %v916_v31 = vld [vmem:[%s2127_s21 + $0xd8] sm:$0xff]  ;;  %v899_v33 = vld [vmem:[%s2127_s21 + $0x50] sm:$0xff] }
 0x337   :  { %v625_v36 = vrot.slane %v624_v34, 1  ;;  %v1343_v32 = vpack.c.bf16 %v916_v31, %v915_v30 }
 0x338   :  { %v632_v37 = vrot.slane %v631_v35, 1 }
 0x339   :  { %v626_v38 = vadd.f32 %v625_v36, %v624_v34  ;;  %v900_v34 = vld [vmem:[%s2127_s21 + $0x58] sm:$0xff]  ;;  %v917_v36 = vld [vmem:[%s2127_s21 + $0xe0] sm:$0xff] }
 0x33a   :  { %v633_v39 = vadd.f32 %v632_v37, %v631_v35  ;;  %v1345_v35 = vpack.c.bf16 %v900_v34, %v899_v33  ;;  %v918_v37 = vld [vmem:[%s2127_s21 + $0xe8] sm:$0xff]  ;;  %v817_v33 = vld [vmem:[%s2125_s19] sm:$0x3] }
 0x33b   :  { %v634_v40 = vmul.f32 0.25, %v626_v38  ;;  %v1347_v38 = vpack.c.bf16 %v918_v37, %v917_v36  ;;  %v818_v34 = vld [vmem:[%s2126_s20] sm:$0x3]  ;;  %v869_v37 = vrot.slane %v817_v33, %v1904_v59 }
 0x33c   :  { %v635_v41 = vmul.f32 0.25, %v633_v39  ;;  %v901_v39 = vld [vmem:[%s2127_s21 + $0x60] sm:$0xff] }
 0x33d   :  { %v636_v42 = vadd.f32 1e-05, %v634_v40  ;;  %v902_v40 = vld [vmem:[%s2127_s21 + $0x68] sm:$0xff] }
 0x33e   :  { %v637_v43 = vadd.f32 1e-05, %v635_v41  ;;  %v1349_v41 = vpack.c.bf16 %v902_v40, %v901_v39  ;;  %v878_v40 = vrot.slane %v818_v34, %v1896_v56 }
 0x33f   :  { %1367 = vrsqrt.f32 %v636_v42  ;;  %v919_v42 = vld [vmem:[%s2127_s21 + $0xf0] sm:$0xff] }
 0x340   :  { %1369 = vrsqrt.f32 %v637_v43  ;;  %v920_v43 = vld [vmem:[%s2127_s21 + $0xf8] sm:$0xff] }
 0x341   :  { %v1351_v45 = vpack.c.bf16 %v920_v43, %v919_v42  ;;  %v882_v42 = vrot.slane %v818_v34, %v1904_v59 }
 0x349   :  { %v1368_v47 = vpop.eup %1367 }
 0x34a   :  { %v1370_v49 = vpop.eup %1369  ;;  %v640_v50 = vmul.f32 %v1368_v47, %v616_v22  ;;  %v896_v22 = vld [vmem:[%s2127_s21 + $0x38] sm:$0xff] }
 0x34b   :  { %v641_v52 = vmul.f32 %v1370_v49, %v617_v23  ;;  %v1337_v23 = vpack.c.bf16 %v896_v22, %v895_v21 }
 0x34c   :  { %v653_v54 = vmul.f32 %v646_v46, %v640_v50  ;;  %v904_v46 = vld [vmem:[%s2127_s21 + $0x78] sm:$0xff] }
 0x34d   :  { %v654_v55 = vmul.f32 %v650_v48, %v641_v52  ;;  %1338 = vmatpush3.bf16.msra.mxu1 %v1337_v23  ;;  %v1353_v47 = vpack.c.bf16 %v904_v46, %v903_v44  ;;  %v734_v48 = vld [vmem:[%s2124_s18] sm:$0x3] }
 0x34e   :  { %v666_v57 = vadd.f32 %v659_v51, %v653_v54  ;;  %1340 = vmatprep.subr.bf16.mxu1 %v1339_v26  ;;  %v739_v49 = vrot.slane %v734_v48, %v1896_v56  ;;  %v743_v50 = vrot.slane %v734_v48, %v1904_v59 }
 0x34f   :  { %v667_v58 = vadd.f32 %v663_v53, %v654_v55 }
 0x350   :  { %v668_v62 = vmax.f32 %v666_v57, 0.0 }
 0x351   :  { %v669_v60 = vmax.f32 %v667_v58, 0.0  ;;  %1342 = vmatpush3.bf16.msra.mxu1 %v1341_v29 }
 0x352   :  { %1344 = vmatprep.subr.bf16.mxu1 %v1343_v32 }
 0x353   :  { %810 = vmatprep.mubr.f32.mxu0 %v669_v60 }
 0x354   :  { %811 = vmatmul.mubr.f32.vlgmr.msra.gmra.mrb[0].mxu0 %v668_v62 }
 0x355   :  { %1346 = vmatpush3.bf16.msra.mxu1 %v1345_v35  ;;  %v865_v35 = vrot.slane %v817_v33, %v1896_v56 }
 0x356   :  { %1348 = vmatprep.subr.bf16.mxu1 %v1347_v38 }
 0x359   :  { %1350 = vmatpush3.bf16.msra.mxu1 %v1349_v41 }
 0x35a   :  { %1352 = vmatprep.subr.bf16.mxu1 %v1351_v45 }
 0x35d   :  { %1354 = vmatpush3.bf16.msra.mxu1 %v1353_v47 }
 0x35e   :  { %1242 = vmatprep.subr.mxu1 %v1471_v6 }
 0x427   :  { %v812_v51 = vpop.f32.mrb[0].mxu0 }
 0x428   :  { %v813_v52 = vadd.f32 %v812_v51, %v739_v49  ;;  %v814_v53 = vpop.f32.mrb[1].mxu0  ;;  %v999_v49 = vld [vmem:[%s2129_s23] sm:$0xf] }
 0x429   :  { %v815_v54 = vadd.f32 %v814_v53, %v743_v50 }
 0x42a   :  { %v819_v55 = vsel %vm522_vm4, %v813_v52, 0.0 }
 0x42b   :  { %v820_v57 = vrot.slane %v819_v55, 4  ;;  %v826_v58 = vsel %vm522_vm4, %v815_v54, 0.0 }
 0x42c   :  { %v827_v60 = vrot.slane %v826_v58, 4 }
 0x42d   :  { %v821_v62 = vadd.f32 %v820_v57, %v819_v55 }
 0x42e   :  { %v828_v63 = vadd.f32 %v827_v60, %v826_v58 }
 0x42f   :  { %v822_v0 = vrot.slane %v821_v62, 2 }
 0x430   :  { %v829_v1 = vrot.slane %v828_v63, 2 }
 0x431   :  { %v823_v2 = vadd.f32 %v822_v0, %v821_v62 }
 0x432   :  { %v830_v3 = vadd.f32 %v829_v1, %v828_v63 }
 0x433   :  { %v824_v4 = vrot.slane %v823_v2, 1 }
 0x434   :  { %v831_v5 = vrot.slane %v830_v3, 1 }
 0x435   :  { %v825_v7 = vadd.f32 %v824_v4, %v823_v2 }
 0x436   :  { %v832_v8 = vadd.f32 %v831_v5, %v830_v3 }
 0x437   :  { %v833_v9 = vmul.f32 0.25, %v825_v7 }
 0x438   :  { %v834_v10 = vmul.f32 0.25, %v832_v8 }
 0x439   :  { %v835_v11 = vsub.f32 %v813_v52, %v833_v9 }
 0x43a   :  { %v836_v12 = vsub.f32 %v815_v54, %v834_v10 }
 0x43b   :  { %v837_v13 = vmul.f32 %v835_v11, %v835_v11 }
 0x43c   :  { %v838_v14 = vmul.f32 %v836_v12, %v836_v12 }
 0x43d   :  { %v839_v15 = vsel %vm522_vm4, %v837_v13, 0.0 }
 0x43e   :  { %v840_v16 = vrot.slane %v839_v15, 4  ;;  %v846_v17 = vsel %vm522_vm4, %v838_v14, 0.0 }
 0x43f   :  { %v847_v18 = vrot.slane %v846_v17, 4 }
 0x440   :  { %v841_v19 = vadd.f32 %v840_v16, %v839_v15 }
 0x441   :  { %v848_v20 = vadd.f32 %v847_v18, %v846_v17 }
 0x442   :  { %v842_v21 = vrot.slane %v841_v19, 2 }
 0x443   :  { %v849_v22 = vrot.slane %v848_v20, 2 }
 0x444   :  { %v843_v23 = vadd.f32 %v842_v21, %v841_v19 }
 0x445   :  { %v850_v24 = vadd.f32 %v849_v22, %v848_v20 }
 0x446   :  { %v844_v25 = vrot.slane %v843_v23, 1 }
 0x447   :  { %v851_v26 = vrot.slane %v850_v24, 1 }
 0x448   :  { %v845_v27 = vadd.f32 %v844_v25, %v843_v23 }
 0x449   :  { %v852_v28 = vadd.f32 %v851_v26, %v850_v24 }
 0x44a   :  { %v853_v29 = vmul.f32 0.25, %v845_v27 }
 0x44b   :  { %v854_v30 = vmul.f32 0.25, %v852_v28 }
 0x44c   :  { %v855_v31 = vadd.f32 1e-05, %v853_v29 }
 0x44d   :  { %v856_v32 = vadd.f32 1e-05, %v854_v30 }
 0x44e   :  { %1371 = vrsqrt.f32 %v855_v31 }
 0x44f   :  { %1373 = vrsqrt.f32 %v856_v32 }
 0x458   :  { %v1372_v36 = vpop.eup %1371 }
 0x459   :  { %v1374_v38 = vpop.eup %1373  ;;  %v859_v39 = vmul.f32 %v1372_v36, %v835_v11 }
 0x45a   :  { %v860_v41 = vmul.f32 %v1374_v38, %v836_v12 }
 0x45b   :  { %v872_v43 = vmul.f32 %v865_v35, %v859_v39 }
 0x45c   :  { %v873_v44 = vmul.f32 %v869_v37, %v860_v41 }
 0x45d   :  { %v885_v45 = vadd.f32 %v878_v40, %v872_v43 }
 0x45e   :  { %v886_v46 = vadd.f32 %v882_v42, %v873_v44 }
 0x45f   :  { %v887_v48 = vmax.f32 %v885_v45, 0.0 }
 0x460   :  { %v888_v47 = vmax.f32 %v886_v46, 0.0 }
 0x462   :  { %992 = vmatprep.mubr.f32.mxu1 %v888_v47 }
 0x463   :  { %993 = vmatmul.mubr.f32.vlgmr.msra.gmra.mrb[10].mxu1 %v887_v48 }
 0x464   :  { %1243 = vmatpush3.msk.msra.mxu1 %vm522_vm4, %v999_v49  ;;  %1244 = vmatprep.mubr.msk.f32.mxu1 %vm1470_vm0, %v1471_v6 }
 0x467   :  { %1245 = vmatmul.mubr.msk.f32.vlgmr.msra.gmra.mrb[12].mxu1 %vm518_vm6, %v1906_v61 }
 0x468   :  { %1386 = shalt.err (!%p1383_p4)
}
 0x469   :  { %s1387_s2 = scalar_lea.hbm %s2132_s26, 64 }
 0x46a   :  { %p1388_p5 = scmp.ne.s32.totalorder %s2132_s26, %s1387_s2  ;;  %p1391_p6 = scmp.lt.u32.totalorder %s1387_s2, %s2132_s26 }
 0x46c   :  { %p1393_p7 = pnand %p1391_p6, %p1388_p5 }
 0x46e   :  { %1396 = shalt.err (!%p1393_p7)
}
 0x46f   :  { %1103 = dma.vmem_to_hbm [thread:$0]  %s1101_s6, 64, %s2132_s26, [#allocation5]  }
 0x470   :  { %s1397_s16 = scalar_lea.vmem %s1091_s0, 64  ;;  %p1402_p9 = scmp.lt.s32.totalorder %s1091_s0, %s1091_s0 }
 0x471   :  { %p1398_p8 = scmp.ne.s32.totalorder %s1091_s0, %s1397_s16  ;;  %p1403_p10 = scmp.lt.s32.totalorder %s1397_s16, %s1397_s16 }
 0x473   :  { %p1404_p11 = por %p1403_p10, %p1402_p9 }
 0x475   :  { %p1405_p12 = pnand %p1404_p11, %p1398_p8 }
 0x477   :  { %1408 = shalt.err (!%p1405_p12)
}
 0x478   :  { %s1409_s5 = scalar_lea.hbm %s2131_s25, 64 }
 0x479   :  { %p1410_p13 = scmp.ne.s32.totalorder %s2131_s25, %s1409_s5  ;;  %p1413_p0 = scmp.lt.u32.totalorder %s1409_s5, %s2131_s25 }
 0x47b   :  { %p1415_p1 = pnand %p1413_p0, %p1410_p13 }
 0x47d   :  { %1418 = shalt.err (!%p1415_p1)
}
 0x47e   :  { %1093 = dma.vmem_to_hbm [thread:$0]  %s1091_s0, 64, %s2131_s25, [#allocation3]   ;;  %v1155_v56 = vld [vmem:[%s2128_s22] ss:$0 sm:$0xff] }
 0x47f   :  { %s1474_s3 = smov [#allocation6]   ;;  %v1156_v50 = vld [vmem:[%s2130_s24] ss:$0 sm:$0xff]  ;;  %s1475_s23 = smov [#allocation7]  }
 0x480   :  { %s1110_s6 = sshll.u32 %s1474_s3, 4  ;;  %s1120_s29 = sshll.u32 %s1475_s23, 4  ;;  %s1111_s6 = int_to_ptr.vmem [resolvable:$true] %s1110_s6  ;;  %s1121_s29 = int_to_ptr.vmem [resolvable:$true] %s1120_s29 }
 0x481   :  { %s1419_s22 = scalar_lea.vmem %s1111_s6, 64  ;;  %p1424_p3 = scmp.lt.s32.totalorder %s1111_s6, %s1111_s6 }
 0x482   :  { %p1420_p2 = scmp.ne.s32.totalorder %s1111_s6, %s1419_s22  ;;  %p1425_p4 = scmp.lt.s32.totalorder %s1419_s22, %s1419_s22 }
 0x484   :  { %p1426_p5 = por %p1425_p4, %p1424_p3 }
 0x486   :  { %p1427_p6 = pnand %p1426_p5, %p1420_p2 }
 0x536   :  { %v1205_v6 = vpop.f32.mrb[10].mxu1 }
 0x537   :  { %v1206_v59 = vpop.f32.mrb[11].mxu1 }
 0x538   :  { %v1207_v61 = vadd.f32 %v1206_v59, %v1205_v6 }
 0x53a   :  { %v995_v51 = vadd.f32 %v1207_v61, %v1155_v56  ;;  %v1079_v52 = vpop.f32.mrb[12].mxu1 }
 0x53b   :  { %v1080_v53 = vadd.f32 %v1156_v50, %v1079_v52  ;;  %v1246_v54 = vpop.f32.mrb[13].mxu1 }
 0x53c   :  { %998 = vst.msk [vmem:[#allocation6] sm:$0xf] %vm297_vm5, %v995_v51 }
 0x53d   :  { %1083 = vst.msk [vmem:[#allocation7] sm:$0xf] %vm297_vm5, %v1080_v53 }
 0x53e   :  { %1430 = shalt.err (!%p1427_p6)
}
 0x53f   :  { %s1431_s0 = scalar_lea.hbm %s2133_s27, 64 }
 0x540   :  { %p1432_p7 = scmp.ne.s32.totalorder %s2133_s27, %s1431_s0  ;;  %p1435_p8 = scmp.lt.u32.totalorder %s1431_s0, %s2133_s27 }
 0x542   :  { %p1437_p9 = pnand %p1435_p8, %p1432_p7 }
 0x544   :  { %1440 = shalt.err (!%p1437_p9)
}
 0x545   :  { %1113 = dma.vmem_to_hbm [thread:$0]  %s1111_s6, 64, %s2133_s27, [#allocation5]  }
 0x546   :  { %s1441_s15 = scalar_lea.vmem %s1121_s29, 64  ;;  %p1446_p11 = scmp.lt.s32.totalorder %s1121_s29, %s1121_s29 }
 0x547   :  { %p1442_p10 = scmp.ne.s32.totalorder %s1121_s29, %s1441_s15  ;;  %p1447_p12 = scmp.lt.s32.totalorder %s1441_s15, %s1441_s15 }
 0x549   :  { %p1448_p13 = por %p1447_p12, %p1446_p11 }
 0x54b   :  { %p1449_p0 = pnand %p1448_p13, %p1442_p10 }
 0x54d   :  { %1452 = shalt.err (!%p1449_p0)
}
 0x54e   :  { %s1453_s8 = scalar_lea.hbm %s2134_s28, 64 }
 0x54f   :  { %p1454_p1 = scmp.ne.s32.totalorder %s2134_s28, %s1453_s8  ;;  %p1457_p2 = scmp.lt.u32.totalorder %s1453_s8, %s2134_s28 }
 0x551   :  { %p1459_p3 = pnand %p1457_p2, %p1454_p1 }
 0x553   :  { %1462 = shalt.err (!%p1459_p3)
}
 0x554   :  { %1123 = dma.vmem_to_hbm [thread:$0]  %s1121_s29, 64, %s2134_s28, [#allocation8]  }
 0x555   :  { %1463 = dma.done.wait [#allocation3], 64  }
 0x556   :  { %1464 = vsyncadd [#allocation3], 4294967232 }
 0x557   :  { %1465 = dma.done.wait [#allocation5], 128  }
 0x558   :  { %1466 = vsyncadd [#allocation5], 4294967168 }
 0x559   :  { %1467 = dma.done.wait [#allocation8], 64  }
 0x55a   :  { %1468 = vsyncadd [#allocation8], 4294967232 }
 0x55b   :  { %1136 = vsyncpa [#allocation3], 1 }
 0x55c   :  { %1137 = vsyncpa [#allocation5], 1 }
 0x55d   :  { %1138 = vsyncpa [#allocation8], 1 }

// kernel: tc_forward.2
= control target key start
LH: loop header
LB: loop body
LE: loop exit
PB: predicated region body
PF: predicated region fallthrough
CT: control target
= control target key end

     0   :  { %s5735_s0 = inlined_call_operand.vmem [shape: f32[36,36], index: 0, kind: input, shape index: {}]   ;;  %s5736_s1 = inlined_call_operand.vmem [shape: f32[32,16], index: 1, kind: input, shape index: {}]   ;;  %s5737_s2 = inlined_call_operand.vmem [shape: f32[2,16,32], index: 2, kind: input, shape index: {}]   ;;  %s5738_s3 = inlined_call_operand.vmem [shape: f32[2,1,32], index: 3, kind: input, shape index: {}]   ;;  %s5739_s4 = inlined_call_operand.vmem [shape: f32[2,1,32], index: 4, kind: input, shape index: {}]   ;;  %s5740_s5 = inlined_call_operand.vmem [shape: f32[2,4,1,32], index: 5, kind: input, shape index: {}, may-alias: {5,10}]   ;;  %s5741_s6 = inlined_call_operand.vmem [shape: f32[2,4,1,32], index: 6, kind: input, shape index: {}, may-alias: {6,11}]   ;;  %s5742_s7 = inlined_call_operand.hbm [shape: f32[2,4,32,96], index: 7, kind: input, shape index: {}]   ;;  %s5743_s8 = inlined_call_operand.hbm [shape: f32[2,4,32,32], index: 8, kind: input, shape index: {}]   ;;  %s5744_s9 = inlined_call_operand.vmem [shape: f32[2,4,1,32], index: 9, kind: input, shape index: {}]   ;;  %s5745_s10 = inlined_call_operand.vmem [shape: f32[2,4,1,32], index: 10, kind: input, shape index: {}, may-alias: {5,10}]   ;;  %s5746_s11 = inlined_call_operand.vmem [shape: f32[2,4,1,32], index: 11, kind: input, shape index: {}, may-alias: {6,11}]   ;;  %s5747_s12 = inlined_call_operand.hbm [shape: f32[2,4,32,64], index: 12, kind: input, shape index: {}]   ;;  %s5748_s13 = inlined_call_operand.vmem [shape: f32[2,4,1,64], index: 13, kind: input, shape index: {}]   ;;  %s5749_s14 = inlined_call_operand.hbm [shape: f32[2,4,64,32], index: 14, kind: input, shape index: {}]   ;;  %s5750_s15 = inlined_call_operand.vmem [shape: f32[2,4,1,32], index: 15, kind: input, shape index: {}]   ;;  %s5751_s16 = inlined_call_operand.vmem [shape: f32[2,4,32], index: 16, kind: output, shape index: {}]  }
   0x1   :  { %5762 = sst [smem:[#allocation16_spill]] %s5735_s0 }
   0x2   :  { %5763 = sst [smem:[#allocation17_spill]] %s5736_s1 }
   0x3   :  { %5764 = sst [smem:[#allocation18_spill]] %s5737_s2 }
   0x4   :  { %5765 = sst [smem:[#allocation19_spill]] %s5738_s3 }
   0x5   :  { %5766 = sst [smem:[#allocation20_spill]] %s5742_s7 }
   0x6   :  { %5767 = sst [smem:[#allocation21_spill]] %s5743_s8 }
   0x7   :  { %5768 = sst [smem:[#allocation22_spill]] %s5744_s9 }
   0x8   :  { %5769 = sst [smem:[#allocation23_spill]] %s5745_s10 }
   0x9   :  { %5770 = sst [smem:[#allocation24_spill]] %s5746_s11 }
   0xa   :  { %5771 = sst [smem:[#allocation25_spill]] %s5748_s13 }
   0xb   :  { %5772 = sst [smem:[#allocation26_spill]] %s5750_s15 }
   0xc   :  { %5773 = sst [smem:[#allocation27_spill]] %s5751_s16 }
   0xd   :  { %21 = vsyncpa [#allocation4], 0 }
   0xe   :  { %23 = vsyncpa [#allocation4 + $0x1], 0 }
   0xf   :  { %24 = vsyncpa [#allocation6], 0 }
  0x10   :  { %26 = vsyncpa [#allocation6 + $0x1], 0 }
  0x11   :  { %27 = vsyncpa [#allocation9], 0 }
  0x12   :  { %29 = vsyncpa [#allocation9 + $0x1], 0  ;;  %s4574_s21 = smov 0   ;;  %s4576_s22 = smov 0  }
  0x13   :  { %s4578_s23 = smov 0   ;;  %s4580_s24 = smov 0  }
  0x14 LB: > { %5774 = sst [smem:[#allocation13_spill]] %s4455_s23  ;;  %s4593_s25 = sadd.s32 4294967295, %s4459_s24   ;;  %s4459_s24 = sphi %s4580_s24, %s5813_s24   ;;  %s4455_s23 = sphi %s4578_s23, %s5815_s23   ;;  %s4451_s22 = sphi %s4576_s22, %s5817_s22   ;;  %s4447_s21 = sphi %s4574_s21, %s5816_s21  }
  0x15   : > { %s4596_s26 = sadd.s32 1, %s4459_s24   ;;  %s214_s28 = sadd.s32 1, %s4455_s23 }
  0x16   : > { %5775 = sst [smem:[#allocation14_spill]] %s4596_s26  ;;  %s211_s27 = ssub.s32 %s4459_s24, %s4596_s26 }
  0x17   : > { %p212_p0 = scmp.eq.s32.totalorder %s211_s27, 0  ;;  %p221_p1 = scmp.ne.s32.totalorder %s4455_s23, %s4451_s22 }
  0x18   : > { %p222_p2 = scmp.eq.s32.totalorder %s4459_s24, 0  ;;  %p227_p3 = scmp.ne.s32.totalorder %s4451_s22, %s4447_s21 }
  0x19   : > { %s4606_s29 = scalar_select %p212_p0, %s4455_s23, %s214_s28  }
  0x1a   : > { %p223_p4 = por %p222_p2, %p221_p1  ;;  %p228_p5 = scmp.eq.s32.totalorder %s4593_s25, 0 }
  0x1b   : > { %5776 = sst [smem:[#allocation15_spill]] %s4606_s29  ;;  %p4027_p6 = scmp.lt.s32.totalorder %s4459_s24, 2 }
  0x1c   : > { %p4610_p7 = por %p228_p5, %p227_p3  ;;  %s4615_s0 = sand.u32 1, %s4455_s23  }
  0x1d   : > { %s4618_s17 = sshll.u32 %s4615_s0, 7  ;;  %s4621_s18 = sshll.u32 %s4459_s24, 11 }
  0x1e   : > { %s5777_s30 = scalar_select %p4610_p7, 1, 0 }
  0x1f   : > { %p4623_p8 = pnand %p4027_p6, %p223_p4  ;;  %s546_s20 = sand.u32 1, %s4459_s24  }
  0x20   : > { %s5779_s8 = sld [smem:[#allocation21_spill]]  ;;  %s550_s29 = scalar_lea.vmem [#allocation5], %s4618_s17 }
  0x21   : > { %s557_s23 = sshll.u32 %s550_s29, 4  ;;  %s4639_s26 = scalar_lea.sflag [#allocation6], %s546_s20  ;;  %s4636_s23 = int_to_ptr.vmem [resolvable:$true] %s557_s23 }
  0x22   : > { %p4645_p12 = pneg %p4623_p8 }
  0x26   : > { %s4632_s28 = scalar_lea.hbm %s5779_s8, %s4621_s18  ;;  %s4298_s29 = scalar_lea.hbm %s5779_s8, 4096 }
  0x27   : > { %s4293_s3 = scalar_lea.hbm %s4632_s28, 2048  ;;  %p4299_p1 = scmp.lt.u32.totalorder %s4632_s28, %s5779_s8 }
  0x28   : > { %p4294_p11 = scmp.ne.s32.totalorder %s4632_s28, %s4293_s3  ;;  %p4300_p2 = scmp.lt.u32.totalorder %s4298_s29, %s4293_s3 }
  0x29   : > { %p4302_p4 = scmp.lt.u32.totalorder %s4293_s3, %s4632_s28 }
  0x2a   : > { %p4296_p13 = pnand %p4645_p12, %p4294_p11  ;;  %p4301_p3 = por %p4300_p2, %p4299_p1 }
  0x2c   : > { %p4297_p0 = pneg %p4296_p13  ;;  %p4303_p5 = por %p4302_p4, %p4301_p3 }
  0x2e   : > { %p4304_p6 = pnand %p4303_p5, %p4297_p0 }
  0x30   : > { %4307 = shalt.err (!%p4304_p6)
}
  0x31   : > { %s4308_s20 = scalar_lea.vmem %s4636_s23, 2048  ;;  %s4465_s21 = smov [#allocation5]  }
  0x32   : > { %p4309_p11 = scmp.ne.s32.totalorder %s4636_s23, %s4308_s20  ;;  %s4313_s27 = sshll.u32 %s4465_s21, 4  ;;  %s4314_s27 = int_to_ptr.vmem [resolvable:$false] %s4313_s27 }
  0x33   : > { %s4315_s15 = scalar_lea.vmem %s4314_s27, 4096  ;;  %p4316_p10 = scmp.lt.s32.totalorder %s4636_s23, %s4314_s27 }
  0x34   : > { %p4311_p13 = pnand %p4309_p11, %p4645_p12  ;;  %p4317_p7 = scmp.lt.s32.totalorder %s4315_s15, %s4308_s20 }
  0x36   : > { %p4312_p9 = pneg %p4311_p13  ;;  %p4318_p1 = por %p4317_p7, %p4316_p10 }
  0x38   : > { %p4319_p2 = pnand %p4318_p1, %p4312_p9 }
  0x3a   : > { %4322 = shalt.err (!%p4319_p2)
}
  0x3b   : > { %s5758_s3 = smov 128   ;;  %s5760_s16 = smov 8  }
  0x3c   : > { %4020 = dma.hbm_to_vmem [thread:$0]  (!%p4623_p8), %s4632_s28, 2048, %s4636_s23, %s4639_s26, %s5758_s3, %s5758_s3, %s5760_s16  }
  0x3d   : > { %p5781_p7 = scmp.lt.s32.totalorder %s4459_s24, 3  ;;  %p5782_p9 = scmp.ge.s32.totalorder %s4459_s24, 1 }
  0x3e   : > { %s5784_s7 = sld [smem:[#allocation20_spill]]  ;;  %s529_s15 = scalar_lea.vmem [#allocation3], %s4618_s17 }
  0x3f   : > { %p4676_p10 = pnand %p5782_p9, %p5781_p7  ;;  %s536_s8 = sshll.u32 %s529_s15, 4  ;;  %s4687_s8 = int_to_ptr.vmem [resolvable:$true] %s536_s8 }
  0x40   : > { %s4693_s3 = scalar_lea.hbm %s5747_s12, %s4621_s18  ;;  %s526_s16 = scalar_lea.sflag [#allocation4], %s4615_s0 }
  0x41   : > { %s5783_s29 = scalar_select %p4676_p10, 1, 0 }
  0x44   : > { %s4684_s27 = scalar_lea.hbm %s5784_s7, %s4621_s18  ;;  %s4328_s11 = scalar_lea.hbm %s5784_s7, 4096 }
  0x45   : > { %s4323_s13 = scalar_lea.hbm %s4684_s27, 2048  ;;  %p4329_p5 = scmp.lt.u32.totalorder %s4684_s27, %s5784_s7 }
  0x46   : > { %p4324_p0 = scmp.ne.s32.totalorder %s4684_s27, %s4323_s13  ;;  %p4330_p6 = scmp.lt.u32.totalorder %s4328_s11, %s4323_s13 }
  0x47   : > { %p4332_p13 = scmp.lt.u32.totalorder %s4323_s13, %s4684_s27 }
  0x48   : > { %p4326_p3 = pnand %p4324_p0, %p4645_p12  ;;  %p4331_p11 = por %p4330_p6, %p4329_p5 }
  0x4a   : > { %p4327_p4 = pneg %p4326_p3  ;;  %p4333_p1 = por %p4332_p13, %p4331_p11 }
  0x4c   : > { %p4334_p2 = pnand %p4333_p1, %p4327_p4 }
  0x4e   : > { %4337 = shalt.err (!%p4334_p2)
}
  0x4f   : > { %s4338_s18 = scalar_lea.vmem %s4687_s8, 2048  ;;  %s4468_s15 = smov [#allocation3]  }
  0x50   : > { %p4339_p7 = scmp.ne.s32.totalorder %s4687_s8, %s4338_s18  ;;  %s4343_s23 = sshll.u32 %s4468_s15, 4  ;;  %s4344_s23 = int_to_ptr.vmem [resolvable:$false] %s4343_s23 }
  0x51   : > { %s4345_s9 = scalar_lea.vmem %s4344_s23, 4096  ;;  %p4346_p3 = scmp.lt.s32.totalorder %s4687_s8, %s4344_s23 }
  0x52   : > { %p4341_p9 = pnand %p4339_p7, %p4645_p12  ;;  %p4347_p10 = scmp.lt.s32.totalorder %s4345_s9, %s4338_s18 }
  0x54   : > { %p4342_p0 = pneg %p4341_p9  ;;  %p4348_p5 = por %p4347_p10, %p4346_p3 }
  0x56   : > { %p4349_p6 = pnand %p4348_p5, %p4342_p0 }
  0x58   : > { %4352 = shalt.err (!%p4349_p6)
}
  0x59   : > { %s5785_s10 = smov 8   ;;  %s5786_s11 = smov 128  }
  0x5a   : > { %4017 = dma.hbm_to_vmem [thread:$0]  (!%p4623_p8), %s4684_s27, 2048, %s4687_s8, %s526_s16, %s5786_s11, %s5786_s11, %s5785_s10  }
  0x5b   : > { %s592_s13 = scalar_lea.vmem [#allocation7], %s4618_s17  ;;  %s3351_s20 = sshll.u32 %s4615_s0, 8 }
  0x5c   : > { %s599_s28 = sshll.u32 %s592_s13, 4  ;;  %s4353_s21 = scalar_lea.hbm %s4693_s3, 2048  ;;  %s4723_s28 = int_to_ptr.vmem [resolvable:$true] %s599_s28 }
  0x5d   : > { %p4354_p10 = scmp.ne.s32.totalorder %s4693_s3, %s4353_s21  ;;  %s4358_s23 = scalar_lea.hbm %s5747_s12, 4096 }
  0x5e   : > { %p4359_p13 = scmp.lt.u32.totalorder %s4693_s3, %s5747_s12  ;;  %p4360_p1 = scmp.lt.u32.totalorder %s4358_s23, %s4353_s21 }
  0x5f   : > { %p4356_p4 = pnand %p4354_p10, %p4645_p12  ;;  %p4362_p7 = scmp.lt.u32.totalorder %s4353_s21, %s4693_s3 }
  0x60   : > { %p4361_p2 = por %p4360_p1, %p4359_p13 }
  0x61   : > { %p4357_p11 = pneg %p4356_p4 }
  0x62   : > { %p4363_p9 = por %p4362_p7, %p4361_p2 }
  0x64   : > { %p4364_p0 = pnand %p4363_p9, %p4357_p11 }
  0x66   : > { %4367 = shalt.err (!%p4364_p0)
}
  0x67   : > { %s4368_s8 = scalar_lea.vmem %s4723_s28, 2048  ;;  %s4469_s17 = smov [#allocation7]  }
  0x68   : > { %p4369_p3 = scmp.ne.s32.totalorder %s4723_s28, %s4368_s8  ;;  %s4373_s16 = sshll.u32 %s4469_s17, 4  ;;  %s4374_s16 = int_to_ptr.vmem [resolvable:$false] %s4373_s16 }
  0x69   : > { %s4375_s7 = scalar_lea.vmem %s4374_s16, 4096  ;;  %p4376_p10 = scmp.lt.s32.totalorder %s4723_s28, %s4374_s16 }
  0x6a   : > { %p4371_p5 = pnand %p4369_p3, %p4645_p12  ;;  %p4377_p4 = scmp.lt.s32.totalorder %s4375_s7, %s4368_s8 }
  0x6c   : > { %p4372_p6 = pneg %p4371_p5  ;;  %p4378_p13 = por %p4377_p4, %p4376_p10 }
  0x6e   : > { %p4379_p1 = pnand %p4378_p13, %p4372_p6 }
  0x70   : > { %4382 = shalt.err (!%p4379_p1)
}
  0x71   : > { %4023 = dma.hbm_to_vmem [thread:$0]  (!%p4623_p8), %s4693_s3, 2048, %s4723_s28, %s4639_s26, %s5786_s11, %s5786_s11, %s5785_s10  }
  0x72   : > { %s3472_s27 = sshll.u32 %s4459_s24, 12  ;;  %s620_s15 = scalar_lea.vmem [#allocation8], %s3351_s20 }
  0x73   : > { %s4755_s18 = scalar_lea.hbm %s5749_s14, %s3472_s27  ;;  %s627_s23 = sshll.u32 %s620_s15, 4  ;;  %s4759_s23 = int_to_ptr.vmem [resolvable:$true] %s627_s23 }
  0x74   : > { %s617_s9 = scalar_lea.sflag [#allocation9], %s4615_s0  ;;  %s4383_s8 = scalar_lea.hbm %s4755_s18, 4096 }
  0x75   : > { %p4384_p11 = scmp.ne.s32.totalorder %s4755_s18, %s4383_s8  ;;  %s4388_s3 = scalar_lea.hbm %s5749_s14, 8192 }
  0x76   : > { %p4389_p9 = scmp.lt.u32.totalorder %s4755_s18, %s5749_s14  ;;  %p4390_p0 = scmp.lt.u32.totalorder %s4388_s3, %s4383_s8 }
  0x77   : > { %p4386_p2 = pnand %p4384_p11, %p4645_p12  ;;  %p4392_p5 = scmp.lt.u32.totalorder %s4383_s8, %s4755_s18 }
  0x78   : > { %p4391_p3 = por %p4390_p0, %p4389_p9 }
  0x79   : > { %p4387_p7 = pneg %p4386_p2 }
  0x7a   : > { %p4393_p6 = por %p4392_p5, %p4391_p3 }
  0x7c   : > { %p4394_p10 = pnand %p4393_p6, %p4387_p7 }
  0x7e   : > { %4397 = shalt.err (!%p4394_p10)
}
  0x7f   : > { %s4398_s20 = scalar_lea.vmem %s4759_s23, 4096  ;;  %s4470_s16 = smov [#allocation8]  }
  0x80   : > { %p4399_p4 = scmp.ne.s32.totalorder %s4759_s23, %s4398_s20  ;;  %s4403_s7 = sshll.u32 %s4470_s16, 4  ;;  %s4404_s7 = int_to_ptr.vmem [resolvable:$false] %s4403_s7 }
  0x81   : > { %s4405_s27 = scalar_lea.vmem %s4404_s7, 8192  ;;  %p4406_p11 = scmp.lt.s32.totalorder %s4759_s23, %s4404_s7 }
  0x82   : > { %p4401_p13 = pnand %p4399_p4, %p4645_p12  ;;  %p4407_p2 = scmp.lt.s32.totalorder %s4405_s27, %s4398_s20 }
  0x84   : > { %p4402_p1 = pneg %p4401_p13  ;;  %p4408_p9 = por %p4407_p2, %p4406_p11 }
  0x86   : > { %p4409_p0 = pnand %p4408_p9, %p4402_p1 }
  0x88   : > { %4412 = shalt.err (!%p4409_p0)
}
  0x89   : > { %4026 = dma.hbm_to_vmem [thread:$0]  (!%p4623_p8), %s4755_s18, 4096, %s4759_s23, %s617_s9, %s5786_s11, %s5786_s11, %s5785_s10  }
  0x8a   : > { %p5787_p12 = scmp.ne.s32.totalorder %s5783_s29, 0 }
  0x8b   : > { %s648_s1 = sand.u32 (!%p5787_p12), 1, %s4451_s22   ;;  %p5788_p7 = scmp.ne.s32.totalorder (!%p5787_p12), %s5777_s30, 0 }
  0x8c   : > { %646 = sbr.rel (%p5787_p12) target bundleno = 3069 (0xbfd), region = 84  ;;  %s4791_s13 = sshll.u32 (!%p5787_p12), %s648_s1, 7 }
  0x8d   : > { %s649_s21 = scalar_lea.sflag (!%p5787_p12), [#allocation4], %s648_s1 }
  0x93   : > { %4434 = dma.done.wait (%p5788_p7), %s649_s21, 2048  }
  0x94   : > { %4436 = vsyncadd (%p5788_p7), %s649_s21, 4294965248  ;;  %s657_s0 = sand.u32 1, %s4593_s25  }
  0x95   : > { %s658_s19 = scalar_lea.sflag [#allocation6], %s657_s0 }
  0x96   : > { %4438 = dma.done.wait (%p5788_p7), %s658_s19, 4096  }
  0x97   : > { %4440 = vsyncadd (%p5788_p7), %s658_s19, 4294963200  ;;  %s3358_s10 = sshll.u32 %s648_s1, 8  ;;  %s676_s18 = scalar_lea.sflag [#allocation9], %s648_s1 }
  0x98   : > { %s4805_s23 = scalar_lea.vmem [#allocation8], %s3358_s10 }
  0x99   : > { %4442 = dma.done.wait (%p5788_p7), %s676_s18, 4096  }
  0x9a   : > { %4444 = vsyncadd (%p5788_p7), %s676_s18, 4294963200  ;;  %p781_p8 = scmp.lt.s32.totalorder %s4593_s25, 1  ;;  %s5789_s2 = sld [smem:[#allocation18_spill]]  ;;  %vm936_vm0 = vcmask 253952   ;;  %vm837_vm1 = vcmask 130048   ;;  %vm938_vm2 = vcmask 261120  }
  0x9b   : > { %s5790_s10 = sld [smem:[#allocation16_spill]]  ;;  %s5794_s27 = sld [smem:[#allocation25_spill]] }
  0x9c   : > { %s5819_s25 = smov (!%p781_p8, %s4593_s25), 1  ;;  %s5793_s3 = sld [smem:[#allocation24_spill]] }
  0x9d   : > { %s3473_s9 = sshll.u32 %s5819_s25, 4  ;;  %s791_s26 = scalar_lea.vmem %s5739_s4, %s5819_s25 }
  0x9e   : > { %s4824_s20 = sshll.u32 %s5819_s25, 2  ;;  %s5795_s21 = sld [smem:[#allocation26_spill]]  ;;  %v935_v7 = vld [vmem:[%s791_s26] sm:$0x1] }
  0x9f   : > { %s5796_s15 = sld [smem:[#allocation27_spill]]  ;;  %s5797_s8 = sld [smem:[#allocation17_spill]]  ;;  %937 = vst.msk [vmem:[#allocation2] sm:$0x1] %vm936_vm0, %v935_v7  ;;  %940 = vst.msk [vmem:[#allocation2 + $0x9] sm:$0x1] %vm936_vm0, %v935_v7 }
  0xa0   : > { %s785_s17 = scalar_lea.vmem %s5789_s2, %s3473_s9  ;;  %942 = vst.msk [vmem:[#allocation2 + $0x12] sm:$0x1] %vm936_vm0, %v935_v7  ;;  %944 = vst.msk [vmem:[#allocation2 + $0x1b] sm:$0x1] %vm936_vm0, %v935_v7 }
  0xa1   : > { %v4837_v0 = vld [vmem:[%s5790_s10] sm:$0xff]  ;;  %v4842_v1 = vld [vmem:[%s5790_s10 + $0x8] sm:$0xff]  ;;  %v4847_v2 = vld [vmem:[%s5790_s10 + $0x10] sm:$0xff]  ;;  %s815_s11 = scalar_lea.vmem %s5794_s27, %s4824_s20  ;;  %s4913_s27 = smov 0  }
  0xa2   : > { %v4860_v3 = vld [vmem:[%s5790_s10 + $0x18] sm:$0xff]  ;;  %v4865_v4 = vld [vmem:[%s5790_s10 + $0x20] sm:$0xf]  ;;  %s811_s28 = scalar_lea.vmem %s5793_s3, %s4824_s20  ;;  %v829_v6 = vld [vmem:[%s785_s17 + $0x8] sm:$0xff]  ;;  %s5798_s3 = sld [smem:[#allocation19_spill]] }
  0xa3   : > { %v828_v5 = vld [vmem:[%s785_s17] sm:$0xff] }
  0xa4   : > { %s819_s29 = scalar_lea.vmem %s5795_s21, %s4824_s20  ;;  %v3910_v9 = vpack.c.bf16 %v829_v6, %v828_v5 }
  0xa5   : > { %s4883_s2 = scalar_lea.vmem %s5796_s15, %s4824_s20  ;;  %v824_v8 = vld [vmem:[%s5797_s8] sm:$0xff]  ;;  %v826_v10 = vld [vmem:[%s5797_s8 + $0x10] sm:$0xff]  ;;  %v825_v11 = vld [vmem:[%s5797_s8 + $0x8] sm:$0xff] }
  0xa6   : > { %3604 = vmatprep.mubr.msk.f32.mxu0 %vm837_vm1, %v824_v8  ;;  %3607 = vmatprep.mubr.msk.f32.mxu1 %vm837_vm1, %v826_v10  ;;  %v827_v12 = vld [vmem:[%s5797_s8 + $0x18] sm:$0xff] }
  0xa7   : > { %3911 = vmatprep.subr.bf16.mxu0 %v3910_v9  ;;  %4000 = vmatprep.subr.bf16.mxu1 %v3910_v9 }
  0xa8   : > { %3913 = vmatpush3.bf16.msra.mxu0 %v3910_v9  ;;  %4001 = vmatpush3.bf16.msra.mxu1 %v3910_v9  ;;  %s788_s30 = scalar_lea.vmem %s5798_s3, %s5819_s25 }
  0xa9   : > { %v3369_v13 = vld [vmem:[%s788_s30] ss:$0 sm:$0xff] }
  0xab   : > { %3605 = vmatmul.mubr.msk.f32.vlgmr.msra.gmra.mrb[0].mxu0 %vm837_vm1, %v825_v11  ;;  %3608 = vmatmul.mubr.msk.f32.vlgmr.msra.gmra.mrb[0].mxu1 %vm837_vm1, %v827_v12 }
 0x17e   : > { %v3606_v14 = vpop.f32.mrb[0].mxu0  ;;  %v3609_v15 = vpop.f32.mrb[0].mxu1 }
 0x17f   : > { %v922_v16 = vadd.f32 %v3606_v14, %v3369_v13  ;;  %v932_v17 = vadd.f32 %v3609_v15, %v3369_v13  ;;  %v916_v18 = vpop.f32.mrb[1].mxu0  ;;  %v926_v19 = vpop.f32.mrb[1].mxu1 }
 0x180   : > { %v917_v20 = vadd.f32 %v3369_v13, %v916_v18  ;;  %v927_v21 = vadd.f32 %v3369_v13, %v926_v19 }
 0x181   : > { %941 = vst.msk [vmem:[#allocation2 + $0xa] sm:$0xff] %vm938_vm2, %v922_v16  ;;  %945 = vst.msk [vmem:[#allocation2 + $0x1c] sm:$0xff] %vm938_vm2, %v932_v17 }
 0x182   : > { %939 = vst.msk [vmem:[#allocation2 + $0x1] sm:$0xff] %vm938_vm2, %v917_v20  ;;  %943 = vst.msk [vmem:[#allocation2 + $0x13] sm:$0xff] %vm938_vm2, %v927_v21 }
 0x183 LB: >> { %vm978_vm3 = vcmask 257024   ;;  %s4949_s25 = sshll.u32 %s4463_s27, 5  ;;  %s5799_s1 = scalar_lea.vmem [#allocation3], %s4791_s13  ;;  %v4471_v62 = vmov 0.0|0.0   ;;  %vm4472_vm4 = vmmov 0   ;;  %v4473_v63 = vmov 0.0   ;;  %s4463_s27 = sphi %s4913_s27, %s956_s27  }
 0x184   : >> { %s1056_s19 = scalar_lea.vmem %s5799_s1, %s4949_s25 [#allocation3]  ;;  %3914 = vmatprep.subr.bf16.mxu0 %v4471_v62  ;;  %3618 = vmatprep.mubr.msk.f32.mxu0 %vm4472_vm4, %v4473_v63  ;;  %s5800_s15 = scalar_lea.vmem %s5740_s5, %s4824_s20  ;;  %vm1181_vm5 = vcmask 64512   ;;  %vm1378_vm7 = vcmask 1043456   ;;  %vm1292_vm8 = vcmask 293888   ;;  %vm1305_vm9 = vcmask 289792  }
 0x185   : >> { %v1057_v57 = vld [vmem:[%s1056_s19] sm:$0xff]  ;;  %v1058_v58 = vld [vmem:[%s1056_s19 + $0x8] sm:$0xff]  ;;  %v1059_v60 = vld [vmem:[%s1056_s19 + $0x10] sm:$0xff]  ;;  %3920 = vmatprep.subr.bf16.mxu1 %v4471_v62  ;;  %3643 = vmatprep.mubr.msk.f32.mxu1 %vm4472_vm4, %v4473_v63  ;;  %s962_s7 = scalar_lea.vmem %s5800_s15, %s4463_s27  ;;  %s5801_s21 = scalar_lea.vmem %s5741_s6, %s4824_s20  ;;  %vm2459_vm10 = vcmask 195584   ;;  %vm2950_vm13 = vcmask 523264  }
 0x186   : >> { %v3915_v59 = vpack.c.bf16 %v1058_v58, %v1057_v57  ;;  %v1060_v61 = vld [vmem:[%s1056_s19 + $0x18] sm:$0xff]  ;;  %s964_s16 = scalar_lea.vmem %s5801_s21, %s4463_s27  ;;  %s4474_s0 = smov 96   ;;  %vm5047_vm6 = vmpackc.low %vm1181_vm5, %vm1181_vm5 }
 0x187   : >> { %v3918_v5 = vpack.c.bf16 %v1060_v61, %v1059_v60  ;;  %s4475_s24 = smov 88   ;;  %s4476_s3 = smov 80  }
 0x188   : >> { %v961_v30 = vld [vmem:[#allocation2 + $0x20] sm:$0xf]  ;;  %3916 = vmatpush3.bf16.msra.mxu0 %v3915_v59  ;;  %s4477_s30 = smov 120   ;;  %s4478_s1 = smov 72  }
 0x189   : >> { %v957_v22 = vld [vmem:[#allocation2] sm:$0xff]  ;;  %v959_v23 = vld [vmem:[#allocation2 + $0x10] sm:$0xff]  ;;  %v958_v24 = vld [vmem:[#allocation2 + $0x8] sm:$0xff]  ;;  %v979_v31 = vsel %vm978_vm3, %v961_v30, 0.0  ;;  %3917 = vmatprep.subr.bf16.mxu0 %v4471_v62  ;;  %s4479_s19 = smov 112   ;;  %s4480_s18 = smov 104  }
 0x18a   : >> { %v966_v25 = vsel %vm938_vm2, %v957_v22, 0.0  ;;  %v972_v26 = vsel %vm938_vm2, %v959_v23, 0.0  ;;  %v960_v27 = vld [vmem:[#allocation2 + $0x18] sm:$0xff]  ;;  %v969_v28 = vsel %vm938_vm2, %v958_v24, 0.0  ;;  %s4481_s9 = smov 64   ;;  %s4482_s15 = smov 56  }
 0x18b   : >> { %967 = vadd.xlane.f32.xlu0 %v966_v25  ;;  %973 = vadd.xlane.f32.xlu1 %v972_v26  ;;  %v975_v29 = vsel %vm938_vm2, %v960_v27, 0.0  ;;  %s4484_s26 = smov 40   ;;  %s4485_s17 = smov 8  }
 0x18c   : >> { %3919 = vmatpush3.bf16.msra.mxu0 %v3918_v5  ;;  %s5804_s21 = scalar_lea.vmem [#allocation5], %s4791_s13 }
 0x18d   : >> { %3928 = vmatprep.subr.bf16.mxu0 %v4471_v62 }
 0x18f   : >> { %970 = vadd.xlane.f32.xlu0 %v969_v28  ;;  %976 = vadd.xlane.f32.xlu1 %v975_v29 }
 0x193   : >> { %980 = vadd.xlane.f32.xlu0 %v979_v31 }
 0x218   : >> { %v968_v32 = vpop.xlane.xlu0 %967  ;;  %v974_v33 = vpop.xlane.xlu1 %973 }
 0x219   : >> { %v983_v34 = vmul.f32 0.03125, %v968_v32  ;;  %v985_v35 = vmul.f32 0.03125, %v974_v33 }
 0x21b   : >> { %v4923_v36 = vsub.f32 %v957_v22, %v983_v34  ;;  %v4925_v37 = vsub.f32 %v959_v23, %v985_v35  ;;  %v3374_v22 = vld [vmem:[%s962_s7] ss:$0 sm:$0xff]  ;;  %s4483_s7 = smov 48  }
 0x21c   : >> { %v971_v38 = vpop.xlane.xlu0 %970  ;;  %v977_v39 = vpop.xlane.xlu1 %976 }
 0x21d   : >> { %v984_v40 = vmul.f32 0.03125, %v971_v38  ;;  %v986_v41 = vmul.f32 0.03125, %v977_v39  ;;  %v993_v42 = vmul.f32 %v4923_v36, %v4923_v36  ;;  %v995_v43 = vmul.f32 %v4925_v37, %v4925_v37 }
 0x21f   : >> { %v998_v44 = vsel %vm938_vm2, %v993_v42, 0.0  ;;  %v4932_v45 = vsub.f32 %v958_v24, %v984_v40  ;;  %v4934_v46 = vsub.f32 %v960_v27, %v986_v41  ;;  %v1004_v49 = vsel %vm938_vm2, %v995_v43, 0.0  ;;  %v3375_v24 = vld [vmem:[%s964_s16] ss:$0 sm:$0xff]  ;;  %s2465_s16 = scalar_lea.vmem %s5804_s21, %s4949_s25 [#allocation5] }
 0x220   : >> { %999 = vadd.xlane.f32.xlu1 %v998_v44  ;;  %v981_v47 = vpop.xlane.xlu0 %980 }
 0x221   : >> { %v987_v48 = vmul.f32 0.03125, %v981_v47  ;;  %v994_v50 = vmul.f32 %v4932_v45, %v4932_v45  ;;  %v996_v51 = vmul.f32 %v4934_v46, %v4934_v46 }
 0x223   : >> { %v4941_v52 = vsub.f32 %v961_v30, %v987_v48  ;;  %v1001_v53 = vsel %vm938_vm2, %v994_v50, 0.0  ;;  %v1007_v54 = vsel %vm938_vm2, %v996_v51, 0.0 }
 0x224   : >> { %1005 = vadd.xlane.f32.xlu1 %v1004_v49  ;;  %1002 = vadd.xlane.f32.xlu0 %v1001_v53 }
 0x225   : >> { %v997_v55 = vmul.f32 %v4941_v52, %v4941_v52 }
 0x227   : >> { %v1010_v56 = vsel %vm978_vm3, %v997_v55, 0.0 }
 0x228   : >> { %1008 = vadd.xlane.f32.xlu0 %v1007_v54  ;;  %1011 = vadd.xlane.f32.xlu1 %v1010_v56 }
 0x2ad   : >> { %v1000_v6 = vpop.xlane.xlu1 %999 }
 0x2ae   : >> { %v1013_v7 = vmul.f32 0.03125, %v1000_v6 }
 0x2b0   : >> { %v1018_v8 = vadd.f32 1e-05, %v1013_v7 }
 0x2b1   : >> { %v1006_v9 = vpop.xlane.xlu1 %1005  ;;  %v1003_v10 = vpop.xlane.xlu0 %1002 }
 0x2b2   : >> { %4168 = vrsqrt.f32 %v1018_v8  ;;  %v1015_v11 = vmul.f32 0.03125, %v1006_v9  ;;  %v1014_v12 = vmul.f32 0.03125, %v1003_v10 }
 0x2b4   : >> { %v1020_v13 = vadd.f32 1e-05, %v1015_v11  ;;  %v1019_v14 = vadd.f32 1e-05, %v1014_v12 }
 0x2b5   : >> { %v1012_v15 = vpop.xlane.xlu1 %1011  ;;  %v1009_v16 = vpop.xlane.xlu0 %1008 }
 0x2b6   : >> { %4170 = vrsqrt.f32 %v1020_v13  ;;  %v1017_v17 = vmul.f32 0.03125, %v1012_v15  ;;  %v1016_v18 = vmul.f32 0.03125, %v1009_v16 }
 0x2b7   : >> { %4172 = vrsqrt.f32 %v1019_v14 }
 0x2b8   : >> { %v1021_v19 = vadd.f32 1e-05, %v1016_v18  ;;  %v1022_v20 = vadd.f32 1e-05, %v1017_v17 }
 0x2ba   : >> { %4174 = vrsqrt.f32 %v1021_v19 }
 0x2bb   : >> { %4176 = vrsqrt.f32 %v1022_v20 }
 0x2bc   : >> { %v4169_v21 = vpop.eup %4168 }
 0x2bd   : >> { %v1028_v23 = vmul.f32 %v4169_v21, %v4923_v36 }
 0x2bf   : >> { %v1039_v25 = vmul.f32 %v3374_v22, %v1028_v23 }
 0x2c0   : >> { %v4171_v26 = vpop.eup %4170 }
 0x2c1   : >> { %v4173_v27 = vpop.eup %4172  ;;  %v1050_v28 = vadd.f32 %v3375_v24, %v1039_v25  ;;  %v1030_v30 = vmul.f32 %v4171_v26, %v4925_v37 }
 0x2c2   : >> { %v1029_v29 = vmul.f32 %v4173_v27, %v4932_v45 }
 0x2c3   : >> { %3619 = vmatmul.mubr.msk.f32.vlgmr.msra.gmra.mrb[0].mxu0 %vm938_vm2, %v1050_v28  ;;  %v1041_v34 = vmul.f32 %v3374_v22, %v1030_v30 }
 0x2c4   : >> { %3621 = vmatprep.mubr.msk.f32.mxu0 %vm4472_vm4, %v4473_v63  ;;  %v1040_v31 = vmul.f32 %v3374_v22, %v1029_v29  ;;  %v4175_v32 = vpop.eup %4174 }
 0x2c5   : >> { %v1031_v35 = vmul.f32 %v4175_v32, %v4934_v46  ;;  %v4177_v36 = vpop.eup %4176  ;;  %v1052_v38 = vadd.f32 %v3375_v24, %v1041_v34 }
 0x2c6   : >> { %v1051_v33 = vadd.f32 %v3375_v24, %v1040_v31  ;;  %v1032_v37 = vmul.f32 %v4177_v36, %v4941_v52 }
 0x2c7   : >> { %v1042_v39 = vmul.f32 %v3374_v22, %v1031_v35 }
 0x2c8   : >> { %3622 = vmatmul.mubr.msk.f32.gmra.mrb[2].mxu0 %vm938_vm2, %v1051_v33  ;;  %v1043_v41 = vmul.f32 %v3374_v22, %v1032_v37 }
 0x2c9   : >> { %3624 = vmatprep.mubr.msk.f32.mxu0 %vm4472_vm4, %v4473_v63  ;;  %v1053_v40 = vadd.f32 %v3375_v24, %v1042_v39 }
 0x2ca   : >> { %v1054_v42 = vadd.f32 %v3375_v24, %v1043_v41 }
 0x2cc   : >> { %3625 = vmatmul.mubr.msk.f32.gmra.mrb[4].mxu0 %vm938_vm2, %v1052_v38 }
 0x2cd   : >> { %3627 = vmatprep.mubr.msk.f32.mxu0 %vm4472_vm4, %v4473_v63 }
 0x2d0   : >> { %3628 = vmatmul.mubr.msk.f32.gmra.mrb[6].mxu0 %vm938_vm2, %v1053_v40 }
 0x2d1   : >> { %3630 = vmatprep.mubr.msk.f32.mxu0 %vm4472_vm4, %v4473_v63 }
 0x2d4   : >> { %3631 = vmatmul.mubr.msk.f32.gmra.mrb[8].mxu0 %vm938_vm2, %v1054_v42 }
 0x2d5   : >> { %3668 = vmatprep.mubr.msk.f32.mxu0 %vm4472_vm4, %v4473_v63 }
 0x396   : >> { %v4994_v43 = vpop.f32.mrb[0].mxu0 }
 0x397   : >> { %v3620_v44 = vpop.f32.mrb[1].mxu0 }
 0x39b   : >> { %v4996_v45 = vpop.f32.mrb[2].mxu0 }
 0x39c   : >> { %v3623_v46 = vpop.f32.mrb[3].mxu0  ;;  %v5000_v47 = vpack.i.bf16 %v4996_v45, %v4994_v43 }
 0x39e   : >> { %4089 = vrot.lane.b32.xlu0 %v5000_v47, %s4474_s0 }
 0x39f   : >> { %v5003_v48 = vpop.f32.mrb[4].mxu0 }
 0x3a0   : >> { %v3626_v49 = vpop.f32.mrb[5].mxu0 }
 0x3a3   : >> { %v5005_v50 = vpop.f32.mrb[6].mxu0 }
 0x3a4   : >> { %v3629_v51 = vpop.f32.mrb[7].mxu0  ;;  %v5009_v52 = vpack.i.bf16 %v5005_v50, %v5003_v48 }
 0x3a6   : >> { %4104 = vrot.lane.b32.xlu0 %v5009_v52, %s4475_s24  ;;  %4094 = vrot.lane.b32.xlu1 %v5009_v52, %s4474_s0 }
 0x3a7   : >> { %v5013_v53 = vpop.f32.mrb[8].mxu0 }
 0x3a8   : >> { %v3632_v54 = vpop.f32.mrb[9].mxu0 }
 0x3aa   : >> { %4109 = vrot.lane.b32.xlu0 %v5000_v47, %s4476_s3  ;;  %1179 = vrot.lane.b32.xlu1 %v5013_v53, %s4474_s0  ;;  %s4486_s0 = smov 16  }
 0x3ae   : >> { %1473 = vrot.lane.b32.xlu0 %v4996_v45, %s4477_s30  ;;  %4099 = vrot.lane.b32.xlu1 %v5000_v47, %s4475_s24 }
 0x3b2   : >> { %1475 = vrot.lane.b32.xlu0 %v5003_v48, %s4477_s30  ;;  %1489 = vrot.lane.b32.xlu1 %v5013_v53, %s4475_s24  ;;  %s4487_s24 = smov 24  }
 0x3b6   : >> { %1479 = vrot.lane.b32.xlu0 %v5013_v53, %s4477_s30  ;;  %1471 = vrot.lane.b32.xlu1 %v4994_v43, %s4477_s30 }
 0x3ba   : >> { %4119 = vrot.lane.b32.xlu0 %v5000_v47, %s4478_s1  ;;  %4114 = vrot.lane.b32.xlu1 %v5009_v52, %s4476_s3 }
 0x3be   : >> { %1779 = vrot.lane.b32.xlu0 %v4996_v45, %s4479_s19  ;;  %1477 = vrot.lane.b32.xlu1 %v5005_v50, %s4477_s30  ;;  %s3460_s30 = sshll.u32 %s4463_s27, 6 }
 0x3c2   : >> { %1781 = vrot.lane.b32.xlu0 %v5003_v48, %s4479_s19  ;;  %1795 = vrot.lane.b32.xlu1 %v5013_v53, %s4476_s3  ;;  %s2590_s3 = scalar_lea.vmem %s811_s28, %s4463_s27 }
 0x3c6   : >> { %1785 = vrot.lane.b32.xlu0 %v5013_v53, %s4479_s19  ;;  %1777 = vrot.lane.b32.xlu1 %v4994_v43, %s4479_s19 }
 0x3ca   : >> { %2083 = vrot.lane.b32.xlu0 %v4994_v43, %s4480_s18  ;;  %4124 = vrot.lane.b32.xlu1 %v5009_v52, %s4478_s1 }
 0x3ce   : >> { %2087 = vrot.lane.b32.xlu0 %v5003_v48, %s4480_s18  ;;  %1783 = vrot.lane.b32.xlu1 %v5005_v50, %s4479_s19 }
 0x3d2   : >> { %2091 = vrot.lane.b32.xlu0 %v5013_v53, %s4480_s18  ;;  %2101 = vrot.lane.b32.xlu1 %v5013_v53, %s4478_s1  ;;  %s5805_s1 = sld [smem:[#allocation22_spill]] }
 0x3d6   : >> { %4129 = vrot.lane.b32.xlu0 %v5000_v47, %s4481_s9  ;;  %2085 = vrot.lane.b32.xlu1 %v4996_v45, %s4480_s18 }
 0x3d8   : >> { %s5806_s19 = scalar_lea.vmem %s5805_s1, %s4824_s20  ;;  %s2933_s1 = scalar_lea.vmem %s4805_s23, %s3460_s30 [#allocation8] }
 0x3da   : >> { %4144 = vrot.lane.b32.xlu0 %v5009_v52, %s4482_s15  ;;  %2089 = vrot.lane.b32.xlu1 %v5005_v50, %s4480_s18  ;;  %s2470_s18 = scalar_lea.vmem %s5806_s19, %s4463_s27 }
 0x3de   : >> { %1357 = vrot.lane.b32.xlu0 %v5013_v53, %s4481_s9  ;;  %4134 = vrot.lane.b32.xlu1 %v5009_v52, %s4481_s9  ;;  %s5807_s9 = scalar_lea.vmem [#allocation7], %s4791_s13 }
 0x3e2   : >> { %1664 = vrot.lane.b32.xlu0 %v5013_v53, %s4482_s15  ;;  %4139 = vrot.lane.b32.xlu1 %v5000_v47, %s4482_s15  ;;  %s2679_s15 = scalar_lea.vmem %s5807_s9, %s4949_s25 [#allocation7] }
 0x410   : >> { %v4090_v55 = vpop.permute.xlu0 %4089 }
 0x411   : >> { %v4092_v56 = vunpack.i.h.bf16 %v4090_v55  ;;  %v4091_v57 = vunpack.i.l.bf16 %v4090_v55 }
 0x413   : >> { %v3921_v59 = vpack.c.bf16 %v4092_v56, %v4091_v57 }
 0x415   : >> { %3923 = vmatpush3.bf16.xpose.msk.msra.mxu1 %vm5047_vm6, %v3921_v59 }
 0x416   : >> { %3924 = vmatprep.subr.bf16.mxu1 %v4471_v62 }
 0x418   : >> { %v4105_v60 = vpop.permute.xlu0 %4104  ;;  %v4095_v61 = vpop.permute.xlu1 %4094 }
 0x419   : >> { %v4097_v5 = vunpack.i.h.bf16 %v4095_v61  ;;  %v4096_v6 = vunpack.i.l.bf16 %v4095_v61  ;;  %v4107_v19 = vunpack.i.h.bf16 %v4105_v60  ;;  %v4106_v20 = vunpack.i.l.bf16 %v4105_v60 }
 0x41b   : >> { %v3925_v7 = vpack.c.bf16 %v4097_v5, %v4096_v6  ;;  %v3939_v23 = vpack.c.bf16 %v4107_v19, %v4106_v20 }
 0x41c   : >> { %v4110_v8 = vpop.permute.xlu0 %4109  ;;  %v1180_v9 = vpop.permute.xlu1 %1179 }
 0x41d   : >> { %3927 = vmatpush3.bf16.xpose.msk.msra.mxu1 %vm5047_vm6, %v3925_v7  ;;  %v4112_v28 = vunpack.i.h.bf16 %v4110_v8  ;;  %v4111_v29 = vunpack.i.l.bf16 %v4110_v8 }
 0x41e   : >> { %3641 = vmatprep.subr.mxu1 %v4473_v63 }
 0x41f   : >> { %v3949_v32 = vpack.c.bf16 %v4112_v28, %v4111_v29 }
 0x420   : >> { %v1474_v10 = vpop.permute.xlu0 %1473  ;;  %v4100_v11 = vpop.permute.xlu1 %4099 }
 0x421   : >> { %v4102_v12 = vunpack.i.h.bf16 %v4100_v11  ;;  %v4101_v13 = vunpack.i.l.bf16 %v4100_v11 }
 0x423   : >> { %v3935_v16 = vpack.c.bf16 %v4102_v12, %v4101_v13 }
 0x424   : >> { %v1476_v14 = vpop.permute.xlu0 %1475  ;;  %v1490_v15 = vpop.permute.xlu1 %1489 }
 0x425   : >> { %3642 = vmatpush3.xpose.msk.msra.mxu1 %vm1181_vm5, %v1180_v9 }
 0x426   : >> { %3934 = vmatprep.subr.bf16.mxu1 %v4471_v62 }
 0x428   : >> { %v1480_v17 = vpop.permute.xlu0 %1479  ;;  %3644 = vmatmul.mubr.msk.f32.vlgmr.msra.gmra.mrb[0].mxu1 %vm1181_vm5, %v4994_v43  ;;  %v1472_v18 = vpop.permute.xlu1 %1471 }
 0x429   : >> { %3937 = vmatpush3.bf16.xpose.msk.msra.mxu1 %vm5047_vm6, %v3935_v16  ;;  %3646 = vmatprep.mubr.msk.f32.mxu1 %vm4472_vm4, %v4473_v63 }
 0x42a   : >> { %3938 = vmatprep.subr.bf16.mxu1 %v4471_v62 }
 0x42c   : >> { %v4120_v21 = vpop.permute.xlu0 %4119  ;;  %3647 = vmatmul.mubr.msk.f32.gmra.mrb[2].mxu1 %vm1181_vm5, %v4996_v45  ;;  %v4115_v22 = vpop.permute.xlu1 %4114 }
 0x42d   : >> { %3649 = vmatprep.mubr.msk.f32.mxu1 %vm4472_vm4, %v4473_v63  ;;  %v4117_v35 = vunpack.i.h.bf16 %v4115_v22  ;;  %v4116_v36 = vunpack.i.l.bf16 %v4115_v22  ;;  %v4122_v46 = vunpack.i.h.bf16 %v4120_v21 }
 0x42f   : >> { %v3953_v37 = vpack.c.bf16 %v4117_v35, %v4116_v36 }
 0x430   : >> { %v5070_v24 = vpop.permute.xlu0 %1779  ;;  %3650 = vmatmul.mubr.msk.f32.gmra.mrb[4].mxu1 %vm1181_vm5, %v5003_v48  ;;  %v1478_v25 = vpop.permute.xlu1 %1477  ;;  %v4121_v48 = vunpack.i.l.bf16 %v4120_v21 }
 0x431   : >> { %3941 = vmatpush3.bf16.xpose.msk.msra.mxu1 %vm5047_vm6, %v3939_v23  ;;  %3652 = vmatprep.mubr.msk.f32.mxu1 %vm4472_vm4, %v4473_v63 }
 0x432   : >> { %3691 = vmatprep.subr.mxu1 %v4473_v63  ;;  %v3963_v51 = vpack.c.bf16 %v4122_v46, %v4121_v48 }
 0x434   : >> { %v5079_v26 = vpop.permute.xlu0 %1781  ;;  %3653 = vmatmul.mubr.msk.f32.gmra.mrb[6].mxu1 %vm1181_vm5, %v5005_v50  ;;  %v1796_v27 = vpop.permute.xlu1 %1795 }
 0x435   : >> { %3655 = vmatprep.mubr.msk.f32.mxu1 %vm4472_vm4, %v4473_v63 }
 0x438   : >> { %v5085_v30 = vpop.permute.xlu0 %1785  ;;  %3656 = vmatmul.mubr.msk.f32.gmra.mrb[8].mxu1 %vm1181_vm5, %v5013_v53  ;;  %v1778_v31 = vpop.permute.xlu1 %1777 }
 0x439   : >> { %3692 = vmatpush3.xpose.msk.msra.mxu1 %vm1181_vm5, %v1490_v15  ;;  %3693 = vmatprep.mubr.msk.f32.mxu1 %vm4472_vm4, %v4473_v63 }
 0x43a   : >> { %3948 = vmatprep.subr.bf16.mxu1 %v4471_v62 }
 0x43c   : >> { %v5093_v33 = vpop.permute.xlu0 %2083  ;;  %v4125_v34 = vpop.permute.xlu1 %4124  ;;  %3694 = vmatmul.mubr.msk.f32.vlgmr.msra.gmra.mrb[10].mxu1 %vm1181_vm5, %v1472_v18 }
 0x43d   : >> { %3951 = vmatpush3.bf16.xpose.msk.msra.mxu1 %vm5047_vm6, %v3949_v32  ;;  %3696 = vmatprep.mubr.msk.f32.mxu1 %vm4472_vm4, %v4473_v63  ;;  %v4127_v59 = vunpack.i.h.bf16 %v4125_v34  ;;  %v4126_v60 = vunpack.i.l.bf16 %v4125_v34 }
 0x43e   : >> { %3952 = vmatprep.subr.bf16.mxu1 %v4471_v62 }
 0x43f   : >> { %v3967_v5 = vpack.c.bf16 %v4127_v59, %v4126_v60 }
 0x440   : >> { %v2088_v38 = vpop.permute.xlu0 %2087  ;;  %v1784_v39 = vpop.permute.xlu1 %1783  ;;  %3697 = vmatmul.mubr.msk.f32.gmra.mrb[12].mxu1 %vm1181_vm5, %v1474_v10 }
 0x441   : >> { %3699 = vmatprep.mubr.msk.f32.mxu1 %vm4472_vm4, %v4473_v63 }
 0x444   : >> { %v2092_v40 = vpop.permute.xlu0 %2091  ;;  %v2102_v41 = vpop.permute.xlu1 %2101  ;;  %3700 = vmatmul.mubr.msk.f32.gmra.mrb[14].mxu1 %vm1181_vm5, %v1476_v14 }
 0x445   : >> { %3955 = vmatpush3.bf16.xpose.msk.msra.mxu1 %vm5047_vm6, %v3953_v37  ;;  %3702 = vmatprep.mubr.msk.f32.mxu1 %vm4472_vm4, %v4473_v63 }
 0x446   : >> { %3741 = vmatprep.subr.mxu1 %v4473_v63 }
 0x448   : >> { %v4130_v42 = vpop.permute.xlu0 %4129  ;;  %v2086_v43 = vpop.permute.xlu1 %2085  ;;  %3703 = vmatmul.mubr.msk.f32.gmra.mrb[16].mxu1 %vm1181_vm5, %v1478_v25 }
 0x449   : >> { %v4132_v44 = vunpack.i.h.bf16 %v4130_v42  ;;  %v4131_v45 = vunpack.i.l.bf16 %v4130_v42  ;;  %3705 = vmatprep.mubr.msk.f32.mxu1 %vm4472_vm4, %v4473_v63 }
 0x44b   : >> { %v3929_v49 = vpack.c.bf16 %v4132_v44, %v4131_v45 }
 0x44c   : >> { %v2090_v50 = vpop.permute.xlu1 %2089  ;;  %3706 = vmatmul.mubr.msk.f32.gmra.mrb[18].mxu1 %vm1181_vm5, %v1480_v17  ;;  %v5124_v57 = vpop.permute.xlu0 %4144 }
 0x44d   : >> { %3930 = vmatpush3.bf16.msra.mxu0 %v3929_v49  ;;  %3742 = vmatpush3.xpose.msk.msra.mxu1 %vm1181_vm5, %v1796_v27 }
 0x44e   : >> { %3743 = vmatprep.mubr.msk.f32.mxu1 %vm4472_vm4, %v4473_v63  ;;  %3962 = vmatprep.subr.bf16.mxu1 %v4471_v62 }
 0x44f   : >> { %3931 = vmatprep.subr.bf16.mxu0 %v4471_v62 }
 0x450   : >> { %v4135_v54 = vpop.permute.xlu1 %4134  ;;  %3744 = vmatmul.mubr.msk.f32.vlgmr.msra.gmra.mrb[20].mxu1 %vm1181_vm5, %v1778_v31  ;;  %v1358_v6 = vpop.permute.xlu0 %1357 }
 0x451   : >> { %v4137_v55 = vunpack.i.h.bf16 %v4135_v54  ;;  %v4136_v56 = vunpack.i.l.bf16 %v4135_v54  ;;  %3965 = vmatpush3.bf16.xpose.msk.msra.mxu1 %vm5047_vm6, %v3963_v51  ;;  %3746 = vmatprep.mubr.msk.f32.mxu1 %vm4472_vm4, %v4473_v63 }
 0x452   : >> { %3966 = vmatprep.subr.bf16.mxu1 %v4471_v62 }
 0x453   : >> { %v3932_v61 = vpack.c.bf16 %v4137_v55, %v4136_v56 }
 0x454   : >> { %3747 = vmatmul.mubr.msk.f32.gmra.mrb[22].mxu1 %vm1181_vm5, %v5070_v24 }
 0x455   : >> { %3933 = vmatpush3.bf16.msra.mxu0 %v3932_v61  ;;  %3749 = vmatprep.mubr.msk.f32.mxu1 %vm4472_vm4, %v4473_v63 }
 0x456   : >> { %3666 = vmatprep.subr.mxu0 %v4473_v63 }
 0x458   : >> { %3750 = vmatmul.mubr.msk.f32.gmra.mrb[24].mxu1 %vm1181_vm5, %v5079_v26 }
 0x459   : >> { %3667 = vmatpush3.msk.msra.mxu0 %vm1378_vm7, %v1358_v6  ;;  %3969 = vmatpush3.bf16.xpose.msk.msra.mxu1 %vm5047_vm6, %v3967_v5 }
 0x45a   : >> { %3752 = vmatprep.mubr.msk.f32.mxu1 %vm4472_vm4, %v4473_v63  ;;  %3791 = vmatprep.subr.mxu1 %v4473_v63 }
 0x45b   : >> { %3942 = vmatprep.subr.bf16.mxu0 %v4471_v62 }
 0x45c   : >> { %3753 = vmatmul.mubr.msk.f32.gmra.mrb[26].mxu1 %vm1181_vm5, %v1784_v39 }
 0x45d   : >> { %3755 = vmatprep.mubr.msk.f32.mxu1 %vm4472_vm4, %v4473_v63 }
 0x460   : >> { %3756 = vmatmul.mubr.msk.f32.gmra.mrb[28].mxu1 %vm1181_vm5, %v5085_v30 }
 0x461   : >> { %3792 = vmatpush3.xpose.msk.msra.mxu1 %vm1181_vm5, %v2102_v41  ;;  %3793 = vmatprep.mubr.msk.f32.mxu1 %vm4472_vm4, %v4473_v63 }
 0x462   : >> { %4002 = vmatprep.subr.bf16.mxu1 %v4471_v62 }
 0x464   : >> { %3794 = vmatmul.mubr.msk.f32.vlgmr.msra.gmra.mrb[30].mxu1 %vm1181_vm5, %v5093_v33 }
 0x465   : >> { %3796 = vmatprep.mubr.msk.f32.mxu1 %vm4472_vm4, %v4473_v63 }
 0x468   : >> { %3797 = vmatmul.mubr.msk.f32.gmra.mrb[32].mxu1 %vm1181_vm5, %v2086_v43 }
 0x469   : >> { %3799 = vmatprep.mubr.msk.f32.mxu1 %vm4472_vm4, %v4473_v63 }
 0x46c   : >> { %3800 = vmatmul.mubr.msk.f32.gmra.mrb[34].mxu1 %vm1181_vm5, %v2088_v38 }
 0x46d   : >> { %3802 = vmatprep.mubr.msk.f32.mxu1 %vm4472_vm4, %v4473_v63 }
 0x470   : >> { %3803 = vmatmul.mubr.msk.f32.gmra.mrb[36].mxu1 %vm1181_vm5, %v2090_v50 }
 0x471   : >> { %3805 = vmatprep.mubr.msk.f32.mxu1 %vm4472_vm4, %v4473_v63 }
 0x474   : >> { %3806 = vmatmul.mubr.msk.f32.gmra.mrb[38].mxu1 %vm1181_vm5, %v2092_v40 }
 0x475   : >> { %3844 = vmatprep.mubr.msk.f32.mxu1 %vm4472_vm4, %v4473_v63 }
 0x4fb   : >> { %v1268_v58 = vpop.f32.mrb[0].mxu1 }
 0x4fc   : >> { %v5167_v7 = vadd.f32 %v1268_v58, %v4837_v0  ;;  %v3645_v8 = vpop.f32.mrb[1].mxu1 }
 0x4fe   : >> { %v1293_v9 = vsel %vm1292_vm8, %v5167_v7, -inf }
 0x4ff   : >> { %1294 = vmax.xlane.f32.xlu1 %v1293_v9  ;;  %v1273_v10 = vpop.f32.mrb[2].mxu1 }
 0x500   : >> { %v5172_v11 = vadd.f32 %v1273_v10, %v4842_v1  ;;  %v3648_v12 = vpop.f32.mrb[3].mxu1 }
 0x502   : >> { %v1296_v13 = vsel %vm1292_vm8, %v5172_v11, -inf }
 0x503   : >> { %1297 = vmax.xlane.f32.xlu0 %v1296_v13  ;;  %v1278_v14 = vpop.f32.mrb[4].mxu1 }
 0x504   : >> { %v5177_v15 = vadd.f32 %v1278_v14, %v4847_v2  ;;  %v3651_v16 = vpop.f32.mrb[5].mxu1 }
 0x506   : >> { %v1299_v17 = vsel %vm1292_vm8, %v5177_v15, -inf }
 0x507   : >> { %1300 = vmax.xlane.f32.xlu0 %v1299_v17  ;;  %v1283_v18 = vpop.f32.mrb[6].mxu1 }
 0x508   : >> { %v5182_v19 = vadd.f32 %v1283_v18, %v4860_v3  ;;  %v3654_v20 = vpop.f32.mrb[7].mxu1 }
 0x50a   : >> { %v1302_v21 = vsel %vm1292_vm8, %v5182_v19, -inf }
 0x50b   : >> { %1303 = vmax.xlane.f32.xlu0 %v1302_v21  ;;  %v1288_v22 = vpop.f32.mrb[8].mxu1 }
 0x50c   : >> { %v5187_v23 = vadd.f32 %v1288_v22, %v4865_v4  ;;  %v3657_v24 = vpop.f32.mrb[9].mxu1 }
 0x50e   : >> { %v1306_v25 = vsel %vm1305_vm9, %v5187_v23, -inf }
 0x50f   : >> { %1307 = vmax.xlane.f32.xlu1 %v1306_v25  ;;  %v1577_v26 = vpop.f32.mrb[10].mxu1 }
 0x510   : >> { %v5192_v27 = vadd.f32 %v1577_v26, %v4837_v0  ;;  %v3695_v28 = vpop.f32.mrb[11].mxu1 }
 0x512   : >> { %v1601_v29 = vsel %vm1292_vm8, %v5192_v27, -inf }
 0x513   : >> { %1602 = vmax.xlane.f32.xlu0 %v1601_v29  ;;  %v1582_v30 = vpop.f32.mrb[12].mxu1 }
 0x514   : >> { %v5197_v31 = vadd.f32 %v1582_v30, %v4842_v1  ;;  %v3698_v32 = vpop.f32.mrb[13].mxu1 }
 0x516   : >> { %v1604_v33 = vsel %vm1292_vm8, %v5197_v31, -inf }
 0x517   : >> { %1605 = vmax.xlane.f32.xlu1 %v1604_v33  ;;  %v1587_v34 = vpop.f32.mrb[14].mxu1 }
 0x518   : >> { %v5202_v35 = vadd.f32 %v1587_v34, %v4847_v2  ;;  %v3701_v36 = vpop.f32.mrb[15].mxu1 }
 0x51a   : >> { %v1607_v38 = vsel %vm1292_vm8, %v5202_v35, -inf }
 0x51b   : >> { %1608 = vmax.xlane.f32.xlu0 %v1607_v38  ;;  %v1592_v39 = vpop.f32.mrb[16].mxu1 }
 0x51c   : >> { %v5207_v37 = vadd.f32 %v1592_v39, %v4860_v3  ;;  %v3704_v40 = vpop.f32.mrb[17].mxu1 }
 0x51e   : >> { %v1610_v41 = vsel %vm1292_vm8, %v5207_v37, -inf }
 0x51f   : >> { %1611 = vmax.xlane.f32.xlu1 %v1610_v41  ;;  %v1597_v42 = vpop.f32.mrb[18].mxu1 }
 0x520   : >> { %v5212_v43 = vadd.f32 %v1597_v42, %v4865_v4  ;;  %v3707_v44 = vpop.f32.mrb[19].mxu1  ;;  %v5268_v42 = vpop.permute.xlu1 %4139 }
 0x521   : >> { %v5270_v44 = vpop.permute.xlu0 %1664 }
 0x522   : >> { %v1613_v45 = vsel %vm1305_vm9, %v5212_v43, -inf }
 0x523   : >> { %1614 = vmax.xlane.f32.xlu0 %v1613_v45  ;;  %v1883_v46 = vpop.f32.mrb[20].mxu1 }
 0x524   : >> { %v5217_v48 = vadd.f32 %v1883_v46, %v4837_v0  ;;  %v3745_v49 = vpop.f32.mrb[21].mxu1 }
 0x526   : >> { %v1907_v50 = vsel %vm1292_vm8, %v5217_v48, -inf }
 0x527   : >> { %1908 = vmax.xlane.f32.xlu1 %v1907_v50  ;;  %v1888_v51 = vpop.f32.mrb[22].mxu1 }
 0x528   : >> { %v5222_v54 = vadd.f32 %v1888_v51, %v4842_v1  ;;  %v3748_v55 = vpop.f32.mrb[23].mxu1 }
 0x52a   : >> { %v1910_v56 = vsel %vm1292_vm8, %v5222_v54, -inf }
 0x52b   : >> { %1911 = vmax.xlane.f32.xlu0 %v1910_v56  ;;  %v1893_v59 = vpop.f32.mrb[24].mxu1 }
 0x52c   : >> { %v5227_v60 = vadd.f32 %v1893_v59, %v4847_v2  ;;  %v3751_v61 = vpop.f32.mrb[25].mxu1 }
 0x52e   : >> { %v1913_v5 = vsel %vm1292_vm8, %v5227_v60, -inf }
 0x52f   : >> { %1914 = vmax.xlane.f32.xlu1 %v1913_v5  ;;  %v1898_v6 = vpop.f32.mrb[26].mxu1 }
 0x530   : >> { %v5232_v58 = vadd.f32 %v1898_v6, %v4860_v3  ;;  %v3754_v8 = vpop.f32.mrb[27].mxu1 }
 0x532   : >> { %v1916_v9 = vsel %vm1292_vm8, %v5232_v58, -inf }
 0x533   : >> { %1917 = vmax.xlane.f32.xlu0 %v1916_v9  ;;  %v1903_v10 = vpop.f32.mrb[28].mxu1 }
 0x534   : >> { %v5237_v12 = vadd.f32 %v1903_v10, %v4865_v4  ;;  %v3757_v13 = vpop.f32.mrb[29].mxu1 }
 0x536   : >> { %v1919_v14 = vsel %vm1305_vm9, %v5237_v12, -inf }
 0x537   : >> { %1920 = vmax.xlane.f32.xlu1 %v1919_v14  ;;  %v2189_v16 = vpop.f32.mrb[30].mxu1 }
 0x538   : >> { %v5242_v17 = vadd.f32 %v2189_v16, %v4837_v0  ;;  %v3795_v18 = vpop.f32.mrb[31].mxu1 }
 0x53a   : >> { %v2213_v20 = vsel %vm1292_vm8, %v5242_v17, -inf }
 0x53b   : >> { %2214 = vmax.xlane.f32.xlu0 %v2213_v20  ;;  %v2194_v21 = vpop.f32.mrb[32].mxu1 }
 0x53c   : >> { %v5247_v22 = vadd.f32 %v2194_v21, %v4842_v1  ;;  %v3798_v24 = vpop.f32.mrb[33].mxu1 }
 0x53e   : >> { %v2216_v25 = vsel %vm1292_vm8, %v5247_v22, -inf }
 0x53f   : >> { %2217 = vmax.xlane.f32.xlu1 %v2216_v25  ;;  %v2199_v26 = vpop.f32.mrb[34].mxu1 }
 0x540   : >> { %v5252_v28 = vadd.f32 %v2199_v26, %v4847_v2  ;;  %v3801_v29 = vpop.f32.mrb[35].mxu1 }
 0x542   : >> { %v2219_v30 = vsel %vm1292_vm8, %v5252_v28, -inf }
 0x543   : >> { %2220 = vmax.xlane.f32.xlu0 %v2219_v30  ;;  %v2204_v32 = vpop.f32.mrb[36].mxu1 }
 0x544   : >> { %v3804_v33 = vpop.f32.mrb[37].mxu1  ;;  %v5264_v40 = vadd.f32 %v2204_v32, %v4860_v3 }
 0x546   : >> { %v2222_v41 = vsel %vm1292_vm8, %v5264_v40, -inf }
 0x547   : >> { %v2209_v34 = vpop.f32.mrb[38].mxu1 }
 0x548   : >> { %v5257_v36 = vadd.f32 %v2209_v34, %v4865_v4  ;;  %v3807_v38 = vpop.f32.mrb[39].mxu1 }
 0x54a   : >> { %v2225_v39 = vsel %vm1305_vm9, %v5257_v36, -inf }
 0x54b   : >> { %2226 = vmax.xlane.f32.xlu0 %v2225_v39 }
 0x550   : >> { %4149 = vrot.lane.b32.xlu1 %v5000_v47, %s4483_s7 }
 0x574   : >> { %2223 = vmax.xlane.f32.xlu1 %v2222_v41 }
 0x58c   : >> { %v1295_v45 = vpop.xlane.xlu1 %1294 }
 0x58d   : >> { %v1309_v46 = vsub.f32 %v5167_v7, %v1295_v45 }
 0x58f   : >> { %v1314_v49 = vmul.f32 1.442695, %v1309_v46 }
 0x590   : >> { %v1298_v50 = vpop.xlane.xlu0 %1297 }
 0x591   : >> { %4178 = vpow2.f32 %v1314_v49  ;;  %v1310_v51 = vsub.f32 %v5172_v11, %v1298_v50 }
 0x593   : >> { %v1316_v55 = vmul.f32 1.442695, %v1310_v51 }
 0x594   : >> { %v1301_v56 = vpop.xlane.xlu0 %1300 }
 0x595   : >> { %4180 = vpow2.f32 %v1316_v55  ;;  %v1311_v59 = vsub.f32 %v5177_v15, %v1301_v56 }
 0x597   : >> { %v1318_v61 = vmul.f32 1.442695, %v1311_v59 }
 0x598   : >> { %v1304_v6 = vpop.xlane.xlu0 %1303 }
 0x599   : >> { %4182 = vpow2.f32 %v1318_v61 }
 0x59b   : >> { %v5275_v5 = vpop.eup %4178 }
 0x59c   : >> { %v1308_v8 = vpop.xlane.xlu1 %1307  ;;  %v1324_v9 = vsel %vm1292_vm8, %v5275_v5, 0.0 }
 0x59d   : >> { %v1313_v7 = vsub.f32 %v5187_v23, %v1308_v8  ;;  %1325 = vadd.xlane.f32.xlu1 %v1324_v9  ;;  %v1312_v8 = vsub.f32 %v5182_v19, %v1304_v6 }
 0x59f   : >> { %v5280_v10 = vpop.eup %4180  ;;  %v1322_v11 = vmul.f32 1.442695, %v1313_v7 }
 0x5a0   : >> { %v1603_v13 = vpop.xlane.xlu0 %1602  ;;  %v1327_v14 = vsel %vm1292_vm8, %v5280_v10, 0.0 }
 0x5a1   : >> { %4184 = vpow2.f32 %v1322_v11  ;;  %v1616_v15 = vsub.f32 %v5192_v27, %v1603_v13  ;;  %1328 = vadd.xlane.f32.xlu0 %v1327_v14  ;;  %v1320_v13 = vmul.f32 1.442695, %v1312_v8 }
 0x5a3   : >> { %v5285_v16 = vpop.eup %4182  ;;  %v1621_v18 = vmul.f32 1.442695, %v1616_v15 }
 0x5a4   : >> { %v1330_v20 = vsel %vm1292_vm8, %v5285_v16, 0.0  ;;  %v1606_v23 = vpop.xlane.xlu1 %1605 }
 0x5a5   : >> { %4186 = vpow2.f32 %v1621_v18  ;;  %1331 = vadd.xlane.f32.xlu1 %v1330_v20  ;;  %v1617_v14 = vsub.f32 %v5197_v31, %v1606_v23 }
 0x5a7   : >> { %v1623_v19 = vmul.f32 1.442695, %v1617_v14 }
 0x5a8   : >> { %v1609_v21 = vpop.xlane.xlu0 %1608 }
 0x5a9   : >> { %v1618_v24 = vsub.f32 %v5202_v35, %v1609_v21 }
 0x5ab   : >> { %v5290_v25 = vpop.eup %4184  ;;  %v1625_v26 = vmul.f32 1.442695, %v1618_v24 }
 0x5ac   : >> { %v1612_v29 = vpop.xlane.xlu1 %1611  ;;  %v1336_v27 = vsel %vm1305_vm9, %v5290_v25, 0.0 }
 0x5ad   : >> { %4188 = vpow2.f32 %v1625_v26  ;;  %v1619_v30 = vsub.f32 %v5207_v37, %v1612_v29  ;;  %1337 = vadd.xlane.f32.xlu1 %v1336_v27 }
 0x5af   : >> { %v5295_v32 = vpop.eup %4186  ;;  %v1627_v33 = vmul.f32 1.442695, %v1619_v30 }
 0x5b0   : >> { %v1615_v34 = vpop.xlane.xlu0 %1614  ;;  %v1631_v38 = vsel %vm1292_vm8, %v5295_v32, 0.0 }
 0x5b1   : >> { %4190 = vpow2.f32 %v1627_v33  ;;  %v1620_v35 = vsub.f32 %v5212_v43, %v1615_v34  ;;  %1632 = vadd.xlane.f32.xlu1 %v1631_v38 }
 0x5b3   : >> { %v1629_v39 = vmul.f32 1.442695, %v1620_v35 }
 0x5b4   : >> { %v1909_v37 = vpop.xlane.xlu1 %1908 }
 0x5b5   : >> { %4192 = vpow2.f32 %v1629_v39  ;;  %v1922_v6 = vsub.f32 %v5217_v48, %v1909_v37 }
 0x5b7   : >> { %v5300_v41 = vpop.eup %4188  ;;  %4154 = vrot.lane.b32.xlu0 %v5009_v52, %s4483_s7  ;;  %v1927_v31 = vmul.f32 1.442695, %v1922_v6 }
 0x5b8   : >> { %v1912_v45 = vpop.xlane.xlu0 %1911  ;;  %v1637_v46 = vsel %vm1292_vm8, %v5300_v41, 0.0 }
 0x5b9   : >> { %v1923_v49 = vsub.f32 %v5222_v54, %v1912_v45  ;;  %1638 = vadd.xlane.f32.xlu1 %v1637_v46 }
 0x5bb   : >> { %v5307_v50 = vpop.eup %4190  ;;  %v1929_v51 = vmul.f32 1.442695, %v1923_v49 }
 0x5bc   : >> { %v1915_v43 = vpop.xlane.xlu1 %1914  ;;  %v1640_v55 = vsel %vm1292_vm8, %v5307_v50, 0.0 }
 0x5bd   : >> { %4194 = vpow2.f32 %v1929_v51  ;;  %v1924_v56 = vsub.f32 %v5227_v60, %v1915_v43  ;;  %1641 = vadd.xlane.f32.xlu1 %v1640_v55 }
 0x5bf   : >> { %v5312_v59 = vpop.eup %4192  ;;  %v1931_v61 = vmul.f32 1.442695, %v1924_v56 }
 0x5c0   : >> { %v1918_v9 = vpop.xlane.xlu0 %1917  ;;  %v1643_v54 = vsel %vm1305_vm9, %v5312_v59, 0.0 }
 0x5c1   : >> { %4196 = vpow2.f32 %v1931_v61  ;;  %v1925_v7 = vsub.f32 %v5232_v58, %v1918_v9  ;;  %1644 = vadd.xlane.f32.xlu1 %v1643_v54 }
 0x5c3   : >> { %v1933_v11 = vmul.f32 1.442695, %v1925_v7 }
 0x5c4   : >> { %v1921_v15 = vpop.xlane.xlu1 %1920 }
 0x5c5   : >> { %4198 = vpow2.f32 %v1933_v11  ;;  %v1926_v60 = vsub.f32 %v5237_v12, %v1921_v15 }
 0x5c6   : >> { %4200 = vpow2.f32 %v1320_v13 }
 0x5c7   : >> { %v5320_v18 = vpop.eup %4194  ;;  %v1935_v20 = vmul.f32 1.442695, %v1926_v60 }
 0x5c8   : >> { %v1940_v21 = vsel %vm1292_vm8, %v5320_v18, 0.0  ;;  %v2215_v58 = vpop.xlane.xlu0 %2214 }
 0x5c9   : >> { %4202 = vpow2.f32 %v1935_v20  ;;  %1941 = vadd.xlane.f32.xlu1 %v1940_v21  ;;  %v2228_v23 = vsub.f32 %v5242_v17, %v2215_v58  ;;  %v4142_v58 = vunpack.i.h.bf16 %v5268_v42 }
 0x5ca   : >> { %4204 = vpow2.f32 %v1623_v19 }
 0x5cb   : >> { %v5325_v24 = vpop.eup %4196  ;;  %4206 = vpow2.f32 %v1927_v31  ;;  %v2233_v30 = vmul.f32 1.442695, %v2228_v23  ;;  %v4141_v31 = vunpack.i.l.bf16 %v5268_v42 }
 0x5cc   : >> { %v2218_v12 = vpop.xlane.xlu1 %2217  ;;  %v1943_v26 = vsel %vm1292_vm8, %v5325_v24, 0.0 }
 0x5cd   : >> { %v2229_v29 = vsub.f32 %v5247_v22, %v2218_v12  ;;  %1944 = vadd.xlane.f32.xlu1 %v1943_v26  ;;  %v4147_v26 = vunpack.i.h.bf16 %v5124_v57 }
 0x5cf   : >> { %v5331_v48 = vpop.eup %4198  ;;  %v2235_v27 = vmul.f32 1.442695, %v2229_v29 }
 0x5d0   : >> { %v2221_v33 = vpop.xlane.xlu0 %2220  ;;  %v1946_v34 = vsel %vm1292_vm8, %v5331_v48, 0.0  ;;  %v5336_v17 = vpop.eup %4200 }
 0x5d1   : >> { %4208 = vpow2.f32 %v2235_v27  ;;  %v2230_v38 = vsub.f32 %v5252_v28, %v2221_v33  ;;  %1947 = vadd.xlane.f32.xlu1 %v1946_v34  ;;  %v1333_v37 = vsel %vm1292_vm8, %v5336_v17, 0.0  ;;  %v5366_v9 = vpop.permute.xlu1 %4149 }
 0x5d2   : >> { %4210 = vpow2.f32 %v2233_v30 }
 0x5d3   : >> { %v5338_v35 = vpop.eup %4202  ;;  %v2237_v39 = vmul.f32 1.442695, %v2230_v38 }
 0x5d4   : >> { %v1949_v22 = vsel %vm1305_vm9, %v5338_v35, 0.0  ;;  %v5344_v45 = vpop.eup %4204 }
 0x5d5   : >> { %4212 = vpow2.f32 %v2237_v39  ;;  %1950 = vadd.xlane.f32.xlu1 %v1949_v22  ;;  %v1634_v28 = vsel %vm1292_vm8, %v5344_v45, 0.0  ;;  %v5348_v46 = vpop.eup %4206 }
 0x5d6   : >> { %1334 = vadd.xlane.f32.xlu0 %v1333_v37  ;;  %v1937_v43 = vsel %vm1292_vm8, %v5348_v46, 0.0 }
 0x5d8   : >> { %v2227_v54 = vpop.xlane.xlu0 %2226 }
 0x5d9   : >> { %v2232_v7 = vsub.f32 %v5257_v36, %v2227_v54 }
 0x5da   : >> { %1635 = vadd.xlane.f32.xlu0 %v1634_v28 }
 0x5db   : >> { %v5350_v49 = vpop.eup %4208  ;;  %v2241_v15 = vmul.f32 1.442695, %v2232_v7 }
 0x5dc   : >> { %v2246_v51 = vsel %vm1292_vm8, %v5350_v49, 0.0  ;;  %v5356_v55 = vpop.eup %4210 }
 0x5dd   : >> { %2247 = vadd.xlane.f32.xlu1 %v2246_v51  ;;  %v2243_v8 = vsel %vm1292_vm8, %v5356_v55, 0.0  ;;  %v4152_v51 = vunpack.i.h.bf16 %v5366_v9 }
 0x5de   : >> { %1938 = vadd.xlane.f32.xlu0 %v1937_v43  ;;  %v4151_v43 = vunpack.i.l.bf16 %v5366_v9 }
 0x5df   : >> { %v5358_v56 = vpop.eup %4212 }
 0x5e0   : >> { %v2249_v61 = vsel %vm1292_vm8, %v5358_v56, 0.0  ;;  %v3957_v7 = vpack.c.bf16 %v4152_v51, %v4151_v43 }
 0x5e1   : >> { %2250 = vadd.xlane.f32.xlu1 %v2249_v61 }
 0x5e2   : >> { %2244 = vadd.xlane.f32.xlu0 %v2243_v8 }
 0x5f8   : >> { %1970 = vrot.lane.b32.xlu0 %v5013_v53, %s4483_s7 }
 0x601   : >> { %v2224_v11 = vpop.xlane.xlu1 %2223 }
 0x602   : >> { %v2231_v13 = vsub.f32 %v5264_v40, %v2224_v11 }
 0x604   : >> { %v2239_v14 = vmul.f32 1.442695, %v2231_v13 }
 0x606   : >> { %4214 = vpow2.f32 %v2239_v14 }
 0x607   : >> { %4216 = vpow2.f32 %v2241_v15 }
 0x610   : >> { %v5370_v60 = vpop.eup %4214 }
 0x611   : >> { %v2252_v20 = vsel %vm1292_vm8, %v5370_v60, 0.0  ;;  %v5374_v19 = vpop.eup %4216 }
 0x612   : >> { %2253 = vadd.xlane.f32.xlu1 %v2252_v20  ;;  %v2255_v6 = vsel %vm1305_vm9, %v5374_v19, 0.0 }
 0x617   : >> { %2256 = vadd.xlane.f32.xlu0 %v2255_v6 }
 0x623   : >> { %4159 = vrot.lane.b32.xlu1 %v5000_v47, %s4484_s26  ;;  %v4146_v47 = vunpack.i.l.bf16 %v5124_v57 }
 0x625   : >> { %v3946_v42 = vpack.c.bf16 %v4147_v26, %v4146_v47 }
 0x627   : >> { %4164 = vrot.lane.b32.xlu1 %v5009_v52, %s4484_s26  ;;  %v3943_v52 = vpack.c.bf16 %v4142_v58, %v4141_v31 }
 0x62a   : >> { %v1326_v36 = vpop.xlane.xlu1 %1325 }
 0x62b   : >> { %4218 = vrcp.f32 %v1326_v36  ;;  %2276 = vrot.lane.b32.xlu1 %v5013_v53, %s4484_s26  ;;  %s5808_s26 = sld [smem:[#allocation23_spill]] }
 0x62e   : >> { %v1329_v40 = vpop.xlane.xlu0 %1328 }
 0x62f   : >> { %4220 = vrcp.f32 %v1329_v40 }
 0x632   : >> { %v1332_v21 = vpop.xlane.xlu1 %1331 }
 0x633   : >> { %4222 = vrcp.f32 %v1332_v21 }
 0x635   : >> { %v4219_v23 = vpop.eup %4218 }
 0x636   : >> { %v1340_v12 = vmul.f32 %v4219_v23, %v5275_v5 }
 0x638   : >> { %3669 = vmatmul.mubr.msk.f32.vlgmr.msra.gmra.mrb[10].mxu0 %vm1292_vm8, %v1340_v12 }
 0x639   : >> { %v4221_v29 = vpop.eup %4220  ;;  %3944 = vmatpush3.bf16.msra.mxu0 %v3943_v52  ;;  %3671 = vmatprep.mubr.msk.f32.mxu0 %vm4472_vm4, %v4473_v63 }
 0x63a   : >> { %3945 = vmatprep.subr.bf16.mxu0 %v4471_v62  ;;  %v1342_v53 = vmul.f32 %v4221_v29, %v5280_v10  ;;  %v4155_v10 = vpop.permute.xlu0 %4154  ;;  %v1338_v27 = vpop.xlane.xlu1 %1337 }
 0x63b   : >> { %v4157_v11 = vunpack.i.h.bf16 %v4155_v10  ;;  %v4156_v13 = vunpack.i.l.bf16 %v4155_v10 }
 0x63c   : >> { %3672 = vmatmul.mubr.msk.f32.gmra.mrb[12].mxu0 %vm1292_vm8, %v1342_v53 }
 0x63d   : >> { %v4223_v5 = vpop.eup %4222  ;;  %3947 = vmatpush3.bf16.msra.mxu0 %v3946_v42  ;;  %3674 = vmatprep.mubr.msk.f32.mxu0 %vm4472_vm4, %v4473_v63  ;;  %v3960_v20 = vpack.c.bf16 %v4157_v11, %v4156_v13 }
 0x63e   : >> { %3716 = vmatprep.subr.mxu0 %v4473_v63  ;;  %v1344_v57 = vmul.f32 %v4223_v5, %v5285_v16  ;;  %v1633_v33 = vpop.xlane.xlu1 %1632 }
 0x640   : >> { %3675 = vmatmul.mubr.msk.f32.gmra.mrb[14].mxu0 %vm1292_vm8, %v1344_v57 }
 0x641   : >> { %3717 = vmatpush3.msk.msra.mxu0 %vm1378_vm7, %v5270_v44  ;;  %3677 = vmatprep.mubr.msk.f32.mxu0 %vm4472_vm4, %v4473_v63 }
 0x642   : >> { %3956 = vmatprep.subr.bf16.mxu0 %v4471_v62 }
 0x646   : >> { %v1639_v34 = vpop.xlane.xlu1 %1638 }
 0x64a   : >> { %v1642_v39 = vpop.xlane.xlu1 %1641 }
 0x64e   : >> { %v1645_v61 = vpop.xlane.xlu1 %1644 }
 0x663   : >> { %v1335_v30 = vpop.xlane.xlu0 %1334 }
 0x664   : >> { %4224 = vrcp.f32 %v1335_v30 }
 0x665   : >> { %4226 = vrcp.f32 %v1338_v27 }
 0x666   : >> { %4228 = vrcp.f32 %v1633_v33 }
 0x667   : >> { %v1636_v38 = vpop.xlane.xlu0 %1635 }
 0x668   : >> { %4230 = vrcp.f32 %v1636_v38 }
 0x669   : >> { %4232 = vrcp.f32 %v1639_v34 }
 0x66a   : >> { %4234 = vrcp.f32 %v1642_v39 }
 0x66b   : >> { %v1939_v8 = vpop.xlane.xlu0 %1938  ;;  %4236 = vrcp.f32 %v1645_v61 }
 0x66c   : >> { %4238 = vrcp.f32 %v1939_v8 }
 0x66e   : >> { %v4225_v16 = vpop.eup %4224 }
 0x66f   : >> { %v1346_v22 = vmul.f32 %v4225_v16, %v5336_v17  ;;  %v4227_v44 = vpop.eup %4226  ;;  %v2245_v9 = vpop.xlane.xlu0 %2244 }
 0x670   : >> { %v1348_v37 = vmul.f32 %v4227_v44, %v5290_v25  ;;  %v4229_v28 = vpop.eup %4228  ;;  %v1942_v25 = vpop.xlane.xlu1 %1941 }
 0x671   : >> { %3678 = vmatmul.mubr.msk.f32.gmra.mrb[16].mxu0 %vm1292_vm8, %v1346_v22  ;;  %v1647_v17 = vmul.f32 %v4229_v28, %v5295_v32  ;;  %4240 = vrcp.f32 %v1942_v25 }
 0x672   : >> { %3680 = vmatprep.mubr.msk.f32.mxu0 %vm4472_vm4, %v4473_v63  ;;  %v4231_v54 = vpop.eup %4230 }
 0x673   : >> { %v1649_v14 = vmul.f32 %v4231_v54, %v5344_v45  ;;  %v4233_v15 = vpop.eup %4232  ;;  %v1971_v40 = vpop.permute.xlu0 %1970 }
 0x674   : >> { %v1945_v32 = vpop.xlane.xlu1 %1944  ;;  %v1651_v6 = vmul.f32 %v4233_v15, %v5300_v41  ;;  %v4235_v36 = vpop.eup %4234 }
 0x675   : >> { %3681 = vmatmul.mubr.msk.f32.gmra.mrb[18].mxu0 %vm1292_vm8, %v1348_v37  ;;  %v1653_v45 = vmul.f32 %v4235_v36, %v5307_v50  ;;  %v4237_v21 = vpop.eup %4236  ;;  %4242 = vrcp.f32 %v1945_v32 }
 0x676   : >> { %3718 = vmatprep.mubr.msk.f32.mxu0 %vm4472_vm4, %v4473_v63  ;;  %v1655_v41 = vmul.f32 %v4237_v21, %v5312_v59  ;;  %v4239_v31 = vpop.eup %4238  ;;  %v2466_v21 = vld [vmem:[%s2465_s16] sm:$0xff] }
 0x677   : >> { %v1953_v23 = vmul.f32 %v4239_v31, %v5348_v46 }
 0x678   : >> { %v1948_v58 = vpop.xlane.xlu1 %1947 }
 0x679   : >> { %3719 = vmatmul.mubr.msk.f32.vlgmr.msra.gmra.mrb[20].mxu0 %vm1292_vm8, %v1647_v17  ;;  %4244 = vrcp.f32 %v1948_v58  ;;  %v2467_v58 = vld [vmem:[%s2465_s16 + $0x8] sm:$0xff] }
 0x67a   : >> { %3958 = vmatpush3.bf16.msra.mxu0 %v3957_v7  ;;  %3721 = vmatprep.mubr.msk.f32.mxu0 %vm4472_vm4, %v4473_v63 }
 0x67b   : >> { %3959 = vmatprep.subr.bf16.mxu0 %v4471_v62  ;;  %v4241_v12 = vpop.eup %4240 }
 0x67c   : >> { %v1951_v50 = vpop.xlane.xlu1 %1950  ;;  %v1955_v26 = vmul.f32 %v4241_v12, %v5320_v18 }
 0x67d   : >> { %3722 = vmatmul.mubr.msk.f32.gmra.mrb[22].mxu0 %vm1292_vm8, %v1649_v14  ;;  %4246 = vrcp.f32 %v1951_v50  ;;  %v3977_v50 = vpack.c.bf16 %v2467_v58, %v2466_v21  ;;  %v3446_v21 = vld [vmem:[%s2470_s18] ss:$0 sm:$0xff] }
 0x67e   : >> { %3961 = vmatpush3.bf16.msra.mxu0 %v3960_v20  ;;  %3724 = vmatprep.mubr.msk.f32.mxu0 %vm4472_vm4, %v4473_v63  ;;  %4248 = vrcp.f32 %v2245_v9 }
 0x67f   : >> { %3766 = vmatprep.subr.mxu0 %v4473_v63  ;;  %v4243_v59 = vpop.eup %4242  ;;  %4004 = vmatpush3.bf16.msra.mxu1 %v3977_v50 }
 0x680   : >> { %v1957_v47 = vmul.f32 %v4243_v59, %v5325_v24  ;;  %v2248_v29 = vpop.xlane.xlu1 %2247  ;;  %4003 = vmatprep.subr.bf16.mxu1 %v4471_v62 }
 0x681   : >> { %3725 = vmatmul.mubr.msk.f32.gmra.mrb[24].mxu0 %vm1292_vm8, %v1651_v6  ;;  %4250 = vrcp.f32 %v2248_v29 }
 0x682   : >> { %3767 = vmatpush3.msk.msra.mxu0 %vm1378_vm7, %v1971_v40  ;;  %3727 = vmatprep.mubr.msk.f32.mxu0 %vm4472_vm4, %v4473_v63 }
 0x683   : >> { %3970 = vmatprep.subr.bf16.mxu0 %v4471_v62  ;;  %v4245_v52 = vpop.eup %4244 }
 0x684   : >> { %v1959_v46 = vmul.f32 %v4245_v52, %v5331_v48  ;;  %v2251_v18 = vpop.xlane.xlu1 %2250 }
 0x685   : >> { %3728 = vmatmul.mubr.msk.f32.gmra.mrb[26].mxu0 %vm1292_vm8, %v1653_v45  ;;  %4252 = vrcp.f32 %v2251_v18 }
 0x686   : >> { %3730 = vmatprep.mubr.msk.f32.mxu0 %vm4472_vm4, %v4473_v63 }
 0x687   : >> { %v4247_v53 = vpop.eup %4246 }
 0x688   : >> { %v1961_v42 = vmul.f32 %v4247_v53, %v5338_v35  ;;  %v4249_v34 = vpop.eup %4248 }
 0x689   : >> { %3731 = vmatmul.mubr.msk.f32.gmra.mrb[28].mxu0 %vm1292_vm8, %v1655_v41  ;;  %v2259_v38 = vmul.f32 %v4249_v34, %v5356_v55  ;;  %v2468_v41 = vld [vmem:[%s2465_s16 + $0x10] sm:$0xff] }
 0x68a   : >> { %3768 = vmatprep.mubr.msk.f32.mxu0 %vm4472_vm4, %v4473_v63 }
 0x68b   : >> { %v4251_v22 = vpop.eup %4250 }
 0x68c   : >> { %v2261_v44 = vmul.f32 %v4251_v22, %v5350_v49 }
 0x68d   : >> { %3769 = vmatmul.mubr.msk.f32.vlgmr.msra.gmra.mrb[30].mxu0 %vm1292_vm8, %v1953_v23  ;;  %v2469_v23 = vld [vmem:[%s2465_s16 + $0x18] sm:$0xff] }
 0x68e   : >> { %3771 = vmatprep.mubr.msk.f32.mxu0 %vm4472_vm4, %v4473_v63 }
 0x68f   : >> { %v4253_v37 = vpop.eup %4252 }
 0x690   : >> { %v2263_v55 = vmul.f32 %v4253_v37, %v5358_v56 }
 0x691   : >> { %3772 = vmatmul.mubr.msk.f32.gmra.mrb[32].mxu0 %vm1292_vm8, %v1955_v26  ;;  %v3980_v26 = vpack.c.bf16 %v2469_v23, %v2468_v41 }
 0x692   : >> { %3774 = vmatprep.mubr.msk.f32.mxu0 %vm4472_vm4, %v4473_v63 }
 0x693   : >> { %4005 = vmatpush3.bf16.msra.mxu1 %v3980_v26 }
 0x694   : >> { %3988 = vmatprep.subr.bf16.mxu1 %v4471_v62 }
 0x695   : >> { %3775 = vmatmul.mubr.msk.f32.gmra.mrb[34].mxu0 %vm1292_vm8, %v1957_v47 }
 0x696   : >> { %3777 = vmatprep.mubr.msk.f32.mxu0 %vm4472_vm4, %v4473_v63 }
 0x699   : >> { %3778 = vmatmul.mubr.msk.f32.gmra.mrb[36].mxu0 %vm1292_vm8, %v1959_v46 }
 0x69a   : >> { %3780 = vmatprep.mubr.msk.f32.mxu0 %vm4472_vm4, %v4473_v63 }
 0x69d   : >> { %3781 = vmatmul.mubr.msk.f32.gmra.mrb[38].mxu0 %vm1292_vm8, %v1961_v42 }
 0x69e   : >> { %3818 = vmatprep.mubr.msk.f32.mxu0 %vm4472_vm4, %v4473_v63 }
 0x69f   : >> { %v2254_v24 = vpop.xlane.xlu1 %2253 }
 0x6a0   : >> { %4254 = vrcp.f32 %v2254_v24 }
 0x6a3   : >> { %v4160_v5 = vpop.permute.xlu1 %4159 }
 0x6a4   : >> { %v4162_v57 = vunpack.i.h.bf16 %v4160_v5  ;;  %v4161_v10 = vunpack.i.l.bf16 %v4160_v5  ;;  %v2257_v16 = vpop.xlane.xlu0 %2256 }
 0x6a5   : >> { %4256 = vrcp.f32 %v2257_v16 }
 0x6a6   : >> { %v3971_v48 = vpack.c.bf16 %v4162_v57, %v4161_v10 }
 0x6a7   : >> { %v4165_v27 = vpop.permute.xlu1 %4164 }
 0x6a8   : >> { %v4167_v30 = vunpack.i.h.bf16 %v4165_v27  ;;  %v4166_v33 = vunpack.i.l.bf16 %v4165_v27  ;;  %3972 = vmatpush3.bf16.msra.mxu0 %v3971_v48 }
 0x6a9   : >> { %3973 = vmatprep.subr.bf16.mxu0 %v4471_v62 }
 0x6aa   : >> { %v3974_v35 = vpack.c.bf16 %v4167_v30, %v4166_v33  ;;  %v4255_v28 = vpop.eup %4254 }
 0x6ab   : >> { %v2277_v39 = vpop.permute.xlu1 %2276  ;;  %v2265_v51 = vmul.f32 %v4255_v28, %v5370_v60 }
 0x6ac   : >> { %3975 = vmatpush3.bf16.msra.mxu0 %v3974_v35 }
 0x6ad   : >> { %3816 = vmatprep.subr.mxu0 %v4473_v63 }
 0x6af   : >> { %v4257_v43 = vpop.eup %4256 }
 0x6b0   : >> { %3817 = vmatpush3.msk.msra.mxu0 %vm1378_vm7, %v2277_v39  ;;  %v2267_v49 = vmul.f32 %v4257_v43, %v5374_v19 }
 0x6b1   : >> { %3819 = vmatmul.mubr.msk.f32.vlgmr.msra.gmra.mrb[40].mxu0 %vm1292_vm8, %v2259_v38  ;;  %3976 = vmatprep.subr.bf16.mxu0 %v4471_v62 }
 0x6b2   : >> { %3821 = vmatprep.mubr.msk.f32.mxu0 %vm4472_vm4, %v4473_v63  ;;  %3978 = vmatpush3.bf16.msra.mxu0 %v3977_v50 }
 0x6b3   : >> { %3979 = vmatprep.subr.bf16.mxu0 %v4471_v62 }
 0x6b5   : >> { %3822 = vmatmul.mubr.msk.f32.gmra.mrb[42].mxu0 %vm1292_vm8, %v2261_v44 }
 0x6b6   : >> { %3824 = vmatprep.mubr.msk.f32.mxu0 %vm4472_vm4, %v4473_v63  ;;  %3981 = vmatpush3.bf16.msra.mxu0 %v3980_v26 }
 0x6b7   : >> { %3982 = vmatprep.subr.bf16.mxu0 %v4471_v62 }
 0x6b9   : >> { %3825 = vmatmul.mubr.msk.f32.gmra.mrb[44].mxu0 %vm1292_vm8, %v2263_v55 }
 0x6ba   : >> { %3827 = vmatprep.mubr.msk.f32.mxu0 %vm4472_vm4, %v4473_v63 }
 0x6bd   : >> { %3828 = vmatmul.mubr.msk.f32.gmra.mrb[46].mxu0 %vm1292_vm8, %v2265_v51 }
 0x6be   : >> { %3830 = vmatprep.mubr.msk.f32.mxu0 %vm4472_vm4, %v4473_v63 }
 0x6c1   : >> { %3831 = vmatmul.mubr.msk.f32.gmra.mrb[48].mxu0 %vm1292_vm8, %v2267_v49 }
 0x6c2   : >> { %3841 = vmatprep.mubr.msk.f32.mxu0 %vm4472_vm4, %v4473_v63 }
 0x70b   : >> { %v5480_v56 = vpop.f32.mrb[10].mxu0 }
 0x70c   : >> { %v3670_v61 = vpop.f32.mrb[11].mxu0 }
 0x70f   : >> { %v5482_v8 = vpop.f32.mrb[12].mxu0 }
 0x710   : >> { %v3673_v17 = vpop.f32.mrb[13].mxu0 }
 0x713   : >> { %v5484_v60 = vpop.f32.mrb[14].mxu0 }
 0x714   : >> { %v3676_v54 = vpop.f32.mrb[15].mxu0 }
 0x744   : >> { %v5486_v7 = vpop.f32.mrb[16].mxu0 }
 0x745   : >> { %v3679_v11 = vpop.f32.mrb[17].mxu0 }
 0x748   : >> { %v5488_v19 = vpop.f32.mrb[18].mxu0 }
 0x749   : >> { %v3682_v13 = vpop.f32.mrb[19].mxu0 }
 0x74c   : >> { %v1753_v25 = vpop.f32.mrb[20].mxu0 }
 0x74d   : >> { %2394 = vrot.lane.b32.xlu1 %v1753_v25, %s4485_s17  ;;  %v3720_v9 = vpop.f32.mrb[21].mxu0 }
 0x750   : >> { %v1758_v14 = vpop.f32.mrb[22].mxu0 }
 0x751   : >> { %2396 = vrot.lane.b32.xlu1 %v1758_v14, %s4485_s17  ;;  %v3723_v15 = vpop.f32.mrb[23].mxu0 }
 0x754   : >> { %v1763_v20 = vpop.f32.mrb[24].mxu0 }
 0x755   : >> { %2398 = vrot.lane.b32.xlu1 %v1763_v20, %s4485_s17  ;;  %v3726_v32 = vpop.f32.mrb[25].mxu0 }
 0x758   : >> { %v1768_v6 = vpop.f32.mrb[26].mxu0 }
 0x759   : >> { %v3729_v36 = vpop.f32.mrb[27].mxu0 }
 0x75c   : >> { %v1773_v40 = vpop.f32.mrb[28].mxu0 }
 0x75d   : >> { %v3732_v45 = vpop.f32.mrb[29].mxu0 }
 0x760   : >> { %v2059_v31 = vpop.f32.mrb[30].mxu0 }
 0x761   : >> { %2414 = vrot.lane.b32.xlu0 %v2059_v31, %s4486_s0  ;;  %v3770_v12 = vpop.f32.mrb[31].mxu0  ;;  %v4288_v31 = vld [vmem:[#allocation2] sm:$0xff] }
 0x764   : >> { %v2064_v59 = vpop.f32.mrb[32].mxu0 }
 0x765   : >> { %2416 = vrot.lane.b32.xlu1 %v2064_v59, %s4486_s0  ;;  %v3773_v47 = vpop.f32.mrb[33].mxu0 }
 0x766   : >> { %v4289_v47 = vld [vmem:[#allocation2 + $0x8] sm:$0xff] }
 0x768   : >> { %v2069_v52 = vpop.f32.mrb[34].mxu0 }
 0x769   : >> { %2418 = vrot.lane.b32.xlu1 %v2069_v52, %s4486_s0  ;;  %v3776_v29 = vpop.f32.mrb[35].mxu0 }
 0x76c   : >> { %v2074_v46 = vpop.f32.mrb[36].mxu0 }
 0x76d   : >> { %2420 = vrot.lane.b32.xlu0 %v2074_v46, %s4486_s0  ;;  %v3779_v53 = vpop.f32.mrb[37].mxu0 }
 0x770   : >> { %v2079_v18 = vpop.f32.mrb[38].mxu0 }
 0x771   : >> { %v3782_v42 = vpop.f32.mrb[39].mxu0 }
 0x772   : >> { %v4290_v42 = vld [vmem:[#allocation2 + $0x10] sm:$0xff] }
 0x784   : >> { %v2365_v24 = vpop.f32.mrb[40].mxu0 }
 0x785   : >> { %2434 = vrot.lane.b32.xlu1 %v2365_v24, %s4487_s24  ;;  %v3820_v5 = vpop.f32.mrb[41].mxu0 }
 0x788   : >> { %v2370_v57 = vpop.f32.mrb[42].mxu0 }
 0x789   : >> { %2436 = vrot.lane.b32.xlu1 %v2370_v57, %s4487_s24  ;;  %v3823_v10 = vpop.f32.mrb[43].mxu0 }
 0x78c   : >> { %v2375_v48 = vpop.f32.mrb[44].mxu0 }
 0x78d   : >> { %2400 = vrot.lane.b32.xlu1 %v1768_v6, %s4485_s17  ;;  %2438 = vrot.lane.b32.xlu0 %v2375_v48, %s4487_s24  ;;  %v3826_v27 = vpop.f32.mrb[45].mxu0 }
 0x78e   : >> { %v4291_v27 = vld [vmem:[#allocation2 + $0x18] sm:$0xff] }
 0x790   : >> { %v2380_v30 = vpop.f32.mrb[46].mxu0 }
 0x791   : >> { %2402 = vrot.lane.b32.xlu0 %v1773_v40, %s4485_s17  ;;  %2440 = vrot.lane.b32.xlu1 %v2380_v30, %s4487_s24  ;;  %v3829_v33 = vpop.f32.mrb[47].mxu0  ;;  %s5809_s17 = scalar_lea.vmem %s5808_s26, %s4824_s20 }
 0x792   : >> { %s2588_s21 = scalar_lea.vmem %s5809_s17, %s4463_s27  ;;  %s2942_s17 = scalar_lea.vmem %s819_s29, %s4463_s27 }
 0x794   : >> { %v2385_v35 = vpop.f32.mrb[48].mxu0 }
 0x795   : >> { %2422 = vrot.lane.b32.xlu1 %v2079_v18, %s4486_s0  ;;  %2442 = vrot.lane.b32.xlu0 %v2385_v35, %s4487_s24  ;;  %v3832_v34 = vpop.f32.mrb[49].mxu0 }
 0x7bf   : >> { %v2395_v38 = vpop.permute.xlu1 %2394 }
 0x7c0   : >> { %v2449_v55 = vsel %vm1181_vm5, %v5480_v56, %v2395_v38 }
 0x7c3   : >> { %v2397_v16 = vpop.permute.xlu1 %2396 }
 0x7c4   : >> { %v2450_v49 = vsel %vm1181_vm5, %v5482_v8, %v2397_v16  ;;  %v4292_v16 = vld [vmem:[#allocation2 + $0x20] sm:$0xf] }
 0x7c7   : >> { %v2399_v39 = vpop.permute.xlu1 %2398 }
 0x7c8   : >> { %v2451_v56 = vsel %vm1181_vm5, %v5484_v60, %v2399_v39 }
 0x7d3   : >> { %v2415_v37 = vpop.permute.xlu0 %2414 }
 0x7d4   : >> { %v2454_v28 = vsel %vm837_vm1, %v2449_v55, %v2415_v37 }
 0x7d7   : >> { %v2417_v22 = vpop.permute.xlu1 %2416 }
 0x7d8   : >> { %v2455_v61 = vsel %vm837_vm1, %v2450_v49, %v2417_v22 }
 0x7db   : >> { %v2419_v44 = vpop.permute.xlu1 %2418 }
 0x7dc   : >> { %v2456_v13 = vsel %vm837_vm1, %v2451_v56, %v2419_v44 }
 0x7df   : >> { %v2421_v17 = vpop.permute.xlu0 %2420 }
 0x7f7   : >> { %v2435_v51 = vpop.permute.xlu1 %2434 }
 0x7f8   : >> { %v2460_v43 = vsel %vm2459_vm10, %v2454_v28, %v2435_v51 }
 0x7f9   : >> { %3842 = vmatmul.mubr.msk.f32.vlgmr.msra.gmra.mrb[50].mxu0 %vm938_vm2, %v2460_v43 }
 0x7fa   : >> { %3864 = vmatprep.mubr.msk.f32.mxu0 %vm4472_vm4, %v4473_v63 }
 0x7fb   : >> { %v2437_v54 = vpop.permute.xlu1 %2436 }
 0x7fc   : >> { %v2461_v11 = vsel %vm2459_vm10, %v2455_v61, %v2437_v54 }
 0x7fd   : >> { %3845 = vmatmul.mubr.msk.f32.vlgmr.msra.gmra.mrb[40].mxu1 %vm938_vm2, %v2461_v11 }
 0x7fe   : >> { %3847 = vmatprep.mubr.msk.f32.mxu1 %vm4472_vm4, %v4473_v63 }
 0x7ff   : >> { %v2401_v8 = vpop.permute.xlu1 %2400  ;;  %v2439_v25 = vpop.permute.xlu0 %2438 }
 0x800   : >> { %v2452_v9 = vsel %vm1181_vm5, %v5486_v7, %v2401_v8  ;;  %v2462_v14 = vsel %vm2459_vm10, %v2456_v13, %v2439_v25 }
 0x801   : >> { %3848 = vmatmul.mubr.msk.f32.gmra.mrb[42].mxu1 %vm938_vm2, %v2462_v14  ;;  %v2457_v60 = vsel %vm837_vm1, %v2452_v9, %v2421_v17 }
 0x802   : >> { %3850 = vmatprep.mubr.msk.f32.mxu1 %vm4472_vm4, %v4473_v63 }
 0x803   : >> { %v2403_v15 = vpop.permute.xlu0 %2402  ;;  %v2441_v20 = vpop.permute.xlu1 %2440 }
 0x804   : >> { %v2463_v32 = vsel %vm2459_vm10, %v2457_v60, %v2441_v20  ;;  %v2453_v7 = vsel %vm1181_vm5, %v5488_v19, %v2403_v15 }
 0x805   : >> { %3851 = vmatmul.mubr.msk.f32.gmra.mrb[44].mxu1 %vm938_vm2, %v2463_v32 }
 0x806   : >> { %3853 = vmatprep.mubr.msk.f32.mxu1 %vm4472_vm4, %v4473_v63 }
 0x807   : >> { %v2423_v6 = vpop.permute.xlu1 %2422  ;;  %v2443_v36 = vpop.permute.xlu0 %2442 }
 0x808   : >> { %v2458_v40 = vsel %vm837_vm1, %v2453_v7, %v2423_v6 }
 0x809   : >> { %v2464_v45 = vsel %vm2459_vm10, %v2458_v40, %v2443_v36 }
 0x80a   : >> { %3854 = vmatmul.mubr.msk.f32.gmra.mrb[46].mxu1 %vm938_vm2, %v2464_v45  ;;  %v2680_v45 = vld [vmem:[%s2679_s15] sm:$0xff] }
 0x80b   : >> { %3895 = vmatprep.mubr.msk.f32.mxu1 %vm4472_vm4, %v4473_v63 }
 0x8cc   : >> { %v2559_v58 = vpop.f32.mrb[50].mxu0 }
 0x8cd   : >> { %v2560_v41 = vadd.f32 %v3446_v21, %v2559_v58  ;;  %v3843_v19 = vpop.f32.mrb[51].mxu0 }
 0x8ce   : >> { %v2683_v19 = vld [vmem:[%s2679_s15 + $0x18] sm:$0xff] }
 0x8cf   : >> { %v5548_v50 = vadd.f32 %v4288_v31, %v2560_v41  ;;  %v2682_v41 = vld [vmem:[%s2679_s15 + $0x10] sm:$0xff] }
 0x8d0   : >> { %v2564_v23 = vpop.f32.mrb[40].mxu1  ;;  %v3986_v31 = vpack.c.bf16 %v2683_v19, %v2682_v41 }
 0x8d1   : >> { %v2565_v12 = vadd.f32 %v3446_v21, %v2564_v23  ;;  %v3846_v26 = vpop.f32.mrb[41].mxu1  ;;  %v2592_v59 = vsel %vm938_vm2, %v5548_v50, 0.0 }
 0x8d2   : >> { %2593 = vadd.xlane.f32.xlu1 %v2592_v59 }
 0x8d3   : >> { %v5552_v52 = vadd.f32 %v4289_v47, %v2565_v12 }
 0x8d4   : >> { %v2569_v29 = vpop.f32.mrb[42].mxu1 }
 0x8d5   : >> { %v2570_v46 = vadd.f32 %v3446_v21, %v2569_v29  ;;  %v3849_v53 = vpop.f32.mrb[43].mxu1  ;;  %v2595_v18 = vsel %vm938_vm2, %v5552_v52, 0.0 }
 0x8d6   : >> { %2596 = vadd.xlane.f32.xlu0 %v2595_v18 }
 0x8d7   : >> { %v5556_v24 = vadd.f32 %v4290_v42, %v2570_v46 }
 0x8d8   : >> { %v2574_v5 = vpop.f32.mrb[44].mxu1 }
 0x8d9   : >> { %v2575_v57 = vadd.f32 %v3446_v21, %v2574_v5  ;;  %v3852_v10 = vpop.f32.mrb[45].mxu1  ;;  %v2598_v48 = vsel %vm938_vm2, %v5556_v24, 0.0 }
 0x8da   : >> { %2599 = vadd.xlane.f32.xlu0 %v2598_v48  ;;  %v3452_v48 = vld [vmem:[%s2588_s21] ss:$0 sm:$0xff] }
 0x8db   : >> { %v5560_v30 = vadd.f32 %v4291_v27, %v2575_v57 }
 0x8dd   : >> { %v2579_v33 = vpop.f32.mrb[46].mxu1  ;;  %v2601_v35 = vsel %vm938_vm2, %v5560_v30, 0.0 }
 0x8de   : >> { %v2580_v34 = vadd.f32 %v3446_v21, %v2579_v33  ;;  %v3855_v38 = vpop.f32.mrb[47].mxu1  ;;  %2602 = vadd.xlane.f32.xlu1 %v2601_v35  ;;  %v2681_v21 = vld [vmem:[%s2679_s15 + $0x8] sm:$0xff]  ;;  %v3453_v35 = vld [vmem:[%s2590_s3] ss:$0 sm:$0xff]  ;;  %s2684_s15 = scalar_lea.vmem %s815_s11, %s4463_s27  ;;  %s956_s27 = sadd.s32 1, %s4463_s27  }
 0x8df   : >> { %v3983_v58 = vpack.c.bf16 %v2681_v21, %v2680_v45  ;;  %v2940_v45 = vld [vmem:[%s2933_s1 + $0x30] sm:$0xff]  ;;  %v2941_v21 = vld [vmem:[%s2933_s1 + $0x38] sm:$0xff]  ;;  %v3454_v41 = vld [vmem:[%s2684_s15] ss:$0 sm:$0xff]  ;;  %p953_p3 = scmp.ge.s32.totalorder %s956_s27, 4  }
 0x8e0   : >> { %v5564_v39 = vadd.f32 %v4292_v16, %v2580_v34 }
 0x8e1   : >> { %3984 = vmatpush3.bf16.msra.mxu0 %v3983_v58  ;;  %v3998_v58 = vpack.c.bf16 %v2941_v21, %v2940_v45 }
 0x8e2   : >> { %v2604_v22 = vsel %vm978_vm3, %v5564_v39, 0.0  ;;  %3985 = vmatprep.subr.bf16.mxu0 %v4471_v62 }
 0x8e3   : >> { %2605 = vadd.xlane.f32.xlu0 %v2604_v22 }
 0x8e5   : >> { %3987 = vmatpush3.bf16.msra.mxu0 %v3986_v31 }
 0x95f   : >> { %v2594_v44 = vpop.xlane.xlu1 %2593 }
 0x960   : >> { %v2607_v37 = vmul.f32 0.03125, %v2594_v44 }
 0x962   : >> { %v2612_v55 = vsub.f32 %v5548_v50, %v2607_v37 }
 0x963   : >> { %v2597_v28 = vpop.xlane.xlu0 %2596 }
 0x964   : >> { %v2608_v51 = vmul.f32 0.03125, %v2597_v28  ;;  %v2617_v43 = vmul.f32 %v2612_v55, %v2612_v55 }
 0x966   : >> { %v2613_v49 = vsub.f32 %v5552_v52, %v2608_v51  ;;  %v2622_v61 = vsel %vm938_vm2, %v2617_v43, 0.0 }
 0x967   : >> { %v2600_v17 = vpop.xlane.xlu0 %2599  ;;  %2623 = vadd.xlane.f32.xlu1 %v2622_v61 }
 0x968   : >> { %v2609_v54 = vmul.f32 0.03125, %v2600_v17  ;;  %v2618_v11 = vmul.f32 %v2613_v49, %v2613_v49 }
 0x96a   : >> { %v5572_v56 = vsub.f32 %v5556_v24, %v2609_v54  ;;  %v2625_v13 = vsel %vm938_vm2, %v2618_v11, 0.0 }
 0x96b   : >> { %2626 = vadd.xlane.f32.xlu0 %v2625_v13  ;;  %v2603_v8 = vpop.xlane.xlu1 %2602 }
 0x96c   : >> { %v2610_v25 = vmul.f32 0.03125, %v2603_v8  ;;  %v2619_v9 = vmul.f32 %v5572_v56, %v5572_v56 }
 0x96e   : >> { %v5578_v14 = vsub.f32 %v5560_v30, %v2610_v25  ;;  %v2628_v60 = vsel %vm938_vm2, %v2619_v9, 0.0 }
 0x96f   : >> { %2629 = vadd.xlane.f32.xlu1 %v2628_v60  ;;  %v2935_v60 = vld [vmem:[%s2933_s1 + $0x8] sm:$0xff] }
 0x970   : >> { %v2606_v15 = vpop.xlane.xlu0 %2605  ;;  %v2620_v20 = vmul.f32 %v5578_v14, %v5578_v14 }
 0x971   : >> { %v2611_v32 = vmul.f32 0.03125, %v2606_v15 }
 0x972   : >> { %v2631_v7 = vsel %vm938_vm2, %v2620_v20, 0.0  ;;  %v2936_v20 = vld [vmem:[%s2933_s1 + $0x10] sm:$0xff] }
 0x973   : >> { %v2616_v6 = vsub.f32 %v5564_v39, %v2611_v32  ;;  %2632 = vadd.xlane.f32.xlu0 %v2631_v7  ;;  %v2937_v32 = vld [vmem:[%s2933_s1 + $0x18] sm:$0xff] }
 0x974   : >> { %v3992_v7 = vpack.c.bf16 %v2937_v32, %v2936_v20 }
 0x975   : >> { %v2621_v36 = vmul.f32 %v2616_v6, %v2616_v6 }
 0x977   : >> { %v2634_v40 = vsel %vm978_vm3, %v2621_v36, 0.0  ;;  %v2939_v36 = vld [vmem:[%s2933_s1 + $0x28] sm:$0xff] }
 0x978   : >> { %2635 = vadd.xlane.f32.xlu1 %v2634_v40 }
 0x9f4   : >> { %v2624_v23 = vpop.xlane.xlu1 %2623 }
 0x9f5   : >> { %v2637_v12 = vmul.f32 0.03125, %v2624_v23 }
 0x9f7   : >> { %v2642_v26 = vadd.f32 1e-05, %v2637_v12 }
 0x9f8   : >> { %v2627_v59 = vpop.xlane.xlu0 %2626 }
 0x9f9   : >> { %4258 = vrsqrt.f32 %v2642_v26  ;;  %v2638_v47 = vmul.f32 0.03125, %v2627_v59 }
 0x9fb   : >> { %v2643_v29 = vadd.f32 1e-05, %v2638_v47 }
 0x9fc   : >> { %v2630_v46 = vpop.xlane.xlu1 %2629 }
 0x9fd   : >> { %4260 = vrsqrt.f32 %v2643_v29  ;;  %v2639_v53 = vmul.f32 0.03125, %v2630_v46 }
 0x9ff   : >> { %v2644_v18 = vadd.f32 1e-05, %v2639_v53 }
 0xa00   : >> { %v2633_v42 = vpop.xlane.xlu0 %2632 }
 0xa01   : >> { %4262 = vrsqrt.f32 %v2644_v18  ;;  %v2640_v5 = vmul.f32 0.03125, %v2633_v42 }
 0xa03   : >> { %v4259_v57 = vpop.eup %4258  ;;  %v2645_v10 = vadd.f32 1e-05, %v2640_v5 }
 0xa04   : >> { %v2652_v27 = vmul.f32 %v4259_v57, %v2612_v55 }
 0xa05   : >> { %4264 = vrsqrt.f32 %v2645_v10  ;;  %v2636_v33 = vpop.xlane.xlu1 %2635 }
 0xa06   : >> { %v2641_v34 = vmul.f32 0.03125, %v2636_v33  ;;  %v2663_v38 = vmul.f32 %v3452_v48, %v2652_v27 }
 0xa07   : >> { %v4261_v16 = vpop.eup %4260 }
 0xa08   : >> { %v2646_v22 = vadd.f32 1e-05, %v2641_v34  ;;  %v2674_v44 = vadd.f32 %v3453_v35, %v2663_v38  ;;  %v2653_v37 = vmul.f32 %v4261_v16, %v2613_v49 }
 0xa0a   : >> { %4266 = vrsqrt.f32 %v2646_v22  ;;  %3865 = vmatmul.mubr.msk.f32.vlgmr.msra.gmra.mrb[52].mxu0 %vm938_vm2, %v2674_v44  ;;  %v2664_v28 = vmul.f32 %v3452_v48, %v2653_v37 }
 0xa0b   : >> { %v4263_v51 = vpop.eup %4262  ;;  %3867 = vmatprep.mubr.msk.f32.mxu0 %vm4472_vm4, %v4473_v63 }
 0xa0c   : >> { %v2675_v43 = vadd.f32 %v3453_v35, %v2664_v28  ;;  %v2654_v55 = vmul.f32 %v4263_v51, %v5572_v56 }
 0xa0e   : >> { %3868 = vmatmul.mubr.msk.f32.gmra.mrb[54].mxu0 %vm938_vm2, %v2675_v43  ;;  %v2665_v61 = vmul.f32 %v3452_v48, %v2654_v55 }
 0xa0f   : >> { %v4265_v17 = vpop.eup %4264  ;;  %3870 = vmatprep.mubr.msk.f32.mxu0 %vm4472_vm4, %v4473_v63 }
 0xa10   : >> { %v2676_v49 = vadd.f32 %v3453_v35, %v2665_v61  ;;  %v2655_v54 = vmul.f32 %v4265_v17, %v5578_v14  ;;  %v2934_v14 = vld [vmem:[%s2933_s1] sm:$0xff] }
 0xa11   : >> { %v3989_v15 = vpack.c.bf16 %v2935_v60, %v2934_v14 }
 0xa12   : >> { %3871 = vmatmul.mubr.msk.f32.gmra.mrb[56].mxu0 %vm938_vm2, %v2676_v49  ;;  %v2666_v11 = vmul.f32 %v3452_v48, %v2655_v54 }
 0xa13   : >> { %3873 = vmatprep.mubr.msk.f32.mxu0 %vm4472_vm4, %v4473_v63  ;;  %3990 = vmatpush3.bf16.msra.mxu1 %v3989_v15 }
 0xa14   : >> { %v4267_v13 = vpop.eup %4266  ;;  %v2677_v56 = vadd.f32 %v3453_v35, %v2666_v11  ;;  %3991 = vmatprep.subr.bf16.mxu1 %v4471_v62 }
 0xa15   : >> { %v2656_v8 = vmul.f32 %v4267_v13, %v2616_v6  ;;  %v2938_v6 = vld [vmem:[%s2933_s1 + $0x20] sm:$0xff] }
 0xa16   : >> { %3874 = vmatmul.mubr.msk.f32.gmra.mrb[58].mxu0 %vm938_vm2, %v2677_v56  ;;  %v3995_v40 = vpack.c.bf16 %v2939_v36, %v2938_v6 }
 0xa17   : >> { %3876 = vmatprep.mubr.msk.f32.mxu0 %vm4472_vm4, %v4473_v63  ;;  %v2667_v25 = vmul.f32 %v3452_v48, %v2656_v8  ;;  %3993 = vmatpush3.bf16.msra.mxu1 %v3992_v7 }
 0xa18   : >> { %3994 = vmatprep.subr.bf16.mxu1 %v4471_v62 }
 0xa19   : >> { %v2678_v9 = vadd.f32 %v3453_v35, %v2667_v25 }
 0xa1b   : >> { %3877 = vmatmul.mubr.msk.f32.gmra.mrb[60].mxu0 %vm938_vm2, %v2678_v9  ;;  %3996 = vmatpush3.bf16.msra.mxu1 %v3995_v40 }
 0xa1c   : >> { %3997 = vmatprep.subr.bf16.mxu1 %v4471_v62 }
 0xa1f   : >> { %3999 = vmatpush3.bf16.msra.mxu1 %v3998_v58 }
 0xadd   : >> { %v2773_v19 = vpop.f32.mrb[52].mxu0 }
 0xade   : >> { %v5628_v31 = vadd.f32 %v3454_v41, %v2773_v19  ;;  %v3866_v23 = vpop.f32.mrb[53].mxu0 }
 0xae0   : >> { %v5631_v12 = vmul.f32 0.70710677, %v5628_v31 }
 0xae1   : >> { %v2778_v26 = vpop.f32.mrb[54].mxu0 }
 0xae2   : >> { %v2817_v62 = vand.u32 2147483647, %v5631_v12  ;;  %v5634_v59 = vadd.f32 %v3454_v41, %v2778_v26  ;;  %v3869_v47 = vpop.f32.mrb[55].mxu0  ;;  %vm2807_vm11 = vcmp.ge.f32.partialorder %v5631_v12, 0.0 }
 0xae4   : >> { %v2822_v29 = vmul.f32 0.3275911, %v2817_v62  ;;  %v5637_v46 = vmul.f32 0.70710677, %v5634_v59  ;;  %v2887_v16 = vsub.f32 0.0, %v2817_v62 }
 0xae5   : >> { %v2783_v53 = vpop.f32.mrb[56].mxu0 }
 0xae6   : >> { %v2827_v18 = vadd.f32 1.0, %v2822_v29  ;;  %v2818_v42 = vand.u32 2147483647, %v5637_v46  ;;  %v3872_v5 = vpop.f32.mrb[57].mxu0  ;;  %v5640_v57 = vadd.f32 %v3454_v41, %v2783_v53  ;;  %v2892_v61 = vmul.f32 %v2887_v16, %v2817_v62 }
 0xae7   : >> { %vm2808_vm12 = vcmp.ge.f32.partialorder %v5637_v46, 0.0 }
 0xae8   : >> { %4268 = vrcp.f32 %v2827_v18  ;;  %v2823_v10 = vmul.f32 0.3275911, %v2818_v42  ;;  %v5643_v48 = vmul.f32 0.70710677, %v5640_v57  ;;  %v2888_v54 = vsub.f32 0.0, %v2818_v42 }
 0xae9   : >> { %v2788_v27 = vpop.f32.mrb[58].mxu0  ;;  %v2897_v9 = vmul.f32 1.442695, %v2892_v61 }
 0xaea   : >> { %v2828_v33 = vadd.f32 1.0, %v2823_v10  ;;  %v5645_v35 = vadd.f32 %v3454_v41, %v2788_v27  ;;  %v3875_v34 = vpop.f32.mrb[59].mxu0  ;;  %v2819_v38 = vand.u32 2147483647, %v5643_v48  ;;  %v2893_v60 = vmul.f32 %v2888_v54, %v2818_v42 }
 0xaeb   : >> { %vm2809_vm14 = vcmp.ge.f32.partialorder %v5643_v48, 0.0 }
 0xaec   : >> { %4270 = vrcp.f32 %v2828_v33  ;;  %v2824_v22 = vmul.f32 0.3275911, %v2819_v38  ;;  %v5649_v44 = vmul.f32 0.70710677, %v5645_v35  ;;  %v2889_v7 = vsub.f32 0.0, %v2819_v38 }
 0xaed   : >> { %v2899_v45 = vmul.f32 1.442695, %v2893_v60 }
 0xaee   : >> { %v2793_v37 = vpop.f32.mrb[60].mxu0  ;;  %v2829_v28 = vadd.f32 1.0, %v2824_v22  ;;  %v2820_v51 = vand.u32 2147483647, %v5649_v44  ;;  %v2894_v19 = vmul.f32 %v2889_v7, %v2819_v38  ;;  %vm2810_vm15 = vcmp.ge.f32.partialorder %v5649_v44, 0.0 }
 0xaef   : >> { %v3878_v43 = vpop.f32.mrb[61].mxu0  ;;  %v5652_v55 = vadd.f32 %v3454_v41, %v2793_v37 }
 0xaf0   : >> { %4272 = vrcp.f32 %v2829_v28  ;;  %v2825_v17 = vmul.f32 0.3275911, %v2820_v51  ;;  %v2890_v23 = vsub.f32 0.0, %v2820_v51  ;;  %v2901_v5 = vmul.f32 1.442695, %v2894_v19 }
 0xaf1   : >> { %v5655_v11 = vmul.f32 0.70710677, %v5652_v55 }
 0xaf2   : >> { %v4269_v49 = vpop.eup %4268  ;;  %v2830_v56 = vadd.f32 1.0, %v2825_v17  ;;  %v2895_v10 = vmul.f32 %v2890_v23, %v2820_v51 }
 0xaf3   : >> { %v2842_v13 = vmul.f32 1.0614054, %v4269_v49  ;;  %v2821_v8 = vand.u32 2147483647, %v5655_v11  ;;  %vm2811_vm5 = vcmp.ge.f32.partialorder %v5655_v11, 0.0 }
 0xaf4   : >> { %4274 = vrcp.f32 %v2830_v56  ;;  %v2903_v17 = vmul.f32 1.442695, %v2895_v10 }
 0xaf5   : >> { %v2847_v25 = vadd.f32 -1.4531521, %v2842_v13  ;;  %v2826_v15 = vmul.f32 0.3275911, %v2821_v8  ;;  %4276 = vpow2.f32 %v2897_v9  ;;  %v2891_v34 = vsub.f32 0.0, %v2821_v8 }
 0xaf6   : >> { %v4271_v14 = vpop.eup %4270 }
 0xaf7   : >> { %v2852_v20 = vmul.f32 %v4269_v49, %v2847_v25  ;;  %v2843_v32 = vmul.f32 1.0614054, %v4271_v14  ;;  %v2831_v6 = vadd.f32 1.0, %v2826_v15  ;;  %v2896_v25 = vmul.f32 %v2891_v34, %v2821_v8 }
 0xaf9   : >> { %v2857_v36 = vadd.f32 1.4214138, %v2852_v20  ;;  %v2848_v40 = vadd.f32 -1.4531521, %v2843_v32  ;;  %4278 = vrcp.f32 %v2831_v6 }
 0xafa   : >> { %v4273_v21 = vpop.eup %4272  ;;  %4280 = vpow2.f32 %v2899_v45 }
 0xafb   : >> { %v2862_v58 = vmul.f32 %v4269_v49, %v2857_v36  ;;  %v2853_v41 = vmul.f32 %v4271_v14, %v2848_v40  ;;  %v2844_v26 = vmul.f32 1.0614054, %v4273_v21  ;;  %4282 = vpow2.f32 %v2901_v5 }
 0xafc   : >> { %4284 = vpow2.f32 %v2903_v17  ;;  %v4488_v36 = vmov -1.0  }
 0xafd   : >> { %v2867_v62 = vadd.f32 -0.28449672, %v2862_v58  ;;  %v2858_v47 = vadd.f32 1.4214138, %v2853_v41  ;;  %v2849_v29 = vadd.f32 -1.4531521, %v2844_v26 }
 0xafe   : >> { %v5658_v53 = vpop.eup %4274  ;;  %v2812_v40 = vsel %vm2807_vm11, 1.0, %v4488_v36  ;;  %v2905_v41 = vmul.f32 1.442695, %v2896_v25 }
 0xaff   : >> { %v2872_v18 = vmul.f32 %v4269_v49, %v2867_v62  ;;  %v2863_v42 = vmul.f32 %v4271_v14, %v2858_v47  ;;  %v2854_v27 = vmul.f32 %v4273_v21, %v2849_v29  ;;  %v2845_v33 = vmul.f32 1.0614054, %v5658_v53  ;;  %v4277_v28 = vpop.eup %4276 }
 0xb00   : >> { %4286 = vpow2.f32 %v2905_v41 }
 0xb01   : >> { %v2877_v16 = vadd.f32 0.2548296, %v2872_v18  ;;  %v2868_v22 = vadd.f32 -0.28449672, %v2863_v42  ;;  %v2859_v37 = vadd.f32 1.4214138, %v2854_v27 }
 0xb02   : >> { %v2850_v38 = vadd.f32 -1.4531521, %v2845_v33  ;;  %v2813_v18 = vsel %vm2808_vm12, 1.0, %v4488_v36 }
 0xb03   : >> { %v2882_v43 = vmul.f32 %v4269_v49, %v2877_v16  ;;  %v2873_v61 = vmul.f32 %v4271_v14, %v2868_v22  ;;  %v5661_v54 = vpop.eup %4278  ;;  %v2864_v13 = vmul.f32 %v4273_v21, %v2859_v37  ;;  %v2798_v22 = vmul.f32 0.5, %v5634_v59 }
 0xb04   : >> { %v2855_v56 = vmul.f32 %v5658_v53, %v2850_v38  ;;  %v2846_v60 = vmul.f32 1.0614054, %v5661_v54  ;;  %v4281_v6 = vpop.eup %4280 }
 0xb05   : >> { %v2907_v51 = vmul.f32 %v4277_v28, %v2882_v43  ;;  %v2878_v9 = vadd.f32 0.2548296, %v2873_v61  ;;  %v2869_v15 = vadd.f32 -0.28449672, %v2864_v13  ;;  %v4283_v10 = vpop.eup %4282  ;;  %v2814_v61 = vsel %vm2809_vm14, 1.0, %v4488_v36 }
 0xb06   : >> { %v2860_v20 = vadd.f32 1.4214138, %v2855_v56  ;;  %v2851_v49 = vadd.f32 -1.4531521, %v2846_v60  ;;  %v4285_v28 = vpop.eup %4284  ;;  %v2799_v56 = vmul.f32 0.5, %v5640_v57 }
 0xb07   : >> { %v2912_v32 = vsub.f32 1.0, %v2907_v51  ;;  %v2883_v7 = vmul.f32 %v4271_v14, %v2878_v9  ;;  %v2874_v45 = vmul.f32 %v4273_v21, %v2869_v15  ;;  %v2797_v14 = vmul.f32 0.5, %v5628_v31 }
 0xb08   : >> { %v2865_v58 = vmul.f32 %v5658_v53, %v2860_v20  ;;  %v2856_v19 = vmul.f32 %v5661_v54, %v2851_v49 }
 0xb09   : >> { %v2917_v8 = vmul.f32 %v2912_v32, %v2812_v40  ;;  %v2908_v12 = vmul.f32 %v4281_v6, %v2883_v7  ;;  %v2879_v23 = vadd.f32 0.2548296, %v2874_v45  ;;  %v2800_v32 = vmul.f32 0.5, %v5645_v35  ;;  %v3461_v35 = vld [vmem:[%s2942_s17] ss:$0 sm:$0xff] }
 0xb0a   : >> { %v2870_v26 = vadd.f32 -0.28449672, %v2865_v58  ;;  %v2861_v29 = vadd.f32 1.4214138, %v2856_v19  ;;  %v4287_v60 = vpop.eup %4286  ;;  %v2816_v6 = vsel %vm2811_vm5, 1.0, %v4488_v36  ;;  %v2801_v40 = vmul.f32 0.5, %v5652_v55 }
 0xb0b   : >> { %v2922_v62 = vadd.f32 1.0, %v2917_v8  ;;  %v2913_v47 = vsub.f32 1.0, %v2908_v12  ;;  %v2884_v42 = vmul.f32 %v4273_v21, %v2879_v23 }
 0xb0c   : >> { %v2875_v5 = vmul.f32 %v5658_v53, %v2870_v26  ;;  %v2866_v46 = vmul.f32 %v5661_v54, %v2861_v29 }
 0xb0d   : >> { %v2927_v27 = vmul.f32 %v2922_v62, %v2797_v14  ;;  %v2918_v33 = vmul.f32 %v2913_v47, %v2813_v18  ;;  %v2909_v34 = vmul.f32 %v4283_v10, %v2884_v42 }
 0xb0e   : >> { %v2880_v16 = vadd.f32 0.2548296, %v2875_v5  ;;  %v2871_v37 = vadd.f32 -0.28449672, %v2866_v46 }
 0xb0f   : >> { %v2923_v31 = vadd.f32 1.0, %v2918_v33  ;;  %3896 = vmatmul.mubr.msk.f32.vlgmr.msra.gmra.mrb[48].mxu1 %vm2950_vm13, %v2927_v27  ;;  %v2914_v38 = vsub.f32 1.0, %v2909_v34 }
 0xb10   : >> { %v2885_v21 = vmul.f32 %v5658_v53, %v2880_v16  ;;  %3898 = vmatprep.mubr.msk.f32.mxu1 %vm4472_vm4, %v4473_v63  ;;  %v2876_v17 = vmul.f32 %v5661_v54, %v2871_v37  ;;  %v2815_v53 = vsel %vm2810_vm15, 1.0, %v4488_v36 }
 0xb11   : >> { %v2928_v43 = vmul.f32 %v2923_v31, %v2798_v22  ;;  %v2919_v48 = vmul.f32 %v2914_v38, %v2814_v61 }
 0xb12   : >> { %v2910_v13 = vmul.f32 %v4285_v28, %v2885_v21  ;;  %v2881_v59 = vadd.f32 0.2548296, %v2876_v17 }
 0xb13   : >> { %3899 = vmatmul.mubr.msk.f32.gmra.mrb[50].mxu1 %vm2950_vm13, %v2928_v43  ;;  %v2924_v25 = vadd.f32 1.0, %v2919_v48 }
 0xb14   : >> { %v2915_v51 = vsub.f32 1.0, %v2910_v13  ;;  %3901 = vmatprep.mubr.msk.f32.mxu1 %vm4472_vm4, %v4473_v63  ;;  %v2886_v9 = vmul.f32 %v5661_v54, %v2881_v59 }
 0xb15   : >> { %v2929_v15 = vmul.f32 %v2924_v25, %v2799_v56 }
 0xb16   : >> { %v2920_v20 = vmul.f32 %v2915_v51, %v2815_v53  ;;  %v2911_v44 = vmul.f32 %v4287_v60, %v2886_v9 }
 0xb17   : >> { %3902 = vmatmul.mubr.msk.f32.gmra.mrb[52].mxu1 %vm2950_vm13, %v2929_v15 }
 0xb18   : >> { %v2925_v7 = vadd.f32 1.0, %v2920_v20  ;;  %v2916_v57 = vsub.f32 1.0, %v2911_v44  ;;  %3904 = vmatprep.mubr.msk.f32.mxu1 %vm4472_vm4, %v4473_v63 }
 0xb1a   : >> { %v2930_v49 = vmul.f32 %v2925_v7, %v2800_v32  ;;  %v2921_v54 = vmul.f32 %v2916_v57, %v2816_v6 }
 0xb1c   : >> { %3905 = vmatmul.mubr.msk.f32.gmra.mrb[54].mxu1 %vm2950_vm13, %v2930_v49  ;;  %v2926_v11 = vadd.f32 1.0, %v2921_v54 }
 0xb1d   : >> { %3907 = vmatprep.mubr.msk.f32.mxu1 %vm4472_vm4, %v4473_v63 }
 0xb1e   : >> { %v2931_v45 = vmul.f32 %v2926_v11, %v2801_v40 }
 0xb20   : >> { %3908 = vmatmul.mubr.msk.f32.gmra.mrb[56].mxu1 %vm2950_vm13, %v2931_v45 }
 0xbe2   : >> { %v3032_v58 = vpop.f32.mrb[48].mxu1 }
 0xbe3   : >> { %v3033_v36 = vadd.f32 %v3461_v35, %v3032_v58  ;;  %v3897_v41 = vpop.f32.mrb[49].mxu1 }
 0xbe5   : >> { %v3056_v8 = vadd.f32 %v3033_v36, %v5548_v50 }
 0xbe6   : >> { %v3037_v12 = vpop.f32.mrb[50].mxu1 }
 0xbe7   : >> { %3061 = vst.msk [vmem:[#allocation2] sm:$0xff] %vm938_vm2, %v3056_v8  ;;  %v3038_v55 = vadd.f32 %v3461_v35, %v3037_v12  ;;  %v3900_v19 = vpop.f32.mrb[51].mxu1 }
 0xbe9   : >> { %v3057_v63 = vadd.f32 %v3038_v55, %v5552_v52 }
 0xbea   : >> { %v3042_v23 = vpop.f32.mrb[52].mxu1 }
 0xbeb   : >> { %3062 = vst.msk [vmem:[#allocation2 + $0x8] sm:$0xff] %vm938_vm2, %v3057_v63  ;;  %v3043_v26 = vadd.f32 %v3461_v35, %v3042_v23  ;;  %v3903_v14 = vpop.f32.mrb[53].mxu1 }
 0xbed   : >> { %v3058_v62 = vadd.f32 %v3043_v26, %v5556_v24 }
 0xbee   : > { %v3066_v24 = vld [vmem:[#allocation2] sm:$0x1] (%p953_p3) }
 0xbef   : >> { %v3047_v47 = vpop.f32.mrb[54].mxu1  ;;  %3063 = vst.msk [vmem:[#allocation2 + $0x10] sm:$0xff] %vm938_vm2, %v3058_v62 }
 0xbf0   : >> { %v3048_v29 = vadd.f32 %v3461_v35, %v3047_v47  ;;  %v3906_v18 = vpop.f32.mrb[55].mxu1  ;;  %3067 = vst.msk [vmem:[%s4883_s2] sm:$0x1] (%p953_p3), %vm936_vm0, %v3066_v24 }
 0xbf2   : >> { %v3059_v50 = vadd.f32 %v3048_v29, %v5560_v30  ;;  %955 = sbr.rel (!%p953_p3) target bundleno = 387 (0x183), region = 209  ;;  %v3068_v30 = vld [vmem:[#allocation2 + $0x9] sm:$0x1] (%p953_p3) }
 0xbf3   : >> { %v3052_v42 = vpop.f32.mrb[56].mxu1  ;;  %3069 = vst.msk [vmem:[%s4883_s2 + $0x1] sm:$0x1] (%p953_p3), %vm936_vm0, %v3068_v30 }
 0xbf4   : >> { %3064 = vst.msk [vmem:[#allocation2 + $0x18] sm:$0xff] %vm938_vm2, %v3059_v50  ;;  %v3053_v5 = vadd.f32 %v3461_v35, %v3052_v42  ;;  %v3909_v10 = vpop.f32.mrb[57].mxu1 }
 0xbf6   : >> { %v3060_v52 = vadd.f32 %v3053_v5, %v5564_v39  ;;  %v3070_v27 = vld [vmem:[#allocation2 + $0x12] sm:$0x1] (%p953_p3) }
 0xbf7   : > { %3071 = vst.msk [vmem:[%s4883_s2 + $0x2] sm:$0x1] (%p953_p3), %vm936_vm0, %v3070_v27 }
 0xbf8   : >> { %3065 = vst.msk [vmem:[#allocation2 + $0x20] sm:$0xf] %vm978_vm3, %v3060_v52 }
 0xbfb   : > { %v3072_v39 = vld [vmem:[#allocation2 + $0x1b] sm:$0x1] }
 0xbfc   : > { %3073 = vst.msk [vmem:[%s4883_s2 + $0x3] sm:$0x1] %vm936_vm0, %v3072_v39 }
 0xbfd PF: > { %s5813_s24 = sld [smem:[#allocation14_spill]]  ;;  %s5814_s27 = sld [smem:[#allocation13_spill]] }
 0xbfe   : > { %s5815_s23 = sld [smem:[#allocation15_spill]]  ;;  %s5816_s21 = smov %s4451_s22 }
 0xc03   : > { %p32_p5 = scmp.ge.s32.totalorder %s5813_s24, 4   ;;  %s5817_s22 = smov %s5814_s27 }
 0xc05   :  { %34 = sbr.rel (!%p32_p5) target bundleno = 20 (0x14), region = 220 }
 0xc0c   :  { %3093 = vsyncpa [#allocation4], 1 }
 0xc0d   :  { %3095 = vsyncpa [#allocation4 + $0x1], 1 }
 0xc0e   :  { %3096 = vsyncpa [#allocation6], 1 }
 0xc0f   :  { %3098 = vsyncpa [#allocation6 + $0x1], 1 }
 0xc10   :  { %3099 = vsyncpa [#allocation9], 1 }
 0xc11   :  { %3101 = vsyncpa [#allocation9 + $0x1], 1 }

</bundles_post_ra>
